<compile_context>
chip_gen: v5e
topology: v5e:2x2
jax: 0.10.0
libtpu: 0.0.40
codegen_flags: <defaults>
</compile_context>

<pallas_src>
import jax
import jax.numpy as jnp
from jax import lax
from jax.experimental import pallas as pl
from jax.experimental.pallas import tpu as pltpu


def _batch_tile(n):
    """Largest convenient batch-row tile (multiple of 8) that divides n."""
    for t in (512, 256, 128, 64, 32, 16, 8):
        if n % t == 0:
            return t
    return n


def _time_chunk(T, cap=16):
    """Largest divisor of T that is <= cap (time-chunk for the LSTM kernel)."""
    for t in range(min(T, cap), 0, -1):
        if T % t == 0:
            return t
    return 1


# ----------------------------------------------------------------------------
# Kernel 1: fused encoder (Linear + ReLU) and hoisted LSTM input projection,
# emitting gates directly TIME-MAJOR (no XLA transpose afterwards).
#   gates[t, n, :] = relu(x[n, t] @ enc_w + enc_b) @ w_ih + (b_ih + b_hh)
# ----------------------------------------------------------------------------
def _encode_ih_kernel(x_ref, ew_ref, eb_ref, wih_ref, b_ref, g_ref):
    x = x_ref[...]                                             # bf16 (tn, CHW)
    z = jnp.dot(x, ew_ref[...], preferred_element_type=jnp.float32)
    z = jnp.maximum(z + eb_ref[...], 0.0)                      # ReLU in f32
    g = jnp.dot(z.astype(jnp.bfloat16), wih_ref[...],
                preferred_element_type=jnp.float32)
    g_ref[0] = (g + b_ref[...]).astype(g_ref.dtype)            # (tn, 4L)


def encode_ih_pallas(x2d, enc_w, enc_b, w_ih, b, T, NP):
    """x2d: (NP, T*CHW) bf16  ->  gates: (T, NP, 4L) f32 (time-major)."""
    CHW = x2d.shape[1] // T
    L = enc_w.shape[1]
    G = w_ih.shape[1]                                          # 4 * L
    tn = _batch_tile(NP)
    return pl.pallas_call(
        _encode_ih_kernel,
        out_shape=jax.ShapeDtypeStruct((T, NP, G), jnp.float32),
        grid_spec=pltpu.PrefetchScalarGridSpec(
            num_scalar_prefetch=0,
            grid=(NP // tn, T),
            in_specs=[
                pl.BlockSpec((tn, CHW), lambda n, t: (n, t)),
                pl.BlockSpec((CHW, L), lambda n, t: (0, 0)),
                pl.BlockSpec((1, L), lambda n, t: (0, 0)),
                pl.BlockSpec((L, G), lambda n, t: (0, 0)),
                pl.BlockSpec((1, G), lambda n, t: (0, 0)),
            ],
            out_specs=pl.BlockSpec((1, tn, G), lambda n, t: (t, n, 0)),
        ),
        compiler_params=pltpu.CompilerParams(
            dimension_semantics=("parallel", "parallel"),
            vmem_limit_bytes=32 * 1024 * 1024),
    )(x2d, enc_w, enc_b, w_ih, b)


# ----------------------------------------------------------------------------
# Kernel 2: LSTM recurrence, time-chunked. Input gates are precomputed; only
# h @ W_hh remains per step. Gate order i, f, g, o (PyTorch).
# ----------------------------------------------------------------------------
def _lstm_kernel(g_ref, whh_ref, h0_ref, c0_ref,
                 hseq_ref, hT_ref, cT_ref, h_sc, c_sc):
    tc = pl.program_id(0)

    @pl.when(tc == 0)
    def _():
        h_sc[...] = h0_ref[...]
        c_sc[...] = c0_ref[...]

    L = whh_ref.shape[0]
    Tc = g_ref.shape[0]
    w_hh = whh_ref[...]                                        # bf16 (L, 4L)

    def step(s, carry):
        h, c = carry                                           # f32 (NB, L)
        gates = g_ref[s] + jnp.dot(h.astype(jnp.bfloat16), w_hh,
                                   preferred_element_type=jnp.float32)
        i_g = jax.nn.sigmoid(gates[:, 0 * L:1 * L])
        f_g = jax.nn.sigmoid(gates[:, 1 * L:2 * L])
        g_g = jnp.tanh(gates[:, 2 * L:3 * L])
        o_g = jax.nn.sigmoid(gates[:, 3 * L:4 * L])
        c_new = f_g * c + i_g * g_g
        h_new = o_g * jnp.tanh(c_new)
        hseq_ref[s] = h_new.astype(hseq_ref.dtype)             # bf16 store
        return h_new, c_new

    h_fin, c_fin = lax.fori_loop(0, Tc, step, (h_sc[...], c_sc[...]),
                                 unroll=True)
    h_sc[...] = h_fin
    c_sc[...] = c_fin

    @pl.when(tc == pl.num_programs(0) - 1)
    def _():
        hT_ref[...] = h_fin.astype(hT_ref.dtype)
        cT_ref[...] = c_fin.astype(cT_ref.dtype)


def lstm_pallas(gates_tm, w_hh, h0, c0):
    """gates_tm: (T, NB, 4L) time-major precomputed input gates (f32)."""
    T, NB, G = gates_tm.shape
    L = w_hh.shape[0]
    Tc = _time_chunk(T)
    out_shapes = (
        jax.ShapeDtypeStruct((T, NB, L), jnp.bfloat16),   # hseq (bf16 MXU lhs)
        jax.ShapeDtypeStruct((NB, L), jnp.float32),       # h_T
        jax.ShapeDtypeStruct((NB, L), jnp.float32),       # c_T
    )
    return pl.pallas_call(
        _lstm_kernel,
        out_shape=out_shapes,
        grid_spec=pltpu.PrefetchScalarGridSpec(
            num_scalar_prefetch=0,
            grid=(T // Tc,),
            in_specs=[
                pl.BlockSpec((Tc, NB, G), lambda t: (t, 0, 0)),
                pl.BlockSpec((L, G), lambda t: (0, 0)),
                pl.BlockSpec((NB, L), lambda t: (0, 0)),
                pl.BlockSpec((NB, L), lambda t: (0, 0)),
            ],
            out_specs=[
                pl.BlockSpec((Tc, NB, L), lambda t: (t, 0, 0)),
                pl.BlockSpec((NB, L), lambda t: (0, 0)),
                pl.BlockSpec((NB, L), lambda t: (0, 0)),
            ],
            scratch_shapes=[
                pltpu.VMEM((NB, L), jnp.float32),
                pltpu.VMEM((NB, L), jnp.float32),
            ],
        ),
        compiler_params=pltpu.CompilerParams(
            dimension_semantics=("arbitrary",),   # sequential recurrence
            vmem_limit_bytes=32 * 1024 * 1024),
    )(gates_tm, w_hh, h0, c0)


# ----------------------------------------------------------------------------
# Kernel 3: fused rnn output projection + decoder + sigmoid, reading the
# time-major hidden sequence directly (no XLA transpose before it).
#   ys[n, t] = sigmoid((hseq[t, n] @ proj_w + proj_b) @ dec_w + dec_b)
# ----------------------------------------------------------------------------
def _proj_dec_kernel(h_ref, pw_ref, pb_ref, dw_ref, db_ref, y_ref):
    h = h_ref[0]                                               # bf16 (tn, L)
    z = jnp.dot(h, pw_ref[...], preferred_element_type=jnp.float32) + pb_ref[...]
    y = jnp.dot(z.astype(jnp.bfloat16), dw_ref[...],
                preferred_element_type=jnp.float32) + db_ref[...]
    y_ref[...] = jax.nn.sigmoid(y).astype(y_ref.dtype)


def proj_dec_pallas(hseq, proj_w, proj_b, dec_w, dec_b, T, NP):
    """hseq: (T, NP, L) bf16  ->  ys2d: (NP, T*CHW) f32."""
    L = hseq.shape[2]
    CHW = dec_w.shape[1]
    tn = _batch_tile(NP)
    return pl.pallas_call(
        _proj_dec_kernel,
        out_shape=jax.ShapeDtypeStruct((NP, T * CHW), jnp.float32),
        grid_spec=pltpu.PrefetchScalarGridSpec(
            num_scalar_prefetch=0,
            grid=(NP // tn, T),
            in_specs=[
                pl.BlockSpec((1, tn, L), lambda n, t: (t, n, 0)),
                pl.BlockSpec((L, L), lambda n, t: (0, 0)),
                pl.BlockSpec((1, L), lambda n, t: (0, 0)),
                pl.BlockSpec((L, CHW), lambda n, t: (0, 0)),
                pl.BlockSpec((1, CHW), lambda n, t: (0, 0)),
            ],
            out_specs=pl.BlockSpec((tn, CHW), lambda n, t: (n, t)),
        ),
        compiler_params=pltpu.CompilerParams(
            dimension_semantics=("parallel", "parallel"),
            vmem_limit_bytes=32 * 1024 * 1024),
    )(hseq, proj_w, proj_b, dec_w, dec_b)


# ----------------------------------------------------------------------------
# Parameter init (deterministic, PyTorch-style uniform(-1/sqrt(fan_in), ...))
# ----------------------------------------------------------------------------
def init_params(key, latent_size, num_channels, H, W):
    chw = num_channels * H * W
    L = latent_size
    ks = jax.random.split(key, 10)

    def u(k, shape, fan_in):
        bound = 1.0 / jnp.sqrt(fan_in)
        return jax.random.uniform(k, shape, jnp.float32, -bound, bound)

    return {
        "enc_w": u(ks[0], (chw, L), chw),
        "enc_b": u(ks[1], (1, L), chw),
        "w_ih": u(ks[2], (L, 4 * L), L),
        "w_hh": u(ks[3], (L, 4 * L), L),
        "b_ih": u(ks[4], (1, 4 * L), L),
        "b_hh": u(ks[5], (1, 4 * L), L),
        "proj_w": u(ks[6], (L, L), L),
        "proj_b": u(ks[7], (1, L), L),
        "dec_w": u(ks[8], (L, chw), L),
        "dec_b": u(ks[9], (1, chw), L),
    }


# ----------------------------------------------------------------------------
# LatentLSTM forward
# ----------------------------------------------------------------------------
def latent_lstm_forward(params, input_batch, h0):
    """input_batch: (N, T, C, H, W) float32.  h0 = (h, c), each (1, N, L)."""
    N, T, C, H, W = input_batch.shape
    CHW = C * H * W
    L = params["enc_w"].shape[1]
    bf16 = jnp.bfloat16

    # Pad batch to a multiple of 8 sublanes; cast frames to bf16 fused with pad.
    NP = ((N + 7) // 8) * 8
    pad = NP - N
    xb = jnp.pad(input_batch,
                 ((0, pad), (0, 0), (0, 0), (0, 0), (0, 0))).astype(bf16)
    x2d = xb.reshape(NP, T * CHW)                      # contiguous view, no transpose

    h0_arr, c0_arr = h0
    h0p = jnp.pad(h0_arr[0], ((0, pad), (0, 0)))
    c0p = jnp.pad(c0_arr[0], ((0, pad), (0, 0)))

    # 1) fused encoder + hoisted LSTM input projection, emitted time-major.
    b_comb = params["b_ih"] + params["b_hh"]
    gates_tm = encode_ih_pallas(x2d,
                                params["enc_w"].astype(bf16), params["enc_b"],
                                params["w_ih"].astype(bf16), b_comb,
                                T, NP)                                 # (T, NP, 4L) f32

    # 2) recurrence: time-chunked, only h @ W_hh per step.
    hseq, hT, cT = lstm_pallas(gates_tm, params["w_hh"].astype(bf16),
                               h0p, c0p)                               # hseq bf16 (T, NP, L)

    # 3) fused output projection + decoder + sigmoid, consuming time-major hseq.
    ys2d = proj_dec_pallas(hseq,
                           params["proj_w"].astype(bf16), params["proj_b"],
                           params["dec_w"].astype(bf16), params["dec_b"],
                           T, NP)                                      # (NP, T*CHW) f32

    ys = ys2d.reshape(NP, T, C, H, W)[:N]
    next_h = (hT[None, :N], cT[None, :N])                              # (1, N, L) each
    return ys, next_h


def init_hidden(batch_size, latent_size):
    z = jnp.zeros((1, batch_size, latent_size), jnp.float32)
    return (z, z)


# ----------------------------------------------------------------------------
if __name__ == "__main__":
    N, T, C, H, W = 2, 8, 4, 16, 16          # CHW = 1024 (lane-dense)
    LATENT = 128                              # L = 128 -> 4L = 512 (lane-dense)

    key = jax.random.PRNGKey(0)
    k_param, k_x = jax.random.split(key)
    params = init_params(k_param, LATENT, C, H, W)

    x = jax.random.uniform(k_x, (N, T, C, H, W), jnp.float32)
    h0 = init_hidden(N, LATENT)

    fwd = jax.jit(latent_lstm_forward)
    ys, (h_n, c_n) = fwd(params, x, h0)
    jax.block_until_ready((ys, h_n, c_n))

    assert ys.shape == (N, T, C, H, W)
    assert h_n.shape == (1, N, LATENT) and c_n.shape == (1, N, LATENT)
    assert bool(jnp.all(jnp.isfinite(ys)))
    assert bool(jnp.all(jnp.isfinite(h_n))) and bool(jnp.all(jnp.isfinite(c_n)))
    print("KERNEL_OK")
</pallas_src>

<mosaic_0001>
module attributes {stable_mosaic.version = 11 : i64} {
  func.func @_lstm_kernel(%arg0: i32, %arg1: memref<8x8x512xf32, #tpu.memory_space<vmem>>, %arg2: memref<128x512xbf16, #tpu.memory_space<vmem>>, %arg3: memref<8x128xf32, #tpu.memory_space<vmem>>, %arg4: memref<8x128xf32, #tpu.memory_space<vmem>>, %arg5: memref<8x8x128xbf16, #tpu.memory_space<vmem>>, %arg6: memref<8x128xf32, #tpu.memory_space<vmem>>, %arg7: memref<8x128xf32, #tpu.memory_space<vmem>>, %arg8: memref<8x128xf32, #tpu.memory_space<vmem>>, %arg9: memref<8x128xf32, #tpu.memory_space<vmem>>) attributes {dimension_semantics = [#tpu.dimension_semantics<arbitrary>], iteration_bounds = array<i64: 1>, scalar_prefetch = 0 : i64, scratch_operands = 2 : i64, tpu.core_type = #tpu.core_type<tc>, window_params = [{transform_indices = @transform_0, window_bounds = array<i64: 8, 8, 512>}, {pipeline_mode = #tpu.pipeline_mode<synchronous>, transform_indices = @transform_1, window_bounds = array<i64: 128, 512>}, {pipeline_mode = #tpu.pipeline_mode<synchronous>, transform_indices = @transform_2, window_bounds = array<i64: 8, 128>}, {pipeline_mode = #tpu.pipeline_mode<synchronous>, transform_indices = @transform_3, window_bounds = array<i64: 8, 128>}, {transform_indices = @transform_4, window_bounds = array<i64: 8, 8, 128>}, {pipeline_mode = #tpu.pipeline_mode<synchronous>, transform_indices = @transform_5, window_bounds = array<i64: 8, 128>}, {pipeline_mode = #tpu.pipeline_mode<synchronous>, transform_indices = @transform_6, window_bounds = array<i64: 8, 128>}]} {
    %c0_i32 = arith.constant 0 : i32
    %0 = arith.cmpi eq, %arg0, %c0_i32 : i32
    %1 = arith.extui %0 : i1 to i32
    %c0_i32_0 = arith.constant 0 : i32
    %2 = arith.cmpi ne, %1, %c0_i32_0 : i32
    scf.if %2 {
      %c0_76 = arith.constant 0 : index
      %c0_77 = arith.constant 0 : index
      %299 = vector.load %arg3[%c0_76, %c0_77] : memref<8x128xf32, #tpu.memory_space<vmem>>, vector<8x128xf32>
      %c0_78 = arith.constant 0 : index
      %c0_79 = arith.constant 0 : index
      %300 = vector.load %arg8[%c0_78, %c0_79] : memref<8x128xf32, #tpu.memory_space<vmem>>, vector<8x128xf32>
      tpu.vector_store %arg8[%c0_78, %c0_79], %299 {strides = array<i32>} : memref<8x128xf32, #tpu.memory_space<vmem>>, vector<8x128xf32>,
      %c0_80 = arith.constant 0 : index
      %c0_81 = arith.constant 0 : index
      %301 = vector.load %arg4[%c0_80, %c0_81] : memref<8x128xf32, #tpu.memory_space<vmem>>, vector<8x128xf32>
      %c0_82 = arith.constant 0 : index
      %c0_83 = arith.constant 0 : index
      %302 = vector.load %arg9[%c0_82, %c0_83] : memref<8x128xf32, #tpu.memory_space<vmem>>, vector<8x128xf32>
      tpu.vector_store %arg9[%c0_82, %c0_83], %301 {strides = array<i32>} : memref<8x128xf32, #tpu.memory_space<vmem>>, vector<8x128xf32>,
    } else {
    }
    %c0 = arith.constant 0 : index
    %c0_1 = arith.constant 0 : index
    %3 = vector.load %arg2[%c0, %c0_1] : memref<128x512xbf16, #tpu.memory_space<vmem>>, vector<128x512xbf16>
    %c0_2 = arith.constant 0 : index
    %c0_3 = arith.constant 0 : index
    %4 = vector.load %arg8[%c0_2, %c0_3] : memref<8x128xf32, #tpu.memory_space<vmem>>, vector<8x128xf32>
    %c0_4 = arith.constant 0 : index
    %c0_5 = arith.constant 0 : index
    %5 = vector.load %arg9[%c0_4, %c0_5] : memref<8x128xf32, #tpu.memory_space<vmem>>, vector<8x128xf32>
    %c0_i32_6 = arith.constant 0 : i32
    %6 = arith.index_cast %c0_i32_6 : i32 to index
    %c0_7 = arith.constant 0 : index
    %c0_8 = arith.constant 0 : index
    %7 = vector.load %arg1[%6, %c0_7, %c0_8] : memref<8x8x512xf32, #tpu.memory_space<vmem>>, vector<1x8x512xf32>
    %8 = vector.shape_cast %7 : vector<1x8x512xf32> to vector<8x512xf32>
    %9 = arith.truncf %4 : vector<8x128xf32> to vector<8x128xbf16>
    %cst = arith.constant dense<0.000000e+00> : vector<8x512xf32>
    %10 = tpu.matmul %9, %3, %cst {dimension_numbers = #tpu.dot_dimension_numbers<[1], [0], [0], [1], [0, 0, 1, 1], [], []>} : vector<8x128xbf16>, vector<128x512xbf16>, vector<8x512xf32> -> vector<8x512xf32>
    %11 = arith.addf %8, %10 : vector<8x512xf32>
    %12 = vector.extract_strided_slice %11 {offsets = [0, 0], sizes = [8, 128], strides = [1, 1]} : vector<8x512xf32> to vector<8x128xf32>
    %13 = arith.negf %12 : vector<8x128xf32>
    %14 = math.exp %13 : vector<8x128xf32>
    %cst_9 = arith.constant 1.000000e+00 : f32
    %15 = vector.broadcast %cst_9 : f32 to vector<8x128xf32>
    %16 = arith.addf %15, %14 : vector<8x128xf32>
    %17 = arith.divf %15, %16 : vector<8x128xf32>
    %18 = vector.extract_strided_slice %11 {offsets = [0, 128], sizes = [8, 128], strides = [1, 1]} : vector<8x512xf32> to vector<8x128xf32>
    %19 = arith.negf %18 : vector<8x128xf32>
    %20 = math.exp %19 : vector<8x128xf32>
    %cst_10 = arith.constant 1.000000e+00 : f32
    %21 = vector.broadcast %cst_10 : f32 to vector<8x128xf32>
    %22 = arith.addf %21, %20 : vector<8x128xf32>
    %23 = arith.divf %21, %22 : vector<8x128xf32>
    %24 = vector.extract_strided_slice %11 {offsets = [0, 256], sizes = [8, 128], strides = [1, 1]} : vector<8x512xf32> to vector<8x128xf32>
    %25 = math.tanh %24 : vector<8x128xf32>
    %26 = vector.extract_strided_slice %11 {offsets = [0, 384], sizes = [8, 128], strides = [1, 1]} : vector<8x512xf32> to vector<8x128xf32>
    %27 = arith.negf %26 : vector<8x128xf32>
    %28 = math.exp %27 : vector<8x128xf32>
    %cst_11 = arith.constant 1.000000e+00 : f32
    %29 = vector.broadcast %cst_11 : f32 to vector<8x128xf32>
    %30 = arith.addf %29, %28 : vector<8x128xf32>
    %31 = arith.divf %29, %30 : vector<8x128xf32>
    %32 = arith.mulf %23, %5 : vector<8x128xf32>
    %33 = arith.mulf %17, %25 : vector<8x128xf32>
    %34 = arith.addf %32, %33 : vector<8x128xf32>
    %35 = math.tanh %34 : vector<8x128xf32>
    %36 = arith.mulf %31, %35 : vector<8x128xf32>
    %37 = arith.truncf %36 : vector<8x128xf32> to vector<8x128xbf16>
    %38 = arith.index_cast %c0_i32_6 : i32 to index
    %c0_12 = arith.constant 0 : index
    %c0_13 = arith.constant 0 : index
    %39 = vector.load %arg5[%38, %c0_12, %c0_13] : memref<8x8x128xbf16, #tpu.memory_space<vmem>>, vector<1x8x128xbf16>
    %40 = vector.shape_cast %39 : vector<1x8x128xbf16> to vector<8x128xbf16>
    %41 = vector.shape_cast %37 : vector<8x128xbf16> to vector<1x8x128xbf16>
    tpu.vector_store %arg5[%38, %c0_12, %c0_13], %41 {strides = array<i32>} : memref<8x8x128xbf16, #tpu.memory_space<vmem>>, vector<1x8x128xbf16>,
    %c1_i32 = arith.constant 1 : i32
    %42 = arith.index_cast %c1_i32 : i32 to index
    %c0_14 = arith.constant 0 : index
    %c0_15 = arith.constant 0 : index
    %43 = vector.load %arg1[%42, %c0_14, %c0_15] : memref<8x8x512xf32, #tpu.memory_space<vmem>>, vector<1x8x512xf32>
    %44 = vector.shape_cast %43 : vector<1x8x512xf32> to vector<8x512xf32>
    %45 = arith.truncf %36 : vector<8x128xf32> to vector<8x128xbf16>
    %cst_16 = arith.constant dense<0.000000e+00> : vector<8x512xf32>
    %46 = tpu.matmul %45, %3, %cst_16 {dimension_numbers = #tpu.dot_dimension_numbers<[1], [0], [0], [1], [0, 0, 1, 1], [], []>} : vector<8x128xbf16>, vector<128x512xbf16>, vector<8x512xf32> -> vector<8x512xf32>
    %47 = arith.addf %44, %46 : vector<8x512xf32>
    %48 = vector.extract_strided_slice %47 {offsets = [0, 0], sizes = [8, 128], strides = [1, 1]} : vector<8x512xf32> to vector<8x128xf32>
    %49 = arith.negf %48 : vector<8x128xf32>
    %50 = math.exp %49 : vector<8x128xf32>
    %cst_17 = arith.constant 1.000000e+00 : f32
    %51 = vector.broadcast %cst_17 : f32 to vector<8x128xf32>
    %52 = arith.addf %51, %50 : vector<8x128xf32>
    %53 = arith.divf %51, %52 : vector<8x128xf32>
    %54 = vector.extract_strided_slice %47 {offsets = [0, 128], sizes = [8, 128], strides = [1, 1]} : vector<8x512xf32> to vector<8x128xf32>
    %55 = arith.negf %54 : vector<8x128xf32>
    %56 = math.exp %55 : vector<8x128xf32>
    %cst_18 = arith.constant 1.000000e+00 : f32
    %57 = vector.broadcast %cst_18 : f32 to vector<8x128xf32>
    %58 = arith.addf %57, %56 : vector<8x128xf32>
    %59 = arith.divf %57, %58 : vector<8x128xf32>
    %60 = vector.extract_strided_slice %47 {offsets = [0, 256], sizes = [8, 128], strides = [1, 1]} : vector<8x512xf32> to vector<8x128xf32>
    %61 = math.tanh %60 : vector<8x128xf32>
    %62 = vector.extract_strided_slice %47 {offsets = [0, 384], sizes = [8, 128], strides = [1, 1]} : vector<8x512xf32> to vector<8x128xf32>
    %63 = arith.negf %62 : vector<8x128xf32>
    %64 = math.exp %63 : vector<8x128xf32>
    %cst_19 = arith.constant 1.000000e+00 : f32
    %65 = vector.broadcast %cst_19 : f32 to vector<8x128xf32>
    %66 = arith.addf %65, %64 : vector<8x128xf32>
    %67 = arith.divf %65, %66 : vector<8x128xf32>
    %68 = arith.mulf %59, %34 : vector<8x128xf32>
    %69 = arith.mulf %53, %61 : vector<8x128xf32>
    %70 = arith.addf %68, %69 : vector<8x128xf32>
    %71 = math.tanh %70 : vector<8x128xf32>
    %72 = arith.mulf %67, %71 : vector<8x128xf32>
    %73 = arith.truncf %72 : vector<8x128xf32> to vector<8x128xbf16>
    %74 = arith.index_cast %c1_i32 : i32 to index
    %c0_20 = arith.constant 0 : index
    %c0_21 = arith.constant 0 : index
    %75 = vector.load %arg5[%74, %c0_20, %c0_21] : memref<8x8x128xbf16, #tpu.memory_space<vmem>>, vector<1x8x128xbf16>
    %76 = vector.shape_cast %75 : vector<1x8x128xbf16> to vector<8x128xbf16>
    %77 = vector.shape_cast %73 : vector<8x128xbf16> to vector<1x8x128xbf16>
    tpu.vector_store %arg5[%74, %c0_20, %c0_21], %77 {strides = array<i32>} : memref<8x8x128xbf16, #tpu.memory_space<vmem>>, vector<1x8x128xbf16>,
    %c2_i32 = arith.constant 2 : i32
    %78 = arith.index_cast %c2_i32 : i32 to index
    %c0_22 = arith.constant 0 : index
    %c0_23 = arith.constant 0 : index
    %79 = vector.load %arg1[%78, %c0_22, %c0_23] : memref<8x8x512xf32, #tpu.memory_space<vmem>>, vector<1x8x512xf32>
    %80 = vector.shape_cast %79 : vector<1x8x512xf32> to vector<8x512xf32>
    %81 = arith.truncf %72 : vector<8x128xf32> to vector<8x128xbf16>
    %cst_24 = arith.constant dense<0.000000e+00> : vector<8x512xf32>
    %82 = tpu.matmul %81, %3, %cst_24 {dimension_numbers = #tpu.dot_dimension_numbers<[1], [0], [0], [1], [0, 0, 1, 1], [], []>} : vector<8x128xbf16>, vector<128x512xbf16>, vector<8x512xf32> -> vector<8x512xf32>
    %83 = arith.addf %80, %82 : vector<8x512xf32>
    %84 = vector.extract_strided_slice %83 {offsets = [0, 0], sizes = [8, 128], strides = [1, 1]} : vector<8x512xf32> to vector<8x128xf32>
    %85 = arith.negf %84 : vector<8x128xf32>
    %86 = math.exp %85 : vector<8x128xf32>
    %cst_25 = arith.constant 1.000000e+00 : f32
    %87 = vector.broadcast %cst_25 : f32 to vector<8x128xf32>
    %88 = arith.addf %87, %86 : vector<8x128xf32>
    %89 = arith.divf %87, %88 : vector<8x128xf32>
    %90 = vector.extract_strided_slice %83 {offsets = [0, 128], sizes = [8, 128], strides = [1, 1]} : vector<8x512xf32> to vector<8x128xf32>
    %91 = arith.negf %90 : vector<8x128xf32>
    %92 = math.exp %91 : vector<8x128xf32>
    %cst_26 = arith.constant 1.000000e+00 : f32
    %93 = vector.broadcast %cst_26 : f32 to vector<8x128xf32>
    %94 = arith.addf %93, %92 : vector<8x128xf32>
    %95 = arith.divf %93, %94 : vector<8x128xf32>
    %96 = vector.extract_strided_slice %83 {offsets = [0, 256], sizes = [8, 128], strides = [1, 1]} : vector<8x512xf32> to vector<8x128xf32>
    %97 = math.tanh %96 : vector<8x128xf32>
    %98 = vector.extract_strided_slice %83 {offsets = [0, 384], sizes = [8, 128], strides = [1, 1]} : vector<8x512xf32> to vector<8x128xf32>
    %99 = arith.negf %98 : vector<8x128xf32>
    %100 = math.exp %99 : vector<8x128xf32>
    %cst_27 = arith.constant 1.000000e+00 : f32
    %101 = vector.broadcast %cst_27 : f32 to vector<8x128xf32>
    %102 = arith.addf %101, %100 : vector<8x128xf32>
    %103 = arith.divf %101, %102 : vector<8x128xf32>
    %104 = arith.mulf %95, %70 : vector<8x128xf32>
    %105 = arith.mulf %89, %97 : vector<8x128xf32>
    %106 = arith.addf %104, %105 : vector<8x128xf32>
    %107 = math.tanh %106 : vector<8x128xf32>
    %108 = arith.mulf %103, %107 : vector<8x128xf32>
    %109 = arith.truncf %108 : vector<8x128xf32> to vector<8x128xbf16>
    %110 = arith.index_cast %c2_i32 : i32 to index
    %c0_28 = arith.constant 0 : index
    %c0_29 = arith.constant 0 : index
    %111 = vector.load %arg5[%110, %c0_28, %c0_29] : memref<8x8x128xbf16, #tpu.memory_space<vmem>>, vector<1x8x128xbf16>
    %112 = vector.shape_cast %111 : vector<1x8x128xbf16> to vector<8x128xbf16>
    %113 = vector.shape_cast %109 : vector<8x128xbf16> to vector<1x8x128xbf16>
    tpu.vector_store %arg5[%110, %c0_28, %c0_29], %113 {strides = array<i32>} : memref<8x8x128xbf16, #tpu.memory_space<vmem>>, vector<1x8x128xbf16>,
    %c3_i32 = arith.constant 3 : i32
    %114 = arith.index_cast %c3_i32 : i32 to index
    %c0_30 = arith.constant 0 : index
    %c0_31 = arith.constant 0 : index
    %115 = vector.load %arg1[%114, %c0_30, %c0_31] : memref<8x8x512xf32, #tpu.memory_space<vmem>>, vector<1x8x512xf32>
    %116 = vector.shape_cast %115 : vector<1x8x512xf32> to vector<8x512xf32>
    %117 = arith.truncf %108 : vector<8x128xf32> to vector<8x128xbf16>
    %cst_32 = arith.constant dense<0.000000e+00> : vector<8x512xf32>
    %118 = tpu.matmul %117, %3, %cst_32 {dimension_numbers = #tpu.dot_dimension_numbers<[1], [0], [0], [1], [0, 0, 1, 1], [], []>} : vector<8x128xbf16>, vector<128x512xbf16>, vector<8x512xf32> -> vector<8x512xf32>
    %119 = arith.addf %116, %118 : vector<8x512xf32>
    %120 = vector.extract_strided_slice %119 {offsets = [0, 0], sizes = [8, 128], strides = [1, 1]} : vector<8x512xf32> to vector<8x128xf32>
    %121 = arith.negf %120 : vector<8x128xf32>
    %122 = math.exp %121 : vector<8x128xf32>
    %cst_33 = arith.constant 1.000000e+00 : f32
    %123 = vector.broadcast %cst_33 : f32 to vector<8x128xf32>
    %124 = arith.addf %123, %122 : vector<8x128xf32>
    %125 = arith.divf %123, %124 : vector<8x128xf32>
    %126 = vector.extract_strided_slice %119 {offsets = [0, 128], sizes = [8, 128], strides = [1, 1]} : vector<8x512xf32> to vector<8x128xf32>
    %127 = arith.negf %126 : vector<8x128xf32>
    %128 = math.exp %127 : vector<8x128xf32>
    %cst_34 = arith.constant 1.000000e+00 : f32
    %129 = vector.broadcast %cst_34 : f32 to vector<8x128xf32>
    %130 = arith.addf %129, %128 : vector<8x128xf32>
    %131 = arith.divf %129, %130 : vector<8x128xf32>
    %132 = vector.extract_strided_slice %119 {offsets = [0, 256], sizes = [8, 128], strides = [1, 1]} : vector<8x512xf32> to vector<8x128xf32>
    %133 = math.tanh %132 : vector<8x128xf32>
    %134 = vector.extract_strided_slice %119 {offsets = [0, 384], sizes = [8, 128], strides = [1, 1]} : vector<8x512xf32> to vector<8x128xf32>
    %135 = arith.negf %134 : vector<8x128xf32>
    %136 = math.exp %135 : vector<8x128xf32>
    %cst_35 = arith.constant 1.000000e+00 : f32
    %137 = vector.broadcast %cst_35 : f32 to vector<8x128xf32>
    %138 = arith.addf %137, %136 : vector<8x128xf32>
    %139 = arith.divf %137, %138 : vector<8x128xf32>
    %140 = arith.mulf %131, %106 : vector<8x128xf32>
    %141 = arith.mulf %125, %133 : vector<8x128xf32>
    %142 = arith.addf %140, %141 : vector<8x128xf32>
    %143 = math.tanh %142 : vector<8x128xf32>
    %144 = arith.mulf %139, %143 : vector<8x128xf32>
    %145 = arith.truncf %144 : vector<8x128xf32> to vector<8x128xbf16>
    %146 = arith.index_cast %c3_i32 : i32 to index
    %c0_36 = arith.constant 0 : index
    %c0_37 = arith.constant 0 : index
    %147 = vector.load %arg5[%146, %c0_36, %c0_37] : memref<8x8x128xbf16, #tpu.memory_space<vmem>>, vector<1x8x128xbf16>
    %148 = vector.shape_cast %147 : vector<1x8x128xbf16> to vector<8x128xbf16>
    %149 = vector.shape_cast %145 : vector<8x128xbf16> to vector<1x8x128xbf16>
    tpu.vector_store %arg5[%146, %c0_36, %c0_37], %149 {strides = array<i32>} : memref<8x8x128xbf16, #tpu.memory_space<vmem>>, vector<1x8x128xbf16>,
    %c4_i32 = arith.constant 4 : i32
    %150 = arith.index_cast %c4_i32 : i32 to index
    %c0_38 = arith.constant 0 : index
    %c0_39 = arith.constant 0 : index
    %151 = vector.load %arg1[%150, %c0_38, %c0_39] : memref<8x8x512xf32, #tpu.memory_space<vmem>>, vector<1x8x512xf32>
    %152 = vector.shape_cast %151 : vector<1x8x512xf32> to vector<8x512xf32>
    %153 = arith.truncf %144 : vector<8x128xf32> to vector<8x128xbf16>
    %cst_40 = arith.constant dense<0.000000e+00> : vector<8x512xf32>
    %154 = tpu.matmul %153, %3, %cst_40 {dimension_numbers = #tpu.dot_dimension_numbers<[1], [0], [0], [1], [0, 0, 1, 1], [], []>} : vector<8x128xbf16>, vector<128x512xbf16>, vector<8x512xf32> -> vector<8x512xf32>
    %155 = arith.addf %152, %154 : vector<8x512xf32>
    %156 = vector.extract_strided_slice %155 {offsets = [0, 0], sizes = [8, 128], strides = [1, 1]} : vector<8x512xf32> to vector<8x128xf32>
    %157 = arith.negf %156 : vector<8x128xf32>
    %158 = math.exp %157 : vector<8x128xf32>
    %cst_41 = arith.constant 1.000000e+00 : f32
    %159 = vector.broadcast %cst_41 : f32 to vector<8x128xf32>
    %160 = arith.addf %159, %158 : vector<8x128xf32>
    %161 = arith.divf %159, %160 : vector<8x128xf32>
    %162 = vector.extract_strided_slice %155 {offsets = [0, 128], sizes = [8, 128], strides = [1, 1]} : vector<8x512xf32> to vector<8x128xf32>
    %163 = arith.negf %162 : vector<8x128xf32>
    %164 = math.exp %163 : vector<8x128xf32>
    %cst_42 = arith.constant 1.000000e+00 : f32
    %165 = vector.broadcast %cst_42 : f32 to vector<8x128xf32>
    %166 = arith.addf %165, %164 : vector<8x128xf32>
    %167 = arith.divf %165, %166 : vector<8x128xf32>
    %168 = vector.extract_strided_slice %155 {offsets = [0, 256], sizes = [8, 128], strides = [1, 1]} : vector<8x512xf32> to vector<8x128xf32>
    %169 = math.tanh %168 : vector<8x128xf32>
    %170 = vector.extract_strided_slice %155 {offsets = [0, 384], sizes = [8, 128], strides = [1, 1]} : vector<8x512xf32> to vector<8x128xf32>
    %171 = arith.negf %170 : vector<8x128xf32>
    %172 = math.exp %171 : vector<8x128xf32>
    %cst_43 = arith.constant 1.000000e+00 : f32
    %173 = vector.broadcast %cst_43 : f32 to vector<8x128xf32>
    %174 = arith.addf %173, %172 : vector<8x128xf32>
    %175 = arith.divf %173, %174 : vector<8x128xf32>
    %176 = arith.mulf %167, %142 : vector<8x128xf32>
    %177 = arith.mulf %161, %169 : vector<8x128xf32>
    %178 = arith.addf %176, %177 : vector<8x128xf32>
    %179 = math.tanh %178 : vector<8x128xf32>
    %180 = arith.mulf %175, %179 : vector<8x128xf32>
    %181 = arith.truncf %180 : vector<8x128xf32> to vector<8x128xbf16>
    %182 = arith.index_cast %c4_i32 : i32 to index
    %c0_44 = arith.constant 0 : index
    %c0_45 = arith.constant 0 : index
    %183 = vector.load %arg5[%182, %c0_44, %c0_45] : memref<8x8x128xbf16, #tpu.memory_space<vmem>>, vector<1x8x128xbf16>
    %184 = vector.shape_cast %183 : vector<1x8x128xbf16> to vector<8x128xbf16>
    %185 = vector.shape_cast %181 : vector<8x128xbf16> to vector<1x8x128xbf16>
    tpu.vector_store %arg5[%182, %c0_44, %c0_45], %185 {strides = array<i32>} : memref<8x8x128xbf16, #tpu.memory_space<vmem>>, vector<1x8x128xbf16>,
    %c5_i32 = arith.constant 5 : i32
    %186 = arith.index_cast %c5_i32 : i32 to index
    %c0_46 = arith.constant 0 : index
    %c0_47 = arith.constant 0 : index
    %187 = vector.load %arg1[%186, %c0_46, %c0_47] : memref<8x8x512xf32, #tpu.memory_space<vmem>>, vector<1x8x512xf32>
    %188 = vector.shape_cast %187 : vector<1x8x512xf32> to vector<8x512xf32>
    %189 = arith.truncf %180 : vector<8x128xf32> to vector<8x128xbf16>
    %cst_48 = arith.constant dense<0.000000e+00> : vector<8x512xf32>
    %190 = tpu.matmul %189, %3, %cst_48 {dimension_numbers = #tpu.dot_dimension_numbers<[1], [0], [0], [1], [0, 0, 1, 1], [], []>} : vector<8x128xbf16>, vector<128x512xbf16>, vector<8x512xf32> -> vector<8x512xf32>
    %191 = arith.addf %188, %190 : vector<8x512xf32>
    %192 = vector.extract_strided_slice %191 {offsets = [0, 0], sizes = [8, 128], strides = [1, 1]} : vector<8x512xf32> to vector<8x128xf32>
    %193 = arith.negf %192 : vector<8x128xf32>
    %194 = math.exp %193 : vector<8x128xf32>
    %cst_49 = arith.constant 1.000000e+00 : f32
    %195 = vector.broadcast %cst_49 : f32 to vector<8x128xf32>
    %196 = arith.addf %195, %194 : vector<8x128xf32>
    %197 = arith.divf %195, %196 : vector<8x128xf32>
    %198 = vector.extract_strided_slice %191 {offsets = [0, 128], sizes = [8, 128], strides = [1, 1]} : vector<8x512xf32> to vector<8x128xf32>
    %199 = arith.negf %198 : vector<8x128xf32>
    %200 = math.exp %199 : vector<8x128xf32>
    %cst_50 = arith.constant 1.000000e+00 : f32
    %201 = vector.broadcast %cst_50 : f32 to vector<8x128xf32>
    %202 = arith.addf %201, %200 : vector<8x128xf32>
    %203 = arith.divf %201, %202 : vector<8x128xf32>
    %204 = vector.extract_strided_slice %191 {offsets = [0, 256], sizes = [8, 128], strides = [1, 1]} : vector<8x512xf32> to vector<8x128xf32>
    %205 = math.tanh %204 : vector<8x128xf32>
    %206 = vector.extract_strided_slice %191 {offsets = [0, 384], sizes = [8, 128], strides = [1, 1]} : vector<8x512xf32> to vector<8x128xf32>
    %207 = arith.negf %206 : vector<8x128xf32>
    %208 = math.exp %207 : vector<8x128xf32>
    %cst_51 = arith.constant 1.000000e+00 : f32
    %209 = vector.broadcast %cst_51 : f32 to vector<8x128xf32>
    %210 = arith.addf %209, %208 : vector<8x128xf32>
    %211 = arith.divf %209, %210 : vector<8x128xf32>
    %212 = arith.mulf %203, %178 : vector<8x128xf32>
    %213 = arith.mulf %197, %205 : vector<8x128xf32>
    %214 = arith.addf %212, %213 : vector<8x128xf32>
    %215 = math.tanh %214 : vector<8x128xf32>
    %216 = arith.mulf %211, %215 : vector<8x128xf32>
    %217 = arith.truncf %216 : vector<8x128xf32> to vector<8x128xbf16>
    %218 = arith.index_cast %c5_i32 : i32 to index
    %c0_52 = arith.constant 0 : index
    %c0_53 = arith.constant 0 : index
    %219 = vector.load %arg5[%218, %c0_52, %c0_53] : memref<8x8x128xbf16, #tpu.memory_space<vmem>>, vector<1x8x128xbf16>
    %220 = vector.shape_cast %219 : vector<1x8x128xbf16> to vector<8x128xbf16>
    %221 = vector.shape_cast %217 : vector<8x128xbf16> to vector<1x8x128xbf16>
    tpu.vector_store %arg5[%218, %c0_52, %c0_53], %221 {strides = array<i32>} : memref<8x8x128xbf16, #tpu.memory_space<vmem>>, vector<1x8x128xbf16>,
    %c6_i32 = arith.constant 6 : i32
    %222 = arith.index_cast %c6_i32 : i32 to index
    %c0_54 = arith.constant 0 : index
    %c0_55 = arith.constant 0 : index
    %223 = vector.load %arg1[%222, %c0_54, %c0_55] : memref<8x8x512xf32, #tpu.memory_space<vmem>>, vector<1x8x512xf32>
    %224 = vector.shape_cast %223 : vector<1x8x512xf32> to vector<8x512xf32>
    %225 = arith.truncf %216 : vector<8x128xf32> to vector<8x128xbf16>
    %cst_56 = arith.constant dense<0.000000e+00> : vector<8x512xf32>
    %226 = tpu.matmul %225, %3, %cst_56 {dimension_numbers = #tpu.dot_dimension_numbers<[1], [0], [0], [1], [0, 0, 1, 1], [], []>} : vector<8x128xbf16>, vector<128x512xbf16>, vector<8x512xf32> -> vector<8x512xf32>
    %227 = arith.addf %224, %226 : vector<8x512xf32>
    %228 = vector.extract_strided_slice %227 {offsets = [0, 0], sizes = [8, 128], strides = [1, 1]} : vector<8x512xf32> to vector<8x128xf32>
    %229 = arith.negf %228 : vector<8x128xf32>
    %230 = math.exp %229 : vector<8x128xf32>
    %cst_57 = arith.constant 1.000000e+00 : f32
    %231 = vector.broadcast %cst_57 : f32 to vector<8x128xf32>
    %232 = arith.addf %231, %230 : vector<8x128xf32>
    %233 = arith.divf %231, %232 : vector<8x128xf32>
    %234 = vector.extract_strided_slice %227 {offsets = [0, 128], sizes = [8, 128], strides = [1, 1]} : vector<8x512xf32> to vector<8x128xf32>
    %235 = arith.negf %234 : vector<8x128xf32>
    %236 = math.exp %235 : vector<8x128xf32>
    %cst_58 = arith.constant 1.000000e+00 : f32
    %237 = vector.broadcast %cst_58 : f32 to vector<8x128xf32>
    %238 = arith.addf %237, %236 : vector<8x128xf32>
    %239 = arith.divf %237, %238 : vector<8x128xf32>
    %240 = vector.extract_strided_slice %227 {offsets = [0, 256], sizes = [8, 128], strides = [1, 1]} : vector<8x512xf32> to vector<8x128xf32>
    %241 = math.tanh %240 : vector<8x128xf32>
    %242 = vector.extract_strided_slice %227 {offsets = [0, 384], sizes = [8, 128], strides = [1, 1]} : vector<8x512xf32> to vector<8x128xf32>
    %243 = arith.negf %242 : vector<8x128xf32>
    %244 = math.exp %243 : vector<8x128xf32>
    %cst_59 = arith.constant 1.000000e+00 : f32
    %245 = vector.broadcast %cst_59 : f32 to vector<8x128xf32>
    %246 = arith.addf %245, %244 : vector<8x128xf32>
    %247 = arith.divf %245, %246 : vector<8x128xf32>
    %248 = arith.mulf %239, %214 : vector<8x128xf32>
    %249 = arith.mulf %233, %241 : vector<8x128xf32>
    %250 = arith.addf %248, %249 : vector<8x128xf32>
    %251 = math.tanh %250 : vector<8x128xf32>
    %252 = arith.mulf %247, %251 : vector<8x128xf32>
    %253 = arith.truncf %252 : vector<8x128xf32> to vector<8x128xbf16>
    %254 = arith.index_cast %c6_i32 : i32 to index
    %c0_60 = arith.constant 0 : index
    %c0_61 = arith.constant 0 : index
    %255 = vector.load %arg5[%254, %c0_60, %c0_61] : memref<8x8x128xbf16, #tpu.memory_space<vmem>>, vector<1x8x128xbf16>
    %256 = vector.shape_cast %255 : vector<1x8x128xbf16> to vector<8x128xbf16>
    %257 = vector.shape_cast %253 : vector<8x128xbf16> to vector<1x8x128xbf16>
    tpu.vector_store %arg5[%254, %c0_60, %c0_61], %257 {strides = array<i32>} : memref<8x8x128xbf16, #tpu.memory_space<vmem>>, vector<1x8x128xbf16>,
    %c7_i32 = arith.constant 7 : i32
    %258 = arith.index_cast %c7_i32 : i32 to index
    %c0_62 = arith.constant 0 : index
    %c0_63 = arith.constant 0 : index
    %259 = vector.load %arg1[%258, %c0_62, %c0_63] : memref<8x8x512xf32, #tpu.memory_space<vmem>>, vector<1x8x512xf32>
    %260 = vector.shape_cast %259 : vector<1x8x512xf32> to vector<8x512xf32>
    %261 = arith.truncf %252 : vector<8x128xf32> to vector<8x128xbf16>
    %cst_64 = arith.constant dense<0.000000e+00> : vector<8x512xf32>
    %262 = tpu.matmul %261, %3, %cst_64 {dimension_numbers = #tpu.dot_dimension_numbers<[1], [0], [0], [1], [0, 0, 1, 1], [], []>} : vector<8x128xbf16>, vector<128x512xbf16>, vector<8x512xf32> -> vector<8x512xf32>
    %263 = arith.addf %260, %262 : vector<8x512xf32>
    %264 = vector.extract_strided_slice %263 {offsets = [0, 0], sizes = [8, 128], strides = [1, 1]} : vector<8x512xf32> to vector<8x128xf32>
    %265 = arith.negf %264 : vector<8x128xf32>
    %266 = math.exp %265 : vector<8x128xf32>
    %cst_65 = arith.constant 1.000000e+00 : f32
    %267 = vector.broadcast %cst_65 : f32 to vector<8x128xf32>
    %268 = arith.addf %267, %266 : vector<8x128xf32>
    %269 = arith.divf %267, %268 : vector<8x128xf32>
    %270 = vector.extract_strided_slice %263 {offsets = [0, 128], sizes = [8, 128], strides = [1, 1]} : vector<8x512xf32> to vector<8x128xf32>
    %271 = arith.negf %270 : vector<8x128xf32>
    %272 = math.exp %271 : vector<8x128xf32>
    %cst_66 = arith.constant 1.000000e+00 : f32
    %273 = vector.broadcast %cst_66 : f32 to vector<8x128xf32>
    %274 = arith.addf %273, %272 : vector<8x128xf32>
    %275 = arith.divf %273, %274 : vector<8x128xf32>
    %276 = vector.extract_strided_slice %263 {offsets = [0, 256], sizes = [8, 128], strides = [1, 1]} : vector<8x512xf32> to vector<8x128xf32>
    %277 = math.tanh %276 : vector<8x128xf32>
    %278 = vector.extract_strided_slice %263 {offsets = [0, 384], sizes = [8, 128], strides = [1, 1]} : vector<8x512xf32> to vector<8x128xf32>
    %279 = arith.negf %278 : vector<8x128xf32>
    %280 = math.exp %279 : vector<8x128xf32>
    %cst_67 = arith.constant 1.000000e+00 : f32
    %281 = vector.broadcast %cst_67 : f32 to vector<8x128xf32>
    %282 = arith.addf %281, %280 : vector<8x128xf32>
    %283 = arith.divf %281, %282 : vector<8x128xf32>
    %284 = arith.mulf %275, %250 : vector<8x128xf32>
    %285 = arith.mulf %269, %277 : vector<8x128xf32>
    %286 = arith.addf %284, %285 : vector<8x128xf32>
    %287 = math.tanh %286 : vector<8x128xf32>
    %288 = arith.mulf %283, %287 : vector<8x128xf32>
    %289 = arith.truncf %288 : vector<8x128xf32> to vector<8x128xbf16>
    %290 = arith.index_cast %c7_i32 : i32 to index
    %c0_68 = arith.constant 0 : index
    %c0_69 = arith.constant 0 : index
    %291 = vector.load %arg5[%290, %c0_68, %c0_69] : memref<8x8x128xbf16, #tpu.memory_space<vmem>>, vector<1x8x128xbf16>
    %292 = vector.shape_cast %291 : vector<1x8x128xbf16> to vector<8x128xbf16>
    %293 = vector.shape_cast %289 : vector<8x128xbf16> to vector<1x8x128xbf16>
    tpu.vector_store %arg5[%290, %c0_68, %c0_69], %293 {strides = array<i32>} : memref<8x8x128xbf16, #tpu.memory_space<vmem>>, vector<1x8x128xbf16>,
    %c8_i32 = arith.constant 8 : i32
    %c0_70 = arith.constant 0 : index
    %c0_71 = arith.constant 0 : index
    %294 = vector.load %arg8[%c0_70, %c0_71] : memref<8x128xf32, #tpu.memory_space<vmem>>, vector<8x128xf32>
    tpu.vector_store %arg8[%c0_70, %c0_71], %288 {strides = array<i32>} : memref<8x128xf32, #tpu.memory_space<vmem>>, vector<8x128xf32>,
    %c0_72 = arith.constant 0 : index
    %c0_73 = arith.constant 0 : index
    %295 = vector.load %arg9[%c0_72, %c0_73] : memref<8x128xf32, #tpu.memory_space<vmem>>, vector<8x128xf32>
    tpu.vector_store %arg9[%c0_72, %c0_73], %286 {strides = array<i32>} : memref<8x128xf32, #tpu.memory_space<vmem>>, vector<8x128xf32>,
    %c0_i32_74 = arith.constant 0 : i32
    %296 = arith.cmpi eq, %arg0, %c0_i32_74 : i32
    %297 = arith.extui %296 : i1 to i32
    %c0_i32_75 = arith.constant 0 : i32
    %298 = arith.cmpi ne, %297, %c0_i32_75 : i32
    scf.if %298 {
      %c0_76 = arith.constant 0 : index
      %c0_77 = arith.constant 0 : index
      %299 = vector.load %arg6[%c0_76, %c0_77] : memref<8x128xf32, #tpu.memory_space<vmem>>, vector<8x128xf32>
      tpu.vector_store %arg6[%c0_76, %c0_77], %288 {strides = array<i32>} : memref<8x128xf32, #tpu.memory_space<vmem>>, vector<8x128xf32>,
      %c0_78 = arith.constant 0 : index
      %c0_79 = arith.constant 0 : index
      %300 = vector.load %arg7[%c0_78, %c0_79] : memref<8x128xf32, #tpu.memory_space<vmem>>, vector<8x128xf32>
      tpu.vector_store %arg7[%c0_78, %c0_79], %286 {strides = array<i32>} : memref<8x128xf32, #tpu.memory_space<vmem>>, vector<8x128xf32>,
    } else {
    }
    return
  }
  func.func @transform_0(%arg0: i32) -> (i32, i32, i32) {
    %c0_i32 = arith.constant 0 : i32
    %c0_i32_0 = arith.constant 0 : i32
    %c0_i32_1 = arith.constant 0 : i32
    return %arg0, %c0_i32, %c0_i32_0 : i32, i32, i32
  }
  func.func @transform_1(%arg0: i32) -> (i32, i32) {
    %c0_i32 = arith.constant 0 : i32
    %c0_i32_0 = arith.constant 0 : i32
    %c0_i32_1 = arith.constant 0 : i32
    return %c0_i32, %c0_i32_0 : i32, i32
  }
  func.func @transform_2(%arg0: i32) -> (i32, i32) {
    %c0_i32 = arith.constant 0 : i32
    %c0_i32_0 = arith.constant 0 : i32
    %c0_i32_1 = arith.constant 0 : i32
    return %c0_i32, %c0_i32_0 : i32, i32
  }
  func.func @transform_3(%arg0: i32) -> (i32, i32) {
    %c0_i32 = arith.constant 0 : i32
    %c0_i32_0 = arith.constant 0 : i32
    %c0_i32_1 = arith.constant 0 : i32
    return %c0_i32, %c0_i32_0 : i32, i32
  }
  func.func @transform_4(%arg0: i32) -> (i32, i32, i32) {
    %c0_i32 = arith.constant 0 : i32
    %c0_i32_0 = arith.constant 0 : i32
    %c0_i32_1 = arith.constant 0 : i32
    return %arg0, %c0_i32, %c0_i32_0 : i32, i32, i32
  }
  func.func @transform_5(%arg0: i32) -> (i32, i32) {
    %c0_i32 = arith.constant 0 : i32
    %c0_i32_0 = arith.constant 0 : i32
    %c0_i32_1 = arith.constant 0 : i32
    return %c0_i32, %c0_i32_0 : i32, i32
  }
  func.func @transform_6(%arg0: i32) -> (i32, i32) {
    %c0_i32 = arith.constant 0 : i32
    %c0_i32_0 = arith.constant 0 : i32
    %c0_i32_1 = arith.constant 0 : i32
    return %c0_i32, %c0_i32_0 : i32, i32
  }
}

module attributes {stable_mosaic.version = 11 : i64} {
  func.func @_encode_ih_kernel(%arg0: i32, %arg1: i32, %arg2: memref<8x1024xbf16, #tpu.memory_space<vmem>>, %arg3: memref<1024x128xbf16, #tpu.memory_space<vmem>>, %arg4: memref<1x128xf32, #tpu.memory_space<vmem>>, %arg5: memref<128x512xbf16, #tpu.memory_space<vmem>>, %arg6: memref<1x512xf32, #tpu.memory_space<vmem>>, %arg7: memref<1x8x512xf32, #tpu.memory_space<vmem>>) attributes {dimension_semantics = [#tpu.dimension_semantics<parallel>, #tpu.dimension_semantics<parallel>], iteration_bounds = array<i64: 1, 8>, scalar_prefetch = 0 : i64, scratch_operands = 0 : i64, tpu.core_type = #tpu.core_type<tc>, window_params = [{transform_indices = @transform_0, window_bounds = array<i64: 8, 1024>}, {pipeline_mode = #tpu.pipeline_mode<synchronous>, transform_indices = @transform_1, window_bounds = array<i64: 1024, 128>}, {pipeline_mode = #tpu.pipeline_mode<synchronous>, transform_indices = @transform_2, window_bounds = array<i64: 1, 128>}, {pipeline_mode = #tpu.pipeline_mode<synchronous>, transform_indices = @transform_3, window_bounds = array<i64: 128, 512>}, {pipeline_mode = #tpu.pipeline_mode<synchronous>, transform_indices = @transform_4, window_bounds = array<i64: 1, 512>}, {transform_indices = @transform_5, window_bounds = array<i64: 1, 8, 512>}]} {
    %c0 = arith.constant 0 : index
    %c0_0 = arith.constant 0 : index
    %0 = vector.load %arg2[%c0, %c0_0] : memref<8x1024xbf16, #tpu.memory_space<vmem>>, vector<8x1024xbf16>
    %c0_1 = arith.constant 0 : index
    %c0_2 = arith.constant 0 : index
    %1 = vector.load %arg3[%c0_1, %c0_2] : memref<1024x128xbf16, #tpu.memory_space<vmem>>, vector<1024x128xbf16>
    %cst = arith.constant dense<0.000000e+00> : vector<8x128xf32>
    %2 = tpu.matmul %0, %1, %cst {dimension_numbers = #tpu.dot_dimension_numbers<[1], [0], [0], [1], [0, 0, 1, 1], [], []>} : vector<8x1024xbf16>, vector<1024x128xbf16>, vector<8x128xf32> -> vector<8x128xf32>
    %c0_3 = arith.constant 0 : index
    %c0_4 = arith.constant 0 : index
    %3 = vector.load %arg4[%c0_3, %c0_4] : memref<1x128xf32, #tpu.memory_space<vmem>>, vector<1x128xf32>
    %4 = vector.broadcast %3 : vector<1x128xf32> to vector<8x128xf32>
    %5 = arith.addf %2, %4 : vector<8x128xf32>
    %cst_5 = arith.constant 0.000000e+00 : f32
    %6 = vector.broadcast %cst_5 : f32 to vector<8x128xf32>
    %7 = arith.maximumf %5, %6 : vector<8x128xf32>
    %8 = arith.truncf %7 : vector<8x128xf32> to vector<8x128xbf16>
    %c0_6 = arith.constant 0 : index
    %c0_7 = arith.constant 0 : index
    %9 = vector.load %arg5[%c0_6, %c0_7] : memref<128x512xbf16, #tpu.memory_space<vmem>>, vector<128x512xbf16>
    %cst_8 = arith.constant dense<0.000000e+00> : vector<8x512xf32>
    %10 = tpu.matmul %8, %9, %cst_8 {dimension_numbers = #tpu.dot_dimension_numbers<[1], [0], [0], [1], [0, 0, 1, 1], [], []>} : vector<8x128xbf16>, vector<128x512xbf16>, vector<8x512xf32> -> vector<8x512xf32>
    %c0_9 = arith.constant 0 : index
    %c0_10 = arith.constant 0 : index
    %11 = vector.load %arg6[%c0_9, %c0_10] : memref<1x512xf32, #tpu.memory_space<vmem>>, vector<1x512xf32>
    %12 = vector.broadcast %11 : vector<1x512xf32> to vector<8x512xf32>
    %13 = arith.addf %10, %12 : vector<8x512xf32>
    %c0_11 = arith.constant 0 : index
    %c0_12 = arith.constant 0 : index
    %c0_13 = arith.constant 0 : index
    %14 = vector.load %arg7[%c0_11, %c0_12, %c0_13] : memref<1x8x512xf32, #tpu.memory_space<vmem>>, vector<1x8x512xf32>
    %15 = vector.shape_cast %14 : vector<1x8x512xf32> to vector<8x512xf32>
    %16 = vector.shape_cast %13 : vector<8x512xf32> to vector<1x8x512xf32>
    tpu.vector_store %arg7[%c0_11, %c0_12, %c0_13], %16 {strides = array<i32>} : memref<1x8x512xf32, #tpu.memory_space<vmem>>, vector<1x8x512xf32>,
    return
  }
  func.func @transform_0(%arg0: i32, %arg1: i32) -> (i32, i32) {
    %c0_i32 = arith.constant 0 : i32
    return %arg0, %arg1 : i32, i32
  }
  func.func @transform_1(%arg0: i32, %arg1: i32) -> (i32, i32) {
    %c0_i32 = arith.constant 0 : i32
    %c0_i32_0 = arith.constant 0 : i32
    %c0_i32_1 = arith.constant 0 : i32
    return %c0_i32, %c0_i32_0 : i32, i32
  }
  func.func @transform_2(%arg0: i32, %arg1: i32) -> (i32, i32) {
    %c0_i32 = arith.constant 0 : i32
    %c0_i32_0 = arith.constant 0 : i32
    %c0_i32_1 = arith.constant 0 : i32
    return %c0_i32, %c0_i32_0 : i32, i32
  }
  func.func @transform_3(%arg0: i32, %arg1: i32) -> (i32, i32) {
    %c0_i32 = arith.constant 0 : i32
    %c0_i32_0 = arith.constant 0 : i32
    %c0_i32_1 = arith.constant 0 : i32
    return %c0_i32, %c0_i32_0 : i32, i32
  }
  func.func @transform_4(%arg0: i32, %arg1: i32) -> (i32, i32) {
    %c0_i32 = arith.constant 0 : i32
    %c0_i32_0 = arith.constant 0 : i32
    %c0_i32_1 = arith.constant 0 : i32
    return %c0_i32, %c0_i32_0 : i32, i32
  }
  func.func @transform_5(%arg0: i32, %arg1: i32) -> (i32, i32, i32) {
    %c0_i32 = arith.constant 0 : i32
    %c0_i32_0 = arith.constant 0 : i32
    return %arg1, %arg0, %c0_i32 : i32, i32, i32
  }
}

module attributes {stable_mosaic.version = 11 : i64} {
  func.func @_proj_dec_kernel(%arg0: i32, %arg1: i32, %arg2: memref<1x8x128xbf16, #tpu.memory_space<vmem>>, %arg3: memref<128x128xbf16, #tpu.memory_space<vmem>>, %arg4: memref<1x128xf32, #tpu.memory_space<vmem>>, %arg5: memref<128x1024xbf16, #tpu.memory_space<vmem>>, %arg6: memref<1x1024xf32, #tpu.memory_space<vmem>>, %arg7: memref<8x1024xf32, #tpu.memory_space<vmem>>) attributes {dimension_semantics = [#tpu.dimension_semantics<parallel>, #tpu.dimension_semantics<parallel>], iteration_bounds = array<i64: 1, 8>, scalar_prefetch = 0 : i64, scratch_operands = 0 : i64, tpu.core_type = #tpu.core_type<tc>, window_params = [{transform_indices = @transform_0, window_bounds = array<i64: 1, 8, 128>}, {pipeline_mode = #tpu.pipeline_mode<synchronous>, transform_indices = @transform_1, window_bounds = array<i64: 128, 128>}, {pipeline_mode = #tpu.pipeline_mode<synchronous>, transform_indices = @transform_2, window_bounds = array<i64: 1, 128>}, {pipeline_mode = #tpu.pipeline_mode<synchronous>, transform_indices = @transform_3, window_bounds = array<i64: 128, 1024>}, {pipeline_mode = #tpu.pipeline_mode<synchronous>, transform_indices = @transform_4, window_bounds = array<i64: 1, 1024>}, {transform_indices = @transform_5, window_bounds = array<i64: 8, 1024>}]} {
    %c0 = arith.constant 0 : index
    %c0_0 = arith.constant 0 : index
    %c0_1 = arith.constant 0 : index
    %0 = vector.load %arg2[%c0, %c0_0, %c0_1] : memref<1x8x128xbf16, #tpu.memory_space<vmem>>, vector<1x8x128xbf16>
    %1 = vector.shape_cast %0 : vector<1x8x128xbf16> to vector<8x128xbf16>
    %c0_2 = arith.constant 0 : index
    %c0_3 = arith.constant 0 : index
    %2 = vector.load %arg3[%c0_2, %c0_3] : memref<128x128xbf16, #tpu.memory_space<vmem>>, vector<128x128xbf16>
    %cst = arith.constant dense<0.000000e+00> : vector<8x128xf32>
    %3 = tpu.matmul %1, %2, %cst {dimension_numbers = #tpu.dot_dimension_numbers<[1], [0], [0], [1], [0, 0, 1, 1], [], []>} : vector<8x128xbf16>, vector<128x128xbf16>, vector<8x128xf32> -> vector<8x128xf32>
    %c0_4 = arith.constant 0 : index
    %c0_5 = arith.constant 0 : index
    %4 = vector.load %arg4[%c0_4, %c0_5] : memref<1x128xf32, #tpu.memory_space<vmem>>, vector<1x128xf32>
    %5 = vector.broadcast %4 : vector<1x128xf32> to vector<8x128xf32>
    %6 = arith.addf %3, %5 : vector<8x128xf32>
    %7 = arith.truncf %6 : vector<8x128xf32> to vector<8x128xbf16>
    %c0_6 = arith.constant 0 : index
    %c0_7 = arith.constant 0 : index
    %8 = vector.load %arg5[%c0_6, %c0_7] : memref<128x1024xbf16, #tpu.memory_space<vmem>>, vector<128x1024xbf16>
    %cst_8 = arith.constant dense<0.000000e+00> : vector<8x1024xf32>
    %9 = tpu.matmul %7, %8, %cst_8 {dimension_numbers = #tpu.dot_dimension_numbers<[1], [0], [0], [1], [0, 0, 1, 1], [], []>} : vector<8x128xbf16>, vector<128x1024xbf16>, vector<8x1024xf32> -> vector<8x1024xf32>
    %c0_9 = arith.constant 0 : index
    %c0_10 = arith.constant 0 : index
    %10 = vector.load %arg6[%c0_9, %c0_10] : memref<1x1024xf32, #tpu.memory_space<vmem>>, vector<1x1024xf32>
    %11 = vector.broadcast %10 : vector<1x1024xf32> to vector<8x1024xf32>
    %12 = arith.addf %9, %11 : vector<8x1024xf32>
    %13 = arith.negf %12 : vector<8x1024xf32>
    %14 = math.exp %13 : vector<8x1024xf32>
    %cst_11 = arith.constant 1.000000e+00 : f32
    %15 = vector.broadcast %cst_11 : f32 to vector<8x1024xf32>
    %16 = arith.addf %15, %14 : vector<8x1024xf32>
    %17 = arith.divf %15, %16 : vector<8x1024xf32>
    %c0_12 = arith.constant 0 : index
    %c0_13 = arith.constant 0 : index
    %18 = vector.load %arg7[%c0_12, %c0_13] : memref<8x1024xf32, #tpu.memory_space<vmem>>, vector<8x1024xf32>
    tpu.vector_store %arg7[%c0_12, %c0_13], %17 {strides = array<i32>} : memref<8x1024xf32, #tpu.memory_space<vmem>>, vector<8x1024xf32>,
    return
  }
  func.func @transform_0(%arg0: i32, %arg1: i32) -> (i32, i32, i32) {
    %c0_i32 = arith.constant 0 : i32
    %c0_i32_0 = arith.constant 0 : i32
    return %arg1, %arg0, %c0_i32 : i32, i32, i32
  }
  func.func @transform_1(%arg0: i32, %arg1: i32) -> (i32, i32) {
    %c0_i32 = arith.constant 0 : i32
    %c0_i32_0 = arith.constant 0 : i32
    %c0_i32_1 = arith.constant 0 : i32
    return %c0_i32, %c0_i32_0 : i32, i32
  }
  func.func @transform_2(%arg0: i32, %arg1: i32) -> (i32, i32) {
    %c0_i32 = arith.constant 0 : i32
    %c0_i32_0 = arith.constant 0 : i32
    %c0_i32_1 = arith.constant 0 : i32
    return %c0_i32, %c0_i32_0 : i32, i32
  }
  func.func @transform_3(%arg0: i32, %arg1: i32) -> (i32, i32) {
    %c0_i32 = arith.constant 0 : i32
    %c0_i32_0 = arith.constant 0 : i32
    %c0_i32_1 = arith.constant 0 : i32
    return %c0_i32, %c0_i32_0 : i32, i32
  }
  func.func @transform_4(%arg0: i32, %arg1: i32) -> (i32, i32) {
    %c0_i32 = arith.constant 0 : i32
    %c0_i32_0 = arith.constant 0 : i32
    %c0_i32_1 = arith.constant 0 : i32
    return %c0_i32, %c0_i32_0 : i32, i32
  }
  func.func @transform_5(%arg0: i32, %arg1: i32) -> (i32, i32) {
    %c0_i32 = arith.constant 0 : i32
    return %arg0, %arg1 : i32, i32
  }
}

</mosaic_0001>

<bundles_post_ra>
// kernel: latent_lstm_forward.4
= control target key start
LH: loop header
LB: loop body
LE: loop exit
PB: predicated region body
PF: predicated region fallthrough
CT: control target
= control target key end

     0   :  { %s2310_s1 = inlined_call_operand.vmem [shape: bf16[128,512], index: 1, kind: input, shape index: {}]   ;;  %s2311_s2 = inlined_call_operand.vmem [shape: f32[8,128], index: 2, kind: input, shape index: {}]   ;;  %s2312_s0 = inlined_call_operand.vmem [shape: f32[8,8,512], index: 0, kind: input, shape index: {}]   ;;  %s2313_s3 = inlined_call_operand.vmem [shape: f32[8,128], index: 3, kind: input, shape index: {}]   ;;  %s2314_s4 = inlined_call_operand.vmem [shape: bf16[8,8,128], index: 4, kind: output, shape index: {0}]   ;;  %s2315_s6 = inlined_call_operand.vmem [shape: f32[8,128], index: 6, kind: output, shape index: {2}]   ;;  %s2316_s5 = inlined_call_operand.vmem [shape: f32[8,128], index: 5, kind: output, shape index: {1}]  }
   0x1   :  { %v1370_v0 = vld [vmem:[%s2310_s1 + $0xe0] sm:$0xf]  ;;  %v1473_v1 = vld [vmem:[%s2310_s1 + $0xec] sm:$0xf0]  ;;  %v1471_v2 = vld [vmem:[%s2310_s1 + $0xe4] sm:$0xf] }
   0x2   :  { %v1647_v3 = vor.u32 %v1473_v1, %v1370_v0  ;;  %v1372_v4 = vld [vmem:[%s2310_s1 + $0xf0] sm:$0xf0]  ;;  %v1472_v5 = vld [vmem:[%s2310_s1 + $0xec] sm:$0xf]  ;;  %v1380_v6 = vld [vmem:[%s2310_s1 + $0xf8] sm:$0xf0] }
   0x3   :  { %v1658_v7 = vor.u32 %v1471_v2, %v1372_v4  ;;  %v1660_v8 = vor.u32 %v1472_v5, %v1380_v6  ;;  %v1354_v9 = vld [vmem:[%s2310_s1 + $0xc0] sm:$0xf]  ;;  %v1469_v10 = vld [vmem:[%s2310_s1 + $0xcc] sm:$0xf0]  ;;  %v1467_v11 = vld [vmem:[%s2310_s1 + $0xc4] sm:$0xf] }
   0x4   :  { %227 = vmatpush.bf16.msra.mxu0 %v1647_v3  ;;  %v1672_v12 = vor.u32 %v1469_v10, %v1354_v9  ;;  %v1356_v13 = vld [vmem:[%s2310_s1 + $0xd0] sm:$0xf0]  ;;  %v1468_v14 = vld [vmem:[%s2310_s1 + $0xcc] sm:$0xf]  ;;  %v1364_v15 = vld [vmem:[%s2310_s1 + $0xd8] sm:$0xf0] }
   0x5   :  { %240 = vmatpush.bf16.msra.mxu1 %v1658_v7  ;;  %266 = vmatpush.bf16.msra.mxu3 %v1660_v8  ;;  %v1685_v16 = vor.u32 %v1467_v11, %v1356_v13  ;;  %v1687_v17 = vor.u32 %v1468_v14, %v1364_v15  ;;  %v1378_v18 = vld [vmem:[%s2310_s1 + $0xe8] sm:$0xf]  ;;  %v1474_v19 = vld [vmem:[%s2310_s1 + $0xf4] sm:$0xf0]  ;;  %v1338_v20 = vld [vmem:[%s2310_s1 + $0xa0] sm:$0xf] }
   0x6   :  { %v1698_v21 = vor.u32 %v1474_v19, %v1378_v18  ;;  %v1465_v22 = vld [vmem:[%s2310_s1 + $0xac] sm:$0xf0]  ;;  %v1463_v23 = vld [vmem:[%s2310_s1 + $0xa4] sm:$0xf]  ;;  %v1340_v24 = vld [vmem:[%s2310_s1 + $0xb0] sm:$0xf0] }
   0x7   :  { %v1464_v25 = vld [vmem:[%s2310_s1 + $0xac] sm:$0xf]  ;;  %v1348_v26 = vld [vmem:[%s2310_s1 + $0xb8] sm:$0xf0]  ;;  %v1362_v27 = vld [vmem:[%s2310_s1 + $0xc8] sm:$0xf]  ;;  %v1720_v28 = vor.u32 %v1465_v22, %v1338_v20  ;;  %v1733_v32 = vor.u32 %v1463_v23, %v1340_v24 }
   0x8   :  { %228 = vmatpush.bf16.msra.mxu0 %v1672_v12  ;;  %253 = vmatpush.bf16.msra.mxu2 %v1698_v21  ;;  %v1470_v29 = vld [vmem:[%s2310_s1 + $0xd4] sm:$0xf0]  ;;  %v1322_v30 = vld [vmem:[%s2310_s1 + $0x80] sm:$0xf]  ;;  %v1461_v31 = vld [vmem:[%s2310_s1 + $0x8c] sm:$0xf0]  ;;  %v1735_v33 = vor.u32 %v1464_v25, %v1348_v26 }
   0x9   :  { %241 = vmatpush.bf16.msra.mxu1 %v1685_v16  ;;  %267 = vmatpush.bf16.msra.mxu3 %v1687_v17  ;;  %v1737_v34 = vor.u32 %v1470_v29, %v1362_v27  ;;  %v1459_v35 = vld [vmem:[%s2310_s1 + $0x84] sm:$0xf]  ;;  %v1324_v36 = vld [vmem:[%s2310_s1 + $0x90] sm:$0xf0]  ;;  %v1460_v37 = vld [vmem:[%s2310_s1 + $0x8c] sm:$0xf]  ;;  %v1759_v41 = vor.u32 %v1461_v31, %v1322_v30 }
   0xa   :  { %v1332_v38 = vld [vmem:[%s2310_s1 + $0x98] sm:$0xf0]  ;;  %v1346_v39 = vld [vmem:[%s2310_s1 + $0xa8] sm:$0xf]  ;;  %v1466_v40 = vld [vmem:[%s2310_s1 + $0xb4] sm:$0xf0]  ;;  %v1771_v45 = vor.u32 %v1459_v35, %v1324_v36 }
   0xb   :  { %v1761_v42 = vor.u32 %v1466_v40, %v1346_v39  ;;  %v1306_v43 = vld [vmem:[%s2310_s1 + $0x60] sm:$0xf]  ;;  %v1457_v44 = vld [vmem:[%s2310_s1 + $0x6c] sm:$0xf0]  ;;  %v1773_v46 = vor.u32 %v1460_v37, %v1332_v38  ;;  %v1455_v47 = vld [vmem:[%s2310_s1 + $0x64] sm:$0xf] }
   0xc   :  { %229 = vmatpush.bf16.msra.mxu0 %v1720_v28  ;;  %254 = vmatpush.bf16.msra.mxu2 %v1737_v34  ;;  %v1330_v48 = vld [vmem:[%s2310_s1 + $0x88] sm:$0xf]  ;;  %v1462_v49 = vld [vmem:[%s2310_s1 + $0x94] sm:$0xf0]  ;;  %v1308_v50 = vld [vmem:[%s2310_s1 + $0x70] sm:$0xf0]  ;;  %v1795_v53 = vor.u32 %v1457_v44, %v1306_v43 }
   0xd   :  { %242 = vmatpush.bf16.msra.mxu1 %v1733_v32  ;;  %268 = vmatpush.bf16.msra.mxu3 %v1735_v33  ;;  %v1456_v51 = vld [vmem:[%s2310_s1 + $0x6c] sm:$0xf]  ;;  %v1316_v52 = vld [vmem:[%s2310_s1 + $0x78] sm:$0xf0]  ;;  %v1797_v54 = vor.u32 %v1462_v49, %v1330_v48  ;;  %v1290_v55 = vld [vmem:[%s2310_s1 + $0x40] sm:$0xf]  ;;  %v1807_v57 = vor.u32 %v1455_v47, %v1308_v50 }
   0xe   :  { %v1453_v56 = vld [vmem:[%s2310_s1 + $0x4c] sm:$0xf0]  ;;  %v1809_v58 = vor.u32 %v1456_v51, %v1316_v52  ;;  %v1451_v59 = vld [vmem:[%s2310_s1 + $0x44] sm:$0xf]  ;;  %v1314_v60 = vld [vmem:[%s2310_s1 + $0x68] sm:$0xf] }
   0xf   :  { %v1458_v61 = vld [vmem:[%s2310_s1 + $0x74] sm:$0xf0]  ;;  %v1292_v62 = vld [vmem:[%s2310_s1 + $0x50] sm:$0xf0]  ;;  %v1452_v63 = vld [vmem:[%s2310_s1 + $0x4c] sm:$0xf]  ;;  %v1831_v1 = vor.u32 %v1453_v56, %v1290_v55 }
  0x10   :  { %230 = vmatpush.bf16.msra.mxu0 %v1759_v41  ;;  %255 = vmatpush.bf16.msra.mxu2 %v1761_v42  ;;  %v1300_v0 = vld [vmem:[%s2310_s1 + $0x58] sm:$0xf0]  ;;  %v1833_v2 = vor.u32 %v1458_v61, %v1314_v60  ;;  %v1274_v4 = vld [vmem:[%s2310_s1 + $0x20] sm:$0xf]  ;;  %v1449_v5 = vld [vmem:[%s2310_s1 + $0x2c] sm:$0xf0]  ;;  %v1843_v6 = vor.u32 %v1451_v59, %v1292_v62 }
  0x11   :  { %243 = vmatpush.bf16.msra.mxu1 %v1771_v45  ;;  %269 = vmatpush.bf16.msra.mxu3 %v1773_v46  ;;  %v1845_v9 = vor.u32 %v1452_v63, %v1300_v0  ;;  %v1447_v10 = vld [vmem:[%s2310_s1 + $0x24] sm:$0xf]  ;;  %v1298_v11 = vld [vmem:[%s2310_s1 + $0x48] sm:$0xf]  ;;  %v1454_v13 = vld [vmem:[%s2310_s1 + $0x54] sm:$0xf0]  ;;  %v1867_v19 = vor.u32 %v1449_v5, %v1274_v4 }
  0x12   :  { %v1276_v14 = vld [vmem:[%s2310_s1 + $0x30] sm:$0xf0]  ;;  %v1448_v15 = vld [vmem:[%s2310_s1 + $0x2c] sm:$0xf]  ;;  %v1284_v18 = vld [vmem:[%s2310_s1 + $0x38] sm:$0xf0]  ;;  %v1869_v20 = vor.u32 %v1454_v13, %v1298_v11 }
  0x13   :  { %v1258_v22 = vld [vmem:[%s2310_s1] sm:$0xf]  ;;  %v1445_v23 = vld [vmem:[%s2310_s1 + $0xc] sm:$0xf0]  ;;  %v1879_v24 = vor.u32 %v1447_v10, %v1276_v14  ;;  %v1881_v25 = vor.u32 %v1448_v15, %v1284_v18  ;;  %v1443_v26 = vld [vmem:[%s2310_s1 + $0x4] sm:$0xf] }
  0x14   :  { %231 = vmatpush.bf16.msra.mxu0 %v1795_v53  ;;  %256 = vmatpush.bf16.msra.mxu2 %v1797_v54  ;;  %v1282_v27 = vld [vmem:[%s2310_s1 + $0x28] sm:$0xf]  ;;  %v1450_v29 = vld [vmem:[%s2310_s1 + $0x34] sm:$0xf0]  ;;  %v1260_v30 = vld [vmem:[%s2310_s1 + $0x10] sm:$0xf0]  ;;  %v1903_v36 = vor.u32 %v1445_v23, %v1258_v22 }
  0x15   :  { %244 = vmatpush.bf16.msra.mxu1 %v1807_v57  ;;  %270 = vmatpush.bf16.msra.mxu3 %v1809_v58  ;;  %v1444_v31 = vld [vmem:[%s2310_s1 + $0xc] sm:$0xf]  ;;  %v1268_v35 = vld [vmem:[%s2310_s1 + $0x18] sm:$0xf0]  ;;  %v24_v37 = vld [vmem:[%s2311_s2] sm:$0xff]  ;;  %v1908_v38 = vor.u32 %v1450_v29, %v1282_v27  ;;  %v1912_v39 = vor.u32 %v1443_v26, %v1260_v30 }
  0x16   :  { %v1914_v40 = vor.u32 %v1444_v31, %v1268_v35  ;;  %v1266_v43 = vld [vmem:[%s2310_s1 + $0x8] sm:$0xf]  ;;  %v1446_v44 = vld [vmem:[%s2310_s1 + $0x14] sm:$0xf0]  ;;  %v66_v47 = vpack.c.bf16 %v24_v37, %v24_v37  ;;  %v62_v49 = vld [vmem:[%s2312_s0] sm:$0xff] }
  0x17   :  { %v1926_v48 = vor.u32 %v1446_v44, %v1266_v43  ;;  %v63_v50 = vld [vmem:[%s2312_s0 + $0x8] sm:$0xff]  ;;  %v65_v61 = vld [vmem:[%s2312_s0 + $0x18] sm:$0xff]  ;;  %v64_v18 = vld [vmem:[%s2312_s0 + $0x10] sm:$0xff] }
  0x18   :  { %232 = vmatpush.bf16.msra.mxu0 %v1831_v1  ;;  %257 = vmatpush.bf16.msra.mxu2 %v1833_v2 }
  0x19   :  { %245 = vmatpush.bf16.msra.mxu1 %v1843_v6  ;;  %271 = vmatpush.bf16.msra.mxu3 %v1845_v9 }
  0x1c   :  { %233 = vmatpush.bf16.msra.mxu0 %v1867_v19  ;;  %258 = vmatpush.bf16.msra.mxu2 %v1869_v20 }
  0x1d   :  { %246 = vmatpush.bf16.msra.mxu1 %v1879_v24  ;;  %272 = vmatpush.bf16.msra.mxu3 %v1881_v25 }
  0x20   :  { %234 = vmatpush.bf16.msra.mxu0 %v1903_v36  ;;  %259 = vmatpush.bf16.msra.mxu2 %v1908_v38 }
  0x21   :  { %247 = vmatpush.bf16.msra.mxu1 %v1912_v39  ;;  %273 = vmatpush.bf16.msra.mxu3 %v1914_v40 }
  0x23   :  { %235 = vmatmul.bf16.vlgmr.msra.gmra.mxu0 %v66_v47 }
  0x24   :  { %353 = vmatpush.bf16.msrb.mxu0 %v1647_v3  ;;  %248 = vmatmul.bf16.vlgmr.msra.gmra.mxu1 %v66_v47 }
  0x25   :  { %366 = vmatpush.bf16.msrb.mxu1 %v1658_v7  ;;  %392 = vmatpush.bf16.msrb.mxu3 %v1660_v8 }
  0x26   :  { %274 = vmatmul.bf16.vlgmr.msra.gmra.mxu3 %v66_v47  ;;  %260 = vmatpush.bf16.msra.mxu2 %v1926_v48 }
  0x28   :  { %354 = vmatpush.bf16.msrb.mxu0 %v1672_v12 }
  0x29   :  { %367 = vmatpush.bf16.msrb.mxu1 %v1685_v16  ;;  %393 = vmatpush.bf16.msrb.mxu3 %v1687_v17 }
  0x2a   :  { %379 = vmatpush.bf16.msrb.mxu2 %v1698_v21 }
  0x2b   :  { %261 = vmatmul.bf16.vlgmr.msra.gmra.mxu2 %v66_v47 }
  0x2c   :  { %355 = vmatpush.bf16.msrb.mxu0 %v1720_v28 }
  0x2d   :  { %368 = vmatpush.bf16.msrb.mxu1 %v1733_v32  ;;  %394 = vmatpush.bf16.msrb.mxu3 %v1735_v33 }
  0x2e   :  { %380 = vmatpush.bf16.msrb.mxu2 %v1737_v34 }
  0x30   :  { %356 = vmatpush.bf16.msrb.mxu0 %v1759_v41 }
  0x31   :  { %369 = vmatpush.bf16.msrb.mxu1 %v1771_v45  ;;  %395 = vmatpush.bf16.msrb.mxu3 %v1773_v46 }
  0x32   :  { %381 = vmatpush.bf16.msrb.mxu2 %v1761_v42 }
  0x34   :  { %357 = vmatpush.bf16.msrb.mxu0 %v1795_v53 }
  0x35   :  { %370 = vmatpush.bf16.msrb.mxu1 %v1807_v57  ;;  %396 = vmatpush.bf16.msrb.mxu3 %v1809_v58 }
  0x36   :  { %382 = vmatpush.bf16.msrb.mxu2 %v1797_v54 }
  0x38   :  { %358 = vmatpush.bf16.msrb.mxu0 %v1831_v1 }
  0x39   :  { %371 = vmatpush.bf16.msrb.mxu1 %v1843_v6  ;;  %397 = vmatpush.bf16.msrb.mxu3 %v1845_v9 }
  0x3a   :  { %383 = vmatpush.bf16.msrb.mxu2 %v1833_v2 }
  0x3c   :  { %359 = vmatpush.bf16.msrb.mxu0 %v1867_v19 }
  0x3d   :  { %372 = vmatpush.bf16.msrb.mxu1 %v1879_v24  ;;  %398 = vmatpush.bf16.msrb.mxu3 %v1881_v25 }
  0x3e   :  { %384 = vmatpush.bf16.msrb.mxu2 %v1869_v20 }
  0x40   :  { %360 = vmatpush.bf16.msrb.mxu0 %v1903_v36 }
  0x41   :  { %373 = vmatpush.bf16.msrb.mxu1 %v1912_v39  ;;  %399 = vmatpush.bf16.msrb.mxu3 %v1914_v40 }
  0x42   :  { %385 = vmatpush.bf16.msrb.mxu2 %v1908_v38 }
  0x44   :  { %480 = vmatpush.bf16.msra.mxu0 %v1647_v3 }
  0x45   :  { %493 = vmatpush.bf16.msra.mxu1 %v1658_v7  ;;  %519 = vmatpush.bf16.msra.mxu3 %v1660_v8 }
  0x46   :  { %386 = vmatpush.bf16.msrb.mxu2 %v1926_v48 }
  0x48   :  { %481 = vmatpush.bf16.msra.mxu0 %v1672_v12 }
  0x49   :  { %494 = vmatpush.bf16.msra.mxu1 %v1685_v16  ;;  %520 = vmatpush.bf16.msra.mxu3 %v1687_v17 }
  0x4a   :  { %506 = vmatpush.bf16.msra.mxu2 %v1698_v21 }
  0x4c   :  { %482 = vmatpush.bf16.msra.mxu0 %v1720_v28 }
  0x4d   :  { %495 = vmatpush.bf16.msra.mxu1 %v1733_v32  ;;  %521 = vmatpush.bf16.msra.mxu3 %v1735_v33 }
  0x4e   :  { %507 = vmatpush.bf16.msra.mxu2 %v1737_v34 }
  0x50   :  { %483 = vmatpush.bf16.msra.mxu0 %v1759_v41 }
  0x51   :  { %496 = vmatpush.bf16.msra.mxu1 %v1771_v45  ;;  %522 = vmatpush.bf16.msra.mxu3 %v1773_v46 }
  0x52   :  { %508 = vmatpush.bf16.msra.mxu2 %v1761_v42 }
  0x54   :  { %484 = vmatpush.bf16.msra.mxu0 %v1795_v53 }
  0x55   :  { %497 = vmatpush.bf16.msra.mxu1 %v1807_v57  ;;  %523 = vmatpush.bf16.msra.mxu3 %v1809_v58 }
  0x56   :  { %509 = vmatpush.bf16.msra.mxu2 %v1797_v54 }
  0x58   :  { %485 = vmatpush.bf16.msra.mxu0 %v1831_v1 }
  0x59   :  { %498 = vmatpush.bf16.msra.mxu1 %v1843_v6  ;;  %524 = vmatpush.bf16.msra.mxu3 %v1845_v9 }
  0x5a   :  { %510 = vmatpush.bf16.msra.mxu2 %v1833_v2 }
  0x5c   :  { %486 = vmatpush.bf16.msra.mxu0 %v1867_v19 }
  0x5d   :  { %499 = vmatpush.bf16.msra.mxu1 %v1879_v24  ;;  %525 = vmatpush.bf16.msra.mxu3 %v1881_v25 }
  0x5e   :  { %511 = vmatpush.bf16.msra.mxu2 %v1869_v20 }
  0x60   :  { %487 = vmatpush.bf16.msra.mxu0 %v1903_v36 }
  0x61   :  { %500 = vmatpush.bf16.msra.mxu1 %v1912_v39  ;;  %526 = vmatpush.bf16.msra.mxu3 %v1914_v40 }
  0x62   :  { %512 = vmatpush.bf16.msra.mxu2 %v1908_v38 }
  0x66   :  { %513 = vmatpush.bf16.msra.mxu2 %v1926_v48 }
  0xa0   :  { %v236_v51 = vpop.f32.mrf.mxu0 }
  0xa1   :  { %v279_v52 = vadd.f32 %v236_v51, %v62_v49  ;;  %v249_v55 = vpop.f32.mrf.mxu1 }
  0xa2   :  { %v280_v56 = vadd.f32 %v249_v55, %v63_v50 }
  0xa3   :  { %v1384_v59 = vmul.f32 -1.442695, %v279_v52 }
  0xa4   :  { %v1385_v60 = vmul.f32 -1.442695, %v280_v56 }
  0xa5   :  { %1475 = vpow2.f32 %v1384_v59 }
  0xa6   :  { %1477 = vpow2.f32 %v1385_v60 }
  0xa8   :  { %v238_v0 = vpop.f32.mrf.mxu0 }
  0xa9   :  { %v275_v62 = vpop.f32.mrf.mxu3  ;;  %v251_v4 = vpop.f32.mrf.mxu1 }
  0xaa   :  { %v282_v63 = vadd.f32 %v275_v62, %v65_v61  ;;  %v26_v4 = vld [vmem:[%s2313_s3] sm:$0xff] }
  0xab   :  { %v1476_v10 = vpop.eup %1475 }
  0xac   :  { %v1386_v5 = vmul.f32 -1.442695, %v282_v63  ;;  %v1478_v13 = vpop.eup %1477  ;;  %v286_v14 = vadd.f32 1.0, %v1476_v10 }
  0xad   :  { %v305_v15 = vadd.f32 1.0, %v1478_v13 }
  0xae   :  { %v262_v11 = vpop.f32.mrf.mxu2  ;;  %1479 = vpow2.f32 %v1386_v5  ;;  %v298_v47 = vand.u32 2147483648, %v286_v14  ;;  %v296_v51 = vand.u32 2147483647, %v286_v14  ;;  %vm292_vm2 = vweird.f32 %v286_v14 }
  0xaf   :  { %1481 = vrcp.f32 %v286_v14  ;;  %v281_v26 = vadd.f32 %v262_v11, %v64_v18  ;;  %v317_v49 = vand.u32 2147483648, %v305_v15  ;;  %v315_v55 = vand.u32 2147483647, %v305_v15 }
  0xb0   :  { %1483 = vrcp.f32 %v305_v15  ;;  %vm311_vm3 = vweird.f32 %v305_v15  ;;  %v299_v62 = vor.u32 1.1754944e-38, %v298_v47  ;;  %vm297_vm6 = vcmp.eq.f32.partialorder %v296_v51, 8.507059e+37 }
  0xb1   :  { %v277_v22 = vpop.f32.mrf.mxu3  ;;  %v318_v0 = vor.u32 1.1754944e-38, %v317_v49  ;;  %vm316_vm7 = vcmp.eq.f32.partialorder %v315_v55, 8.507059e+37  ;;  %v1388_v49 = vld [vmem:[%s2312_s0 + $0x28] sm:$0xff] }
  0xb4   :  { %v1480_v23 = vpop.eup %1479 }
  0xb5   :  { %v325_v27 = vadd.f32 1.0, %v1480_v23  ;;  %v1482_v30 = vpop.eup %1481 }
  0xb6   :  { %v264_v29 = vpop.f32.mrf.mxu2  ;;  %v1484_v31 = vpop.eup %1483  ;;  %v288_v35 = vmul.f32 %v1482_v30, %v286_v14  ;;  %vm293_vm0 = vweird.f32 %v1482_v30 }
  0xb7   :  { %1485 = vrcp.f32 %v325_v27  ;;  %v307_v37 = vmul.f32 %v1484_v31, %v305_v15  ;;  %vm312_vm1 = vweird.f32 %v1484_v31  ;;  %vm294_vm4 = vmor %vm292_vm2, %vm293_vm0  ;;  %v337_v29 = vand.u32 2147483648, %v325_v27 }
  0xb8   :  { %1487 = vtanh.f32 %v281_v26  ;;  %v289_v43 = vsub.f32 1.0, %v288_v35  ;;  %vm313_vm5 = vmor %vm311_vm3, %vm312_vm1  ;;  %vm331_vm9 = vweird.f32 %v325_v27  ;;  %v335_v35 = vand.u32 2147483647, %v325_v27 }
  0xb9   :  { %v308_v44 = vsub.f32 1.0, %v307_v37  ;;  %v338_v37 = vor.u32 1.1754944e-38, %v337_v29 }
  0xba   :  { %v290_v50 = vmul.f32 %v1482_v30, %v289_v43  ;;  %vm336_vm11 = vcmp.eq.f32.partialorder %v335_v35, 8.507059e+37 }
  0xbb   :  { %v309_v52 = vmul.f32 %v1484_v31, %v308_v44 }
  0xbc   :  { %v291_v59 = vadd.f32 %v1482_v30, %v290_v50 }
  0xbd   :  { %v1486_v56 = vpop.eup %1485  ;;  %v310_v63 = vadd.f32 %v1484_v31, %v309_v52 }
  0xbe   :  { %v1488_v60 = vpop.eup %1487  ;;  %v327_v61 = vmul.f32 %v1486_v56, %v325_v27  ;;  %v295_v5 = vsel %vm294_vm4, %v1482_v30, %v291_v59  ;;  %vm332_vm8 = vweird.f32 %v1486_v56  ;;  %v1387_v27 = vld [vmem:[%s2312_s0 + $0x20] sm:$0xff] }
  0xbf   :  { %v300_v11 = vsel %vm297_vm6, %v299_v62, %v295_v5  ;;  %v314_v13 = vsel %vm313_vm5, %v1484_v31, %v310_v63  ;;  %vm333_vm10 = vmor %vm331_vm9, %vm332_vm8 }
  0xc0   :  { %v328_v10 = vsub.f32 1.0, %v327_v61  ;;  %v319_v18 = vsel %vm316_vm7, %v318_v0, %v314_v13  ;;  %v342_v14 = vmul.f32 %v1488_v60, %v300_v11  ;;  %v1390_v60 = vld [vmem:[%s2312_s0 + $0x38] sm:$0xff] }
  0xc1   :  { %v341_v15 = vmul.f32 %v319_v18, %v26_v4 }
  0xc2   :  { %v329_v22 = vmul.f32 %v1486_v56, %v328_v10 }
  0xc3   :  { %v2008_v23 = vadd.f32 %v342_v14, %v341_v15  ;;  %v1389_v15 = vld [vmem:[%s2312_s0 + $0x30] sm:$0xff] }
  0xc4   :  { %v330_v26 = vadd.f32 %v1486_v56, %v329_v22 }
  0xc5   :  { %1489 = vtanh.f32 %v2008_v23 }
  0xc6   :  { %v334_v30 = vsel %vm333_vm10, %v1486_v56, %v330_v26 }
  0xc7   :  { %v339_v31 = vsel %vm336_vm11, %v338_v37, %v334_v30 }
  0xcb   :  { %v1490_v43 = vpop.eup %1489 }
  0xcc   :  { %v345_v44 = vmul.f32 %v1490_v43, %v339_v31 }
  0xce   :  { %v346_v47 = vpack.c.bf16 %v345_v44, %v345_v44 }
  0xd0   :  { %347 = vst [vmem:[%s2314_s4] sm:$0xf] %v346_v47  ;;  %361 = vmatmul.bf16.vlgmr.msrb.gmra.mxu0 %v346_v47  ;;  %374 = vmatmul.bf16.vlgmr.msrb.gmra.mxu1 %v346_v47 }
  0xd1   :  { %387 = vmatmul.bf16.vlgmr.msrb.gmra.mxu2 %v346_v47  ;;  %400 = vmatmul.bf16.vlgmr.msrb.gmra.mxu3 %v346_v47 }
  0xd2   :  { %607 = vmatpush.bf16.msrb.mxu0 %v1647_v3  ;;  %620 = vmatpush.bf16.msrb.mxu1 %v1658_v7 }
  0xd3   :  { %633 = vmatpush.bf16.msrb.mxu2 %v1698_v21  ;;  %646 = vmatpush.bf16.msrb.mxu3 %v1660_v8 }
  0xd6   :  { %608 = vmatpush.bf16.msrb.mxu0 %v1672_v12  ;;  %621 = vmatpush.bf16.msrb.mxu1 %v1685_v16 }
  0xd7   :  { %634 = vmatpush.bf16.msrb.mxu2 %v1737_v34  ;;  %647 = vmatpush.bf16.msrb.mxu3 %v1687_v17 }
  0xda   :  { %609 = vmatpush.bf16.msrb.mxu0 %v1720_v28  ;;  %622 = vmatpush.bf16.msrb.mxu1 %v1733_v32 }
  0xdb   :  { %635 = vmatpush.bf16.msrb.mxu2 %v1761_v42  ;;  %648 = vmatpush.bf16.msrb.mxu3 %v1735_v33 }
  0xde   :  { %610 = vmatpush.bf16.msrb.mxu0 %v1759_v41  ;;  %623 = vmatpush.bf16.msrb.mxu1 %v1771_v45 }
  0xdf   :  { %636 = vmatpush.bf16.msrb.mxu2 %v1797_v54  ;;  %649 = vmatpush.bf16.msrb.mxu3 %v1773_v46 }
  0xe2   :  { %611 = vmatpush.bf16.msrb.mxu0 %v1795_v53  ;;  %624 = vmatpush.bf16.msrb.mxu1 %v1807_v57 }
  0xe3   :  { %637 = vmatpush.bf16.msrb.mxu2 %v1833_v2  ;;  %650 = vmatpush.bf16.msrb.mxu3 %v1809_v58 }
  0xe6   :  { %612 = vmatpush.bf16.msrb.mxu0 %v1831_v1  ;;  %625 = vmatpush.bf16.msrb.mxu1 %v1843_v6 }
  0xe7   :  { %638 = vmatpush.bf16.msrb.mxu2 %v1869_v20  ;;  %651 = vmatpush.bf16.msrb.mxu3 %v1845_v9 }
  0xea   :  { %613 = vmatpush.bf16.msrb.mxu0 %v1867_v19  ;;  %626 = vmatpush.bf16.msrb.mxu1 %v1879_v24 }
  0xeb   :  { %639 = vmatpush.bf16.msrb.mxu2 %v1908_v38  ;;  %652 = vmatpush.bf16.msrb.mxu3 %v1881_v25 }
  0xee   :  { %614 = vmatpush.bf16.msrb.mxu0 %v1903_v36  ;;  %627 = vmatpush.bf16.msrb.mxu1 %v1912_v39 }
  0xef   :  { %640 = vmatpush.bf16.msrb.mxu2 %v1926_v48  ;;  %653 = vmatpush.bf16.msrb.mxu3 %v1914_v40 }
 0x14d   :  { %v362_v50 = vpop.f32.mrf.mxu0  ;;  %v375_v51 = vpop.f32.mrf.mxu1 }
 0x14e   :  { %v405_v52 = vadd.f32 %v1387_v27, %v362_v50  ;;  %v406_v55 = vadd.f32 %v1388_v49, %v375_v51 }
 0x150   :  { %v1391_v56 = vmul.f32 -1.442695, %v405_v52  ;;  %v1392_v59 = vmul.f32 -1.442695, %v406_v55 }
 0x152   :  { %1491 = vpow2.f32 %v1391_v56 }
 0x153   :  { %1493 = vpow2.f32 %v1392_v59 }
 0x154   :  { %v388_v61 = vpop.f32.mrf.mxu2  ;;  %v401_v62 = vpop.f32.mrf.mxu3 }
 0x155   :  { %v408_v63 = vadd.f32 %v1390_v60, %v401_v62  ;;  %v364_v0 = vpop.f32.mrf.mxu0  ;;  %v377_v4 = vpop.f32.mrf.mxu1  ;;  %v407_v30 = vadd.f32 %v1389_v15, %v388_v61 }
 0x157   :  { %v1393_v5 = vmul.f32 -1.442695, %v408_v63 }
 0x158   :  { %v1492_v10 = vpop.eup %1491 }
 0x159   :  { %v1494_v11 = vpop.eup %1493  ;;  %v412_v13 = vadd.f32 1.0, %v1492_v10  ;;  %1495 = vpow2.f32 %v1393_v5 }
 0x15a   :  { %v431_v18 = vadd.f32 1.0, %v1494_v11 }
 0x15b   :  { %1497 = vrcp.f32 %v412_v13  ;;  %v424_v27 = vand.u32 2147483648, %v412_v13  ;;  %v422_v51 = vand.u32 2147483647, %v412_v13  ;;  %vm418_vm14 = vweird.f32 %v412_v13 }
 0x15c   :  { %1499 = vrcp.f32 %v431_v18  ;;  %v390_v14 = vpop.f32.mrf.mxu2  ;;  %v403_v22 = vpop.f32.mrf.mxu3  ;;  %v443_v49 = vand.u32 2147483648, %v431_v18  ;;  %v441_v55 = vand.u32 2147483647, %v431_v18  ;;  %vm437_vm15 = vweird.f32 %v431_v18 }
 0x15d   :  { %v425_v60 = vor.u32 1.1754944e-38, %v424_v27  ;;  %vm423_vm2 = vcmp.eq.f32.partialorder %v422_v51, 8.507059e+37 }
 0x15e   :  { %v444_v63 = vor.u32 1.1754944e-38, %v443_v49  ;;  %vm442_vm3 = vcmp.eq.f32.partialorder %v441_v55, 8.507059e+37 }
 0x15f   :  { %v1496_v26 = vpop.eup %1495 }
 0x160   :  { %v451_v29 = vadd.f32 1.0, %v1496_v26 }
 0x161   :  { %v1498_v35 = vpop.eup %1497 }
 0x162   :  { %v1500_v37 = vpop.eup %1499  ;;  %v414_v43 = vmul.f32 %v1498_v35, %v412_v13  ;;  %1501 = vrcp.f32 %v451_v29  ;;  %vm419_vm12 = vweird.f32 %v1498_v35  ;;  %vm457_vm5 = vweird.f32 %v451_v29 }
 0x163   :  { %v433_v31 = vmul.f32 %v1500_v37, %v431_v18  ;;  %1503 = vtanh.f32 %v407_v30  ;;  %vm438_vm13 = vweird.f32 %v1500_v37  ;;  %vm420_vm0 = vmor %vm418_vm14, %vm419_vm12  ;;  %v463_v30 = vand.u32 2147483648, %v451_v29 }
 0x164   :  { %v415_v44 = vsub.f32 1.0, %v414_v43  ;;  %vm439_vm1 = vmor %vm437_vm15, %vm438_vm13 }
 0x165   :  { %v434_v47 = vsub.f32 1.0, %v433_v31  ;;  %v464_v31 = vor.u32 1.1754944e-38, %v463_v30 }
 0x166   :  { %v416_v50 = vmul.f32 %v1498_v35, %v415_v44 }
 0x167   :  { %v435_v52 = vmul.f32 %v1500_v37, %v434_v47 }
 0x168   :  { %v1502_v56 = vpop.eup %1501  ;;  %v417_v59 = vadd.f32 %v1498_v35, %v416_v50 }
 0x169   :  { %v436_v61 = vadd.f32 %v1500_v37, %v435_v52  ;;  %v453_v62 = vmul.f32 %v1502_v56, %v451_v29  ;;  %v1504_v4 = vpop.eup %1503  ;;  %vm458_vm4 = vweird.f32 %v1502_v56 }
 0x16a   :  { %v421_v0 = vsel %vm420_vm0, %v1498_v35, %v417_v59  ;;  %v461_v35 = vand.u32 2147483647, %v451_v29  ;;  %vm459_vm6 = vmor %vm457_vm5, %vm458_vm4  ;;  %v1396_v29 = vld [vmem:[%s2312_s0 + $0x48] sm:$0xff]  ;;  %v1398_v59 = vld [vmem:[%s2312_s0 + $0x58] sm:$0xff] }
 0x16b   :  { %v426_v5 = vsel %vm423_vm2, %v425_v60, %v421_v0  ;;  %v440_v10 = vsel %vm439_vm1, %v1500_v37, %v436_v61  ;;  %v454_v11 = vsub.f32 1.0, %v453_v62 }
 0x16c   :  { %v445_v14 = vsel %vm442_vm3, %v444_v63, %v440_v10  ;;  %v468_v22 = vmul.f32 %v1504_v4, %v426_v5  ;;  %vm462_vm7 = vcmp.eq.f32.partialorder %v461_v35, 8.507059e+37 }
 0x16d   :  { %v467_v15 = vmul.f32 %v445_v14, %v2008_v23  ;;  %v455_v26 = vmul.f32 %v1502_v56, %v454_v11  ;;  %v1395_v23 = vld [vmem:[%s2312_s0 + $0x40] sm:$0xff] }
 0x16f   :  { %v2059_v13 = vadd.f32 %v468_v22, %v467_v15  ;;  %v456_v18 = vadd.f32 %v1502_v56, %v455_v26  ;;  %v1397_v26 = vld [vmem:[%s2312_s0 + $0x50] sm:$0xff] }
 0x171   :  { %1505 = vtanh.f32 %v2059_v13  ;;  %v460_v43 = vsel %vm459_vm6, %v1502_v56, %v456_v18 }
 0x172   :  { %v465_v44 = vsel %vm462_vm7, %v464_v31, %v460_v43 }
 0x177   :  { %v1506_v37 = vpop.eup %1505 }
 0x178   :  { %v471_v47 = vmul.f32 %v1506_v37, %v465_v44 }
 0x17a   :  { %v472_v27 = vpack.c.bf16 %v471_v47, %v471_v47 }
 0x17c   :  { %1394 = vst [vmem:[%s2314_s4 + $0x4] sm:$0xf] %v472_v27  ;;  %488 = vmatmul.bf16.vlgmr.msra.gmra.mxu0 %v472_v27  ;;  %501 = vmatmul.bf16.vlgmr.msra.gmra.mxu1 %v472_v27 }
 0x17d   :  { %514 = vmatmul.bf16.vlgmr.msra.gmra.mxu2 %v472_v27  ;;  %527 = vmatmul.bf16.vlgmr.msra.gmra.mxu3 %v472_v27 }
 0x17e   :  { %734 = vmatpush.bf16.msra.mxu0 %v1647_v3  ;;  %747 = vmatpush.bf16.msra.mxu1 %v1658_v7 }
 0x17f   :  { %760 = vmatpush.bf16.msra.mxu2 %v1698_v21  ;;  %773 = vmatpush.bf16.msra.mxu3 %v1660_v8 }
 0x182   :  { %735 = vmatpush.bf16.msra.mxu0 %v1672_v12  ;;  %748 = vmatpush.bf16.msra.mxu1 %v1685_v16 }
 0x183   :  { %761 = vmatpush.bf16.msra.mxu2 %v1737_v34  ;;  %774 = vmatpush.bf16.msra.mxu3 %v1687_v17 }
 0x186   :  { %736 = vmatpush.bf16.msra.mxu0 %v1720_v28  ;;  %749 = vmatpush.bf16.msra.mxu1 %v1733_v32 }
 0x187   :  { %762 = vmatpush.bf16.msra.mxu2 %v1761_v42  ;;  %775 = vmatpush.bf16.msra.mxu3 %v1735_v33 }
 0x18a   :  { %737 = vmatpush.bf16.msra.mxu0 %v1759_v41  ;;  %750 = vmatpush.bf16.msra.mxu1 %v1771_v45 }
 0x18b   :  { %763 = vmatpush.bf16.msra.mxu2 %v1797_v54  ;;  %776 = vmatpush.bf16.msra.mxu3 %v1773_v46 }
 0x18e   :  { %738 = vmatpush.bf16.msra.mxu0 %v1795_v53  ;;  %751 = vmatpush.bf16.msra.mxu1 %v1807_v57 }
 0x18f   :  { %764 = vmatpush.bf16.msra.mxu2 %v1833_v2  ;;  %777 = vmatpush.bf16.msra.mxu3 %v1809_v58 }
 0x192   :  { %739 = vmatpush.bf16.msra.mxu0 %v1831_v1  ;;  %752 = vmatpush.bf16.msra.mxu1 %v1843_v6 }
 0x193   :  { %765 = vmatpush.bf16.msra.mxu2 %v1869_v20  ;;  %778 = vmatpush.bf16.msra.mxu3 %v1845_v9 }
 0x196   :  { %740 = vmatpush.bf16.msra.mxu0 %v1867_v19  ;;  %753 = vmatpush.bf16.msra.mxu1 %v1879_v24 }
 0x197   :  { %766 = vmatpush.bf16.msra.mxu2 %v1908_v38  ;;  %779 = vmatpush.bf16.msra.mxu3 %v1881_v25 }
 0x19a   :  { %741 = vmatpush.bf16.msra.mxu0 %v1903_v36  ;;  %754 = vmatpush.bf16.msra.mxu1 %v1912_v39 }
 0x19b   :  { %767 = vmatpush.bf16.msra.mxu2 %v1926_v48  ;;  %780 = vmatpush.bf16.msra.mxu3 %v1914_v40 }
 0x1f9   :  { %v489_v49 = vpop.f32.mrf.mxu0  ;;  %v502_v50 = vpop.f32.mrf.mxu1 }
 0x1fa   :  { %v532_v51 = vadd.f32 %v1395_v23, %v489_v49  ;;  %v533_v52 = vadd.f32 %v1396_v29, %v502_v50 }
 0x1fc   :  { %v1399_v55 = vmul.f32 -1.442695, %v532_v51  ;;  %v1400_v56 = vmul.f32 -1.442695, %v533_v52 }
 0x1fe   :  { %1507 = vpow2.f32 %v1399_v55 }
 0x1ff   :  { %1509 = vpow2.f32 %v1400_v56 }
 0x200   :  { %v515_v60 = vpop.f32.mrf.mxu2  ;;  %v528_v61 = vpop.f32.mrf.mxu3 }
 0x201   :  { %v535_v62 = vadd.f32 %v1398_v59, %v528_v61  ;;  %v491_v63 = vpop.f32.mrf.mxu0  ;;  %v504_v0 = vpop.f32.mrf.mxu1  ;;  %v534_v43 = vadd.f32 %v1397_v26, %v515_v60 }
 0x203   :  { %v1401_v4 = vmul.f32 -1.442695, %v535_v62 }
 0x204   :  { %v1508_v5 = vpop.eup %1507 }
 0x205   :  { %v1510_v10 = vpop.eup %1509  ;;  %v539_v11 = vadd.f32 1.0, %v1508_v5  ;;  %1511 = vpow2.f32 %v1401_v4 }
 0x206   :  { %v558_v14 = vadd.f32 1.0, %v1510_v10 }
 0x207   :  { %1513 = vrcp.f32 %v539_v11  ;;  %v551_v23 = vand.u32 2147483648, %v539_v11  ;;  %v549_v50 = vand.u32 2147483647, %v539_v11  ;;  %vm545_vm10 = vweird.f32 %v539_v11 }
 0x208   :  { %1515 = vrcp.f32 %v558_v14  ;;  %v517_v22 = vpop.f32.mrf.mxu2  ;;  %v530_v15 = vpop.f32.mrf.mxu3  ;;  %v570_v29 = vand.u32 2147483648, %v558_v14  ;;  %v568_v52 = vand.u32 2147483647, %v558_v14  ;;  %vm564_vm11 = vweird.f32 %v558_v14 }
 0x209   :  { %v552_v59 = vor.u32 1.1754944e-38, %v551_v23  ;;  %vm550_vm14 = vcmp.eq.f32.partialorder %v549_v50, 8.507059e+37 }
 0x20a   :  { %v571_v62 = vor.u32 1.1754944e-38, %v570_v29  ;;  %vm569_vm15 = vcmp.eq.f32.partialorder %v568_v52, 8.507059e+37 }
 0x20b   :  { %v1512_v18 = vpop.eup %1511 }
 0x20c   :  { %v578_v30 = vadd.f32 1.0, %v1512_v18 }
 0x20d   :  { %v1514_v35 = vpop.eup %1513 }
 0x20e   :  { %v1516_v31 = vpop.eup %1515  ;;  %v541_v37 = vmul.f32 %v1514_v35, %v539_v11  ;;  %1517 = vrcp.f32 %v578_v30  ;;  %vm546_vm8 = vweird.f32 %v1514_v35  ;;  %vm584_vm1 = vweird.f32 %v578_v30 }
 0x20f   :  { %v560_v44 = vmul.f32 %v1516_v31, %v558_v14  ;;  %1519 = vtanh.f32 %v534_v43  ;;  %vm565_vm9 = vweird.f32 %v1516_v31  ;;  %vm547_vm12 = vmor %vm545_vm10, %vm546_vm8  ;;  %v590_v43 = vand.u32 2147483648, %v578_v30 }
 0x210   :  { %v542_v47 = vsub.f32 1.0, %v541_v37  ;;  %vm566_vm13 = vmor %vm564_vm11, %vm565_vm9 }
 0x211   :  { %v561_v27 = vsub.f32 1.0, %v560_v44  ;;  %v591_v44 = vor.u32 1.1754944e-38, %v590_v43 }
 0x212   :  { %v543_v49 = vmul.f32 %v1514_v35, %v542_v47 }
 0x213   :  { %v562_v51 = vmul.f32 %v1516_v31, %v561_v27 }
 0x214   :  { %v1518_v55 = vpop.eup %1517  ;;  %v544_v56 = vadd.f32 %v1514_v35, %v543_v49 }
 0x215   :  { %v563_v60 = vadd.f32 %v1516_v31, %v562_v51  ;;  %v580_v61 = vmul.f32 %v1518_v55, %v578_v30  ;;  %v1520_v0 = vpop.eup %1519  ;;  %vm585_vm0 = vweird.f32 %v1518_v55 }
 0x216   :  { %v548_v63 = vsel %vm547_vm12, %v1514_v35, %v544_v56  ;;  %v588_v35 = vand.u32 2147483647, %v578_v30  ;;  %vm586_vm2 = vmor %vm584_vm1, %vm585_vm0  ;;  %v1404_v30 = vld [vmem:[%s2312_s0 + $0x68] sm:$0xff]  ;;  %v1406_v56 = vld [vmem:[%s2312_s0 + $0x78] sm:$0xff] }
 0x217   :  { %v553_v4 = vsel %vm550_vm14, %v552_v59, %v548_v63  ;;  %v567_v5 = vsel %vm566_vm13, %v1516_v31, %v563_v60  ;;  %v581_v10 = vsub.f32 1.0, %v580_v61 }
 0x218   :  { %v572_v22 = vsel %vm569_vm15, %v571_v62, %v567_v5  ;;  %v595_v15 = vmul.f32 %v1520_v0, %v553_v4  ;;  %vm589_vm3 = vcmp.eq.f32.partialorder %v588_v35, 8.507059e+37 }
 0x219   :  { %v594_v26 = vmul.f32 %v572_v22, %v2059_v13  ;;  %v582_v18 = vmul.f32 %v1518_v55, %v581_v10  ;;  %v1403_v13 = vld [vmem:[%s2312_s0 + $0x60] sm:$0xff] }
 0x21b   :  { %v2110_v11 = vadd.f32 %v595_v15, %v594_v26  ;;  %v583_v14 = vadd.f32 %v1518_v55, %v582_v18  ;;  %v1405_v18 = vld [vmem:[%s2312_s0 + $0x70] sm:$0xff] }
 0x21d   :  { %1521 = vtanh.f32 %v2110_v11  ;;  %v587_v37 = vsel %vm586_vm2, %v1518_v55, %v583_v14 }
 0x21e   :  { %v592_v47 = vsel %vm589_vm3, %v591_v44, %v587_v37 }
 0x223   :  { %v1522_v31 = vpop.eup %1521 }
 0x224   :  { %v598_v27 = vmul.f32 %v1522_v31, %v592_v47 }
 0x226   :  { %v599_v23 = vpack.c.bf16 %v598_v27, %v598_v27 }
 0x228   :  { %1402 = vst [vmem:[%s2314_s4 + $0x8] sm:$0xf] %v599_v23  ;;  %615 = vmatmul.bf16.vlgmr.msrb.gmra.mxu0 %v599_v23  ;;  %628 = vmatmul.bf16.vlgmr.msrb.gmra.mxu1 %v599_v23 }
 0x229   :  { %641 = vmatmul.bf16.vlgmr.msrb.gmra.mxu2 %v599_v23  ;;  %654 = vmatmul.bf16.vlgmr.msrb.gmra.mxu3 %v599_v23 }
 0x22a   :  { %861 = vmatpush.bf16.msrb.mxu0 %v1647_v3  ;;  %874 = vmatpush.bf16.msrb.mxu1 %v1658_v7 }
 0x22b   :  { %887 = vmatpush.bf16.msrb.mxu2 %v1698_v21  ;;  %900 = vmatpush.bf16.msrb.mxu3 %v1660_v8 }
 0x22e   :  { %862 = vmatpush.bf16.msrb.mxu0 %v1672_v12  ;;  %875 = vmatpush.bf16.msrb.mxu1 %v1685_v16 }
 0x22f   :  { %888 = vmatpush.bf16.msrb.mxu2 %v1737_v34  ;;  %901 = vmatpush.bf16.msrb.mxu3 %v1687_v17 }
 0x232   :  { %863 = vmatpush.bf16.msrb.mxu0 %v1720_v28  ;;  %876 = vmatpush.bf16.msrb.mxu1 %v1733_v32 }
 0x233   :  { %889 = vmatpush.bf16.msrb.mxu2 %v1761_v42  ;;  %902 = vmatpush.bf16.msrb.mxu3 %v1735_v33 }
 0x236   :  { %864 = vmatpush.bf16.msrb.mxu0 %v1759_v41  ;;  %877 = vmatpush.bf16.msrb.mxu1 %v1771_v45 }
 0x237   :  { %890 = vmatpush.bf16.msrb.mxu2 %v1797_v54  ;;  %903 = vmatpush.bf16.msrb.mxu3 %v1773_v46 }
 0x23a   :  { %865 = vmatpush.bf16.msrb.mxu0 %v1795_v53  ;;  %878 = vmatpush.bf16.msrb.mxu1 %v1807_v57 }
 0x23b   :  { %891 = vmatpush.bf16.msrb.mxu2 %v1833_v2  ;;  %904 = vmatpush.bf16.msrb.mxu3 %v1809_v58 }
 0x23e   :  { %866 = vmatpush.bf16.msrb.mxu0 %v1831_v1  ;;  %879 = vmatpush.bf16.msrb.mxu1 %v1843_v6 }
 0x23f   :  { %892 = vmatpush.bf16.msrb.mxu2 %v1869_v20  ;;  %905 = vmatpush.bf16.msrb.mxu3 %v1845_v9 }
 0x242   :  { %867 = vmatpush.bf16.msrb.mxu0 %v1867_v19  ;;  %880 = vmatpush.bf16.msrb.mxu1 %v1879_v24 }
 0x243   :  { %893 = vmatpush.bf16.msrb.mxu2 %v1908_v38  ;;  %906 = vmatpush.bf16.msrb.mxu3 %v1881_v25 }
 0x246   :  { %868 = vmatpush.bf16.msrb.mxu0 %v1903_v36  ;;  %881 = vmatpush.bf16.msrb.mxu1 %v1912_v39 }
 0x247   :  { %894 = vmatpush.bf16.msrb.mxu2 %v1926_v48  ;;  %907 = vmatpush.bf16.msrb.mxu3 %v1914_v40 }
 0x2a5   :  { %v616_v29 = vpop.f32.mrf.mxu0  ;;  %v629_v49 = vpop.f32.mrf.mxu1 }
 0x2a6   :  { %v659_v50 = vadd.f32 %v1403_v13, %v616_v29  ;;  %v660_v51 = vadd.f32 %v1404_v30, %v629_v49 }
 0x2a8   :  { %v1407_v52 = vmul.f32 -1.442695, %v659_v50  ;;  %v1408_v55 = vmul.f32 -1.442695, %v660_v51 }
 0x2aa   :  { %1523 = vpow2.f32 %v1407_v52 }
 0x2ab   :  { %1525 = vpow2.f32 %v1408_v55 }
 0x2ac   :  { %v642_v59 = vpop.f32.mrf.mxu2  ;;  %v655_v60 = vpop.f32.mrf.mxu3 }
 0x2ad   :  { %v662_v61 = vadd.f32 %v1406_v56, %v655_v60  ;;  %v618_v62 = vpop.f32.mrf.mxu0  ;;  %v631_v63 = vpop.f32.mrf.mxu1  ;;  %v661_v37 = vadd.f32 %v1405_v18, %v642_v59 }
 0x2af   :  { %v1409_v0 = vmul.f32 -1.442695, %v662_v61 }
 0x2b0   :  { %v1524_v4 = vpop.eup %1523 }
 0x2b1   :  { %v1526_v5 = vpop.eup %1525  ;;  %v666_v10 = vadd.f32 1.0, %v1524_v4  ;;  %1527 = vpow2.f32 %v1409_v0 }
 0x2b2   :  { %v685_v22 = vadd.f32 1.0, %v1526_v5 }
 0x2b3   :  { %1529 = vrcp.f32 %v666_v10  ;;  %v678_v13 = vand.u32 2147483648, %v666_v10  ;;  %v676_v49 = vand.u32 2147483647, %v666_v10  ;;  %vm672_vm6 = vweird.f32 %v666_v10 }
 0x2b4   :  { %1531 = vrcp.f32 %v685_v22  ;;  %v644_v15 = vpop.f32.mrf.mxu2  ;;  %v657_v26 = vpop.f32.mrf.mxu3  ;;  %v697_v30 = vand.u32 2147483648, %v685_v22  ;;  %v695_v51 = vand.u32 2147483647, %v685_v22  ;;  %vm691_vm7 = vweird.f32 %v685_v22 }
 0x2b5   :  { %v679_v56 = vor.u32 1.1754944e-38, %v678_v13  ;;  %vm677_vm10 = vcmp.eq.f32.partialorder %v676_v49, 8.507059e+37 }
 0x2b6   :  { %v698_v61 = vor.u32 1.1754944e-38, %v697_v30  ;;  %vm696_vm11 = vcmp.eq.f32.partialorder %v695_v51, 8.507059e+37 }
 0x2b7   :  { %v1528_v14 = vpop.eup %1527 }
 0x2b8   :  { %v705_v43 = vadd.f32 1.0, %v1528_v14 }
 0x2b9   :  { %v1530_v35 = vpop.eup %1529 }
 0x2ba   :  { %v1532_v44 = vpop.eup %1531  ;;  %v668_v31 = vmul.f32 %v1530_v35, %v666_v10  ;;  %1533 = vrcp.f32 %v705_v43  ;;  %vm673_vm4 = vweird.f32 %v1530_v35  ;;  %vm711_vm13 = vweird.f32 %v705_v43 }
 0x2bb   :  { %v687_v47 = vmul.f32 %v1532_v44, %v685_v22  ;;  %1535 = vtanh.f32 %v661_v37  ;;  %vm692_vm5 = vweird.f32 %v1532_v44  ;;  %vm674_vm8 = vmor %vm672_vm6, %vm673_vm4  ;;  %v717_v37 = vand.u32 2147483648, %v705_v43 }
 0x2bc   :  { %v669_v27 = vsub.f32 1.0, %v668_v31  ;;  %vm693_vm9 = vmor %vm691_vm7, %vm692_vm5 }
 0x2bd   :  { %v688_v23 = vsub.f32 1.0, %v687_v47  ;;  %v718_v47 = vor.u32 1.1754944e-38, %v717_v37 }
 0x2be   :  { %v670_v29 = vmul.f32 %v1530_v35, %v669_v27 }
 0x2bf   :  { %v689_v50 = vmul.f32 %v1532_v44, %v688_v23 }
 0x2c0   :  { %v1534_v52 = vpop.eup %1533  ;;  %v671_v55 = vadd.f32 %v1530_v35, %v670_v29 }
 0x2c1   :  { %v690_v59 = vadd.f32 %v1532_v44, %v689_v50  ;;  %v707_v60 = vmul.f32 %v1534_v52, %v705_v43  ;;  %v1536_v63 = vpop.eup %1535  ;;  %vm712_vm12 = vweird.f32 %v1534_v52 }
 0x2c2   :  { %v675_v62 = vsel %vm674_vm8, %v1530_v35, %v671_v55  ;;  %v715_v35 = vand.u32 2147483647, %v705_v43  ;;  %vm713_vm14 = vmor %vm711_vm13, %vm712_vm12  ;;  %v1412_v43 = vld [vmem:[%s2312_s0 + $0x88] sm:$0xff]  ;;  %v1414_v55 = vld [vmem:[%s2312_s0 + $0x98] sm:$0xff] }
 0x2c3   :  { %v680_v0 = vsel %vm677_vm10, %v679_v56, %v675_v62  ;;  %v694_v4 = vsel %vm693_vm9, %v1532_v44, %v690_v59  ;;  %v708_v5 = vsub.f32 1.0, %v707_v60 }
 0x2c4   :  { %v699_v15 = vsel %vm696_vm11, %v698_v61, %v694_v4  ;;  %v722_v26 = vmul.f32 %v1536_v63, %v680_v0  ;;  %vm716_vm15 = vcmp.eq.f32.partialorder %v715_v35, 8.507059e+37 }
 0x2c5   :  { %v721_v18 = vmul.f32 %v699_v15, %v2110_v11  ;;  %v709_v14 = vmul.f32 %v1534_v52, %v708_v5  ;;  %v1411_v11 = vld [vmem:[%s2312_s0 + $0x80] sm:$0xff] }
 0x2c7   :  { %v2161_v10 = vadd.f32 %v722_v26, %v721_v18  ;;  %v710_v22 = vadd.f32 %v1534_v52, %v709_v14  ;;  %v1413_v14 = vld [vmem:[%s2312_s0 + $0x90] sm:$0xff] }
 0x2c9   :  { %1537 = vtanh.f32 %v2161_v10  ;;  %v714_v31 = vsel %vm713_vm14, %v1534_v52, %v710_v22 }
 0x2ca   :  { %v719_v27 = vsel %vm716_vm15, %v718_v47, %v714_v31 }
 0x2cf   :  { %v1538_v44 = vpop.eup %1537 }
 0x2d0   :  { %v725_v23 = vmul.f32 %v1538_v44, %v719_v27 }
 0x2d2   :  { %v726_v13 = vpack.c.bf16 %v725_v23, %v725_v23 }
 0x2d4   :  { %1410 = vst [vmem:[%s2314_s4 + $0xc] sm:$0xf] %v726_v13  ;;  %742 = vmatmul.bf16.vlgmr.msra.gmra.mxu0 %v726_v13  ;;  %755 = vmatmul.bf16.vlgmr.msra.gmra.mxu1 %v726_v13 }
 0x2d5   :  { %768 = vmatmul.bf16.vlgmr.msra.gmra.mxu2 %v726_v13  ;;  %781 = vmatmul.bf16.vlgmr.msra.gmra.mxu3 %v726_v13 }
 0x2d6   :  { %988 = vmatpush.bf16.msra.mxu0 %v1647_v3  ;;  %1001 = vmatpush.bf16.msra.mxu1 %v1658_v7 }
 0x2d7   :  { %1014 = vmatpush.bf16.msra.mxu2 %v1698_v21  ;;  %1027 = vmatpush.bf16.msra.mxu3 %v1660_v8 }
 0x2da   :  { %989 = vmatpush.bf16.msra.mxu0 %v1672_v12  ;;  %1002 = vmatpush.bf16.msra.mxu1 %v1685_v16 }
 0x2db   :  { %1015 = vmatpush.bf16.msra.mxu2 %v1737_v34  ;;  %1028 = vmatpush.bf16.msra.mxu3 %v1687_v17 }
 0x2de   :  { %990 = vmatpush.bf16.msra.mxu0 %v1720_v28  ;;  %1003 = vmatpush.bf16.msra.mxu1 %v1733_v32 }
 0x2df   :  { %1016 = vmatpush.bf16.msra.mxu2 %v1761_v42  ;;  %1029 = vmatpush.bf16.msra.mxu3 %v1735_v33 }
 0x2e2   :  { %991 = vmatpush.bf16.msra.mxu0 %v1759_v41  ;;  %1004 = vmatpush.bf16.msra.mxu1 %v1771_v45 }
 0x2e3   :  { %1017 = vmatpush.bf16.msra.mxu2 %v1797_v54  ;;  %1030 = vmatpush.bf16.msra.mxu3 %v1773_v46 }
 0x2e6   :  { %992 = vmatpush.bf16.msra.mxu0 %v1795_v53  ;;  %1005 = vmatpush.bf16.msra.mxu1 %v1807_v57 }
 0x2e7   :  { %1018 = vmatpush.bf16.msra.mxu2 %v1833_v2  ;;  %1031 = vmatpush.bf16.msra.mxu3 %v1809_v58 }
 0x2ea   :  { %993 = vmatpush.bf16.msra.mxu0 %v1831_v1  ;;  %1006 = vmatpush.bf16.msra.mxu1 %v1843_v6 }
 0x2eb   :  { %1019 = vmatpush.bf16.msra.mxu2 %v1869_v20  ;;  %1032 = vmatpush.bf16.msra.mxu3 %v1845_v9 }
 0x2ee   :  { %994 = vmatpush.bf16.msra.mxu0 %v1867_v19  ;;  %1007 = vmatpush.bf16.msra.mxu1 %v1879_v24 }
 0x2ef   :  { %1020 = vmatpush.bf16.msra.mxu2 %v1908_v38  ;;  %1033 = vmatpush.bf16.msra.mxu3 %v1881_v25 }
 0x2f2   :  { %995 = vmatpush.bf16.msra.mxu0 %v1903_v36  ;;  %1008 = vmatpush.bf16.msra.mxu1 %v1912_v39 }
 0x2f3   :  { %1021 = vmatpush.bf16.msra.mxu2 %v1926_v48  ;;  %1034 = vmatpush.bf16.msra.mxu3 %v1914_v40 }
 0x351   :  { %v743_v30 = vpop.f32.mrf.mxu0  ;;  %v756_v29 = vpop.f32.mrf.mxu1 }
 0x352   :  { %v786_v49 = vadd.f32 %v1411_v11, %v743_v30  ;;  %v787_v50 = vadd.f32 %v1412_v43, %v756_v29 }
 0x354   :  { %v1415_v51 = vmul.f32 -1.442695, %v786_v49  ;;  %v1416_v52 = vmul.f32 -1.442695, %v787_v50 }
 0x356   :  { %1539 = vpow2.f32 %v1415_v51 }
 0x357   :  { %1541 = vpow2.f32 %v1416_v52 }
 0x358   :  { %v769_v56 = vpop.f32.mrf.mxu2  ;;  %v782_v59 = vpop.f32.mrf.mxu3 }
 0x359   :  { %v789_v60 = vadd.f32 %v1414_v55, %v782_v59  ;;  %v745_v61 = vpop.f32.mrf.mxu0  ;;  %v758_v62 = vpop.f32.mrf.mxu1  ;;  %v788_v31 = vadd.f32 %v1413_v14, %v769_v56 }
 0x35b   :  { %v1417_v63 = vmul.f32 -1.442695, %v789_v60 }
 0x35c   :  { %v1540_v0 = vpop.eup %1539 }
 0x35d   :  { %v1542_v4 = vpop.eup %1541  ;;  %v793_v5 = vadd.f32 1.0, %v1540_v0  ;;  %1543 = vpow2.f32 %v1417_v63 }
 0x35e   :  { %v812_v15 = vadd.f32 1.0, %v1542_v4 }
 0x35f   :  { %1545 = vrcp.f32 %v793_v5  ;;  %v805_v11 = vand.u32 2147483648, %v793_v5  ;;  %v803_v29 = vand.u32 2147483647, %v793_v5  ;;  %vm799_vm2 = vweird.f32 %v793_v5 }
 0x360   :  { %1547 = vrcp.f32 %v812_v15  ;;  %v771_v26 = vpop.f32.mrf.mxu2  ;;  %v784_v18 = vpop.f32.mrf.mxu3  ;;  %v824_v43 = vand.u32 2147483648, %v812_v15  ;;  %v822_v50 = vand.u32 2147483647, %v812_v15  ;;  %vm818_vm3 = vweird.f32 %v812_v15 }
 0x361   :  { %v806_v55 = vor.u32 1.1754944e-38, %v805_v11  ;;  %vm804_vm6 = vcmp.eq.f32.partialorder %v803_v29, 8.507059e+37 }
 0x362   :  { %v825_v60 = vor.u32 1.1754944e-38, %v824_v43  ;;  %vm823_vm7 = vcmp.eq.f32.partialorder %v822_v50, 8.507059e+37 }
 0x363   :  { %v1544_v22 = vpop.eup %1543 }
 0x364   :  { %v832_v37 = vadd.f32 1.0, %v1544_v22 }
 0x365   :  { %v1546_v35 = vpop.eup %1545 }
 0x366   :  { %v1548_v47 = vpop.eup %1547  ;;  %v795_v44 = vmul.f32 %v1546_v35, %v793_v5  ;;  %1549 = vrcp.f32 %v832_v37  ;;  %vm800_vm0 = vweird.f32 %v1546_v35  ;;  %vm838_vm9 = vweird.f32 %v832_v37 }
 0x367   :  { %v814_v27 = vmul.f32 %v1548_v47, %v812_v15  ;;  %1551 = vtanh.f32 %v788_v31  ;;  %vm819_vm1 = vweird.f32 %v1548_v47  ;;  %vm801_vm4 = vmor %vm799_vm2, %vm800_vm0  ;;  %v844_v31 = vand.u32 2147483648, %v832_v37 }
 0x368   :  { %v796_v23 = vsub.f32 1.0, %v795_v44  ;;  %vm820_vm5 = vmor %vm818_vm3, %vm819_vm1 }
 0x369   :  { %v815_v13 = vsub.f32 1.0, %v814_v27  ;;  %v845_v27 = vor.u32 1.1754944e-38, %v844_v31 }
 0x36a   :  { %v797_v30 = vmul.f32 %v1546_v35, %v796_v23 }
 0x36b   :  { %v816_v49 = vmul.f32 %v1548_v47, %v815_v13 }
 0x36c   :  { %v1550_v51 = vpop.eup %1549  ;;  %v798_v52 = vadd.f32 %v1546_v35, %v797_v30 }
 0x36d   :  { %v817_v56 = vadd.f32 %v1548_v47, %v816_v49  ;;  %v834_v59 = vmul.f32 %v1550_v51, %v832_v37  ;;  %v1552_v62 = vpop.eup %1551  ;;  %vm839_vm8 = vweird.f32 %v1550_v51 }
 0x36e   :  { %v802_v61 = vsel %vm801_vm4, %v1546_v35, %v798_v52  ;;  %v842_v35 = vand.u32 2147483647, %v832_v37  ;;  %vm840_vm10 = vmor %vm838_vm9, %vm839_vm8 }
 0x36f   :  { %v807_v63 = vsel %vm804_vm6, %v806_v55, %v802_v61  ;;  %v821_v0 = vsel %vm820_vm5, %v1548_v47, %v817_v56  ;;  %v835_v4 = vsub.f32 1.0, %v834_v59 }
 0x370   :  { %v826_v26 = vsel %vm823_vm7, %v825_v60, %v821_v0  ;;  %v849_v18 = vmul.f32 %v1552_v62, %v807_v63  ;;  %vm843_vm11 = vcmp.eq.f32.partialorder %v842_v35, 8.507059e+37 }
 0x371   :  { %v848_v14 = vmul.f32 %v826_v26, %v2161_v10  ;;  %v836_v22 = vmul.f32 %v1550_v51, %v835_v4 }
 0x373   :  { %v2212_v5 = vadd.f32 %v849_v18, %v848_v14  ;;  %v837_v15 = vadd.f32 %v1550_v51, %v836_v22 }
 0x375   :  { %1553 = vtanh.f32 %v2212_v5  ;;  %v841_v44 = vsel %vm840_vm10, %v1550_v51, %v837_v15 }
 0x376   :  { %v846_v23 = vsel %vm843_vm11, %v845_v27, %v841_v44 }
 0x37b   :  { %v1554_v47 = vpop.eup %1553 }
 0x37c   :  { %v852_v13 = vmul.f32 %v1554_v47, %v846_v23 }
 0x37e   :  { %v853_v11 = vpack.c.bf16 %v852_v13, %v852_v13 }
 0x380   :  { %1418 = vst [vmem:[%s2314_s4 + $0x10] sm:$0xf] %v853_v11  ;;  %869 = vmatmul.bf16.vlgmr.msrb.gmra.mxu0 %v853_v11  ;;  %882 = vmatmul.bf16.vlgmr.msrb.gmra.mxu1 %v853_v11 }
 0x381   :  { %895 = vmatmul.bf16.vlgmr.msrb.gmra.mxu2 %v853_v11  ;;  %908 = vmatmul.bf16.vlgmr.msrb.gmra.mxu3 %v853_v11  ;;  %v1428_v11 = vld [vmem:[%s2312_s0 + $0xc8] sm:$0xff] }
 0x382   :  { %1115 = vmatpush.bf16.msrb.mxu0 %v1647_v3  ;;  %1128 = vmatpush.bf16.msrb.mxu1 %v1658_v7  ;;  %v1419_v3 = vld [vmem:[%s2312_s0 + $0xa0] sm:$0xff]  ;;  %v1420_v7 = vld [vmem:[%s2312_s0 + $0xa8] sm:$0xff] }
 0x383   :  { %1141 = vmatpush.bf16.msrb.mxu2 %v1698_v21  ;;  %1154 = vmatpush.bf16.msrb.mxu3 %v1660_v8 }
 0x386   :  { %1116 = vmatpush.bf16.msrb.mxu0 %v1672_v12  ;;  %1129 = vmatpush.bf16.msrb.mxu1 %v1685_v16 }
 0x387   :  { %1142 = vmatpush.bf16.msrb.mxu2 %v1737_v34  ;;  %1155 = vmatpush.bf16.msrb.mxu3 %v1687_v17 }
 0x38a   :  { %1117 = vmatpush.bf16.msrb.mxu0 %v1720_v28  ;;  %1130 = vmatpush.bf16.msrb.mxu1 %v1733_v32  ;;  %v1422_v32 = vld [vmem:[%s2312_s0 + $0xb8] sm:$0xff] }
 0x38b   :  { %1143 = vmatpush.bf16.msrb.mxu2 %v1761_v42  ;;  %1156 = vmatpush.bf16.msrb.mxu3 %v1735_v33 }
 0x38e   :  { %1118 = vmatpush.bf16.msrb.mxu0 %v1759_v41  ;;  %1131 = vmatpush.bf16.msrb.mxu1 %v1771_v45 }
 0x38f   :  { %1144 = vmatpush.bf16.msrb.mxu2 %v1797_v54  ;;  %1157 = vmatpush.bf16.msrb.mxu3 %v1773_v46 }
 0x392   :  { %1119 = vmatpush.bf16.msrb.mxu0 %v1795_v53  ;;  %1132 = vmatpush.bf16.msrb.mxu1 %v1807_v57 }
 0x393   :  { %1145 = vmatpush.bf16.msrb.mxu2 %v1833_v2  ;;  %1158 = vmatpush.bf16.msrb.mxu3 %v1809_v58 }
 0x396   :  { %1120 = vmatpush.bf16.msrb.mxu0 %v1831_v1  ;;  %1133 = vmatpush.bf16.msrb.mxu1 %v1843_v6  ;;  %v1421_v6 = vld [vmem:[%s2312_s0 + $0xb0] sm:$0xff] }
 0x397   :  { %1146 = vmatpush.bf16.msrb.mxu2 %v1869_v20  ;;  %1159 = vmatpush.bf16.msrb.mxu3 %v1845_v9 }
 0x39a   :  { %1121 = vmatpush.bf16.msrb.mxu0 %v1867_v19  ;;  %1134 = vmatpush.bf16.msrb.mxu1 %v1879_v24 }
 0x39b   :  { %1147 = vmatpush.bf16.msrb.mxu2 %v1908_v38  ;;  %1160 = vmatpush.bf16.msrb.mxu3 %v1881_v25 }
 0x39e   :  { %1122 = vmatpush.bf16.msrb.mxu0 %v1903_v36  ;;  %1135 = vmatpush.bf16.msrb.mxu1 %v1912_v39 }
 0x39f   :  { %1148 = vmatpush.bf16.msrb.mxu2 %v1926_v48  ;;  %1161 = vmatpush.bf16.msrb.mxu3 %v1914_v40 }
 0x3fd   :  { %v870_v8 = vpop.f32.mrf.mxu0  ;;  %v883_v12 = vpop.f32.mrf.mxu1 }
 0x3fe   :  { %v913_v16 = vadd.f32 %v1419_v3, %v870_v8  ;;  %v914_v17 = vadd.f32 %v1420_v7, %v883_v12 }
 0x400   :  { %v1423_v21 = vmul.f32 -1.442695, %v913_v16  ;;  %v1424_v28 = vmul.f32 -1.442695, %v914_v17 }
 0x402   :  { %1555 = vpow2.f32 %v1423_v21  ;;  %v1430_v21 = vld [vmem:[%s2312_s0 + $0xd8] sm:$0xff] }
 0x403   :  { %1557 = vpow2.f32 %v1424_v28 }
 0x404   :  { %v896_v33 = vpop.f32.mrf.mxu2  ;;  %v909_v34 = vpop.f32.mrf.mxu3 }
 0x405   :  { %v916_v41 = vadd.f32 %v1422_v32, %v909_v34  ;;  %v872_v42 = vpop.f32.mrf.mxu0  ;;  %v885_v45 = vpop.f32.mrf.mxu1  ;;  %v915_v24 = vadd.f32 %v1421_v6, %v896_v33 }
 0x407   :  { %v1425_v46 = vmul.f32 -1.442695, %v916_v41 }
 0x408   :  { %v1556_v53 = vpop.eup %1555 }
 0x409   :  { %v1558_v54 = vpop.eup %1557  ;;  %v920_v57 = vadd.f32 1.0, %v1556_v53  ;;  %1559 = vpow2.f32 %v1425_v46 }
 0x40a   :  { %v939_v58 = vadd.f32 1.0, %v1558_v54 }
 0x40b   :  { %1561 = vrcp.f32 %v920_v57  ;;  %v932_v48 = vand.u32 2147483648, %v920_v57  ;;  %v930_v43 = vand.u32 2147483647, %v920_v57  ;;  %vm926_vm14 = vweird.f32 %v920_v57 }
 0x40c   :  { %1563 = vrcp.f32 %v939_v58  ;;  %v898_v1 = vpop.f32.mrf.mxu2  ;;  %v911_v2 = vpop.f32.mrf.mxu3  ;;  %v951_v10 = vand.u32 2147483648, %v939_v58  ;;  %v949_v29 = vand.u32 2147483647, %v939_v58  ;;  %vm945_vm15 = vweird.f32 %v939_v58 }
 0x40d   :  { %v933_v51 = vor.u32 1.1754944e-38, %v932_v48  ;;  %vm931_vm2 = vcmp.eq.f32.partialorder %v930_v43, 8.507059e+37  ;;  %v1429_v1 = vld [vmem:[%s2312_s0 + $0xd0] sm:$0xff] }
 0x40e   :  { %v952_v56 = vor.u32 1.1754944e-38, %v951_v10  ;;  %vm950_vm3 = vcmp.eq.f32.partialorder %v949_v29, 8.507059e+37 }
 0x40f   :  { %v1560_v9 = vpop.eup %1559 }
 0x410   :  { %v959_v19 = vadd.f32 1.0, %v1560_v9 }
 0x411   :  { %v1562_v20 = vpop.eup %1561 }
 0x412   :  { %v1564_v25 = vpop.eup %1563  ;;  %v922_v36 = vmul.f32 %v1562_v20, %v920_v57  ;;  %1565 = vrcp.f32 %v959_v19  ;;  %vm927_vm12 = vweird.f32 %v1562_v20  ;;  %v971_v15 = vand.u32 2147483648, %v959_v19 }
 0x413   :  { %v941_v38 = vmul.f32 %v1564_v25, %v939_v58  ;;  %1567 = vtanh.f32 %v915_v24  ;;  %vm946_vm13 = vweird.f32 %v1564_v25  ;;  %vm928_vm0 = vmor %vm926_vm14, %vm927_vm12  ;;  %vm965_vm5 = vweird.f32 %v959_v19 }
 0x414   :  { %v923_v39 = vsub.f32 1.0, %v922_v36  ;;  %vm947_vm1 = vmor %vm945_vm15, %vm946_vm13  ;;  %v969_v31 = vand.u32 2147483647, %v959_v19  ;;  %v972_v44 = vor.u32 1.1754944e-38, %v971_v15 }
 0x415   :  { %v942_v40 = vsub.f32 1.0, %v941_v38 }
 0x416   :  { %v924_v37 = vmul.f32 %v1562_v20, %v923_v39  ;;  %vm970_vm7 = vcmp.eq.f32.partialorder %v969_v31, 8.507059e+37 }
 0x417   :  { %v943_v30 = vmul.f32 %v1564_v25, %v942_v40 }
 0x418   :  { %v1566_v49 = vpop.eup %1565  ;;  %v925_v50 = vadd.f32 %v1562_v20, %v924_v37 }
 0x419   :  { %v944_v52 = vadd.f32 %v1564_v25, %v943_v30  ;;  %v961_v55 = vmul.f32 %v1566_v49, %v959_v19  ;;  %v1568_v60 = vpop.eup %1567  ;;  %vm966_vm4 = vweird.f32 %v1566_v49 }
 0x41a   :  { %v929_v59 = vsel %vm928_vm0, %v1562_v20, %v925_v50  ;;  %vm967_vm6 = vmor %vm965_vm5, %vm966_vm4 }
 0x41b   :  { %v934_v61 = vsel %vm931_vm2, %v933_v51, %v929_v59  ;;  %v948_v62 = vsel %vm947_vm1, %v1564_v25, %v944_v52  ;;  %v962_v63 = vsub.f32 1.0, %v961_v55 }
 0x41c   :  { %v953_v0 = vsel %vm950_vm3, %v952_v56, %v948_v62  ;;  %v976_v4 = vmul.f32 %v1568_v60, %v934_v61 }
 0x41d   :  { %v975_v26 = vmul.f32 %v953_v0, %v2212_v5  ;;  %v963_v18 = vmul.f32 %v1566_v49, %v962_v63  ;;  %v1427_v5 = vld [vmem:[%s2312_s0 + $0xc0] sm:$0xff] }
 0x41f   :  { %v2263_v14 = vadd.f32 %v976_v4, %v975_v26  ;;  %v964_v22 = vadd.f32 %v1566_v49, %v963_v18 }
 0x421   :  { %1569 = vtanh.f32 %v2263_v14  ;;  %v968_v35 = vsel %vm967_vm6, %v1566_v49, %v964_v22 }
 0x422   :  { %v973_v47 = vsel %vm970_vm7, %v972_v44, %v968_v35 }
 0x427   :  { %v1570_v27 = vpop.eup %1569 }
 0x428   :  { %v979_v23 = vmul.f32 %v1570_v27, %v973_v47 }
 0x42a   :  { %v980_v13 = vpack.c.bf16 %v979_v23, %v979_v23 }
 0x42c   :  { %1426 = vst [vmem:[%s2314_s4 + $0x14] sm:$0xf] %v980_v13  ;;  %996 = vmatmul.bf16.vlgmr.msra.gmra.mxu0 %v980_v13  ;;  %1009 = vmatmul.bf16.vlgmr.msra.gmra.mxu1 %v980_v13 }
 0x42d   :  { %1022 = vmatmul.bf16.vlgmr.msra.gmra.mxu2 %v980_v13  ;;  %1035 = vmatmul.bf16.vlgmr.msra.gmra.mxu3 %v980_v13  ;;  %v1436_v13 = vld [vmem:[%s2312_s0 + $0xe8] sm:$0xff] }
 0x4a9   :  { %v997_v3 = vpop.f32.mrf.mxu0  ;;  %v1010_v7 = vpop.f32.mrf.mxu1 }
 0x4aa   :  { %v1040_v8 = vadd.f32 %v1427_v5, %v997_v3  ;;  %v1041_v12 = vadd.f32 %v1428_v11, %v1010_v7 }
 0x4ac   :  { %v1431_v16 = vmul.f32 -1.442695, %v1040_v8  ;;  %v1432_v17 = vmul.f32 -1.442695, %v1041_v12 }
 0x4ae   :  { %1571 = vpow2.f32 %v1431_v16  ;;  %v1438_v16 = vld [vmem:[%s2312_s0 + $0xf8] sm:$0xff] }
 0x4af   :  { %1573 = vpow2.f32 %v1432_v17 }
 0x4b0   :  { %v1023_v28 = vpop.f32.mrf.mxu2  ;;  %v1036_v32 = vpop.f32.mrf.mxu3 }
 0x4b1   :  { %v1043_v33 = vadd.f32 %v1430_v21, %v1036_v32  ;;  %v999_v34 = vpop.f32.mrf.mxu0  ;;  %v1012_v41 = vpop.f32.mrf.mxu1  ;;  %v1042_v19 = vadd.f32 %v1429_v1, %v1023_v28 }
 0x4b3   :  { %v1433_v42 = vmul.f32 -1.442695, %v1043_v33 }
 0x4b4   :  { %v1572_v45 = vpop.eup %1571 }
 0x4b5   :  { %v1574_v46 = vpop.eup %1573  ;;  %v1047_v53 = vadd.f32 1.0, %v1572_v45  ;;  %1575 = vpow2.f32 %v1433_v42 }
 0x4b6   :  { %v1066_v54 = vadd.f32 1.0, %v1574_v46 }
 0x4b7   :  { %1577 = vrcp.f32 %v1047_v53  ;;  %v1059_v39 = vand.u32 2147483648, %v1047_v53  ;;  %v1057_v10 = vand.u32 2147483647, %v1047_v53  ;;  %vm1053_vm10 = vweird.f32 %v1047_v53 }
 0x4b8   :  { %1579 = vrcp.f32 %v1066_v54  ;;  %v1025_v57 = vpop.f32.mrf.mxu2  ;;  %v1038_v58 = vpop.f32.mrf.mxu3  ;;  %v1078_v40 = vand.u32 2147483648, %v1066_v54  ;;  %v1076_v43 = vand.u32 2147483647, %v1066_v54  ;;  %vm1072_vm11 = vweird.f32 %v1066_v54 }
 0x4b9   :  { %v1060_v49 = vor.u32 1.1754944e-38, %v1059_v39  ;;  %vm1058_vm14 = vcmp.eq.f32.partialorder %v1057_v10, 8.507059e+37  ;;  %v1437_v57 = vld [vmem:[%s2312_s0 + $0xf0] sm:$0xff] }
 0x4ba   :  { %v1079_v52 = vor.u32 1.1754944e-38, %v1078_v40  ;;  %vm1077_vm15 = vcmp.eq.f32.partialorder %v1076_v43, 8.507059e+37 }
 0x4bb   :  { %v1576_v2 = vpop.eup %1575 }
 0x4bc   :  { %v1086_v6 = vadd.f32 1.0, %v1576_v2 }
 0x4bd   :  { %v1578_v9 = vpop.eup %1577 }
 0x4be   :  { %v1580_v20 = vpop.eup %1579  ;;  %v1049_v24 = vmul.f32 %v1578_v9, %v1047_v53  ;;  %1581 = vrcp.f32 %v1086_v6  ;;  %vm1054_vm8 = vweird.f32 %v1578_v9  ;;  %v1098_v22 = vand.u32 2147483648, %v1086_v6 }
 0x4bf   :  { %v1068_v25 = vmul.f32 %v1580_v20, %v1066_v54  ;;  %1583 = vtanh.f32 %v1042_v19  ;;  %vm1073_vm9 = vweird.f32 %v1580_v20  ;;  %vm1055_vm12 = vmor %vm1053_vm10, %vm1054_vm8  ;;  %vm1092_vm1 = vweird.f32 %v1086_v6 }
 0x4c0   :  { %v1050_v36 = vsub.f32 1.0, %v1049_v24  ;;  %vm1074_vm13 = vmor %vm1072_vm11, %vm1073_vm9  ;;  %v1096_v15 = vand.u32 2147483647, %v1086_v6  ;;  %v1099_v35 = vor.u32 1.1754944e-38, %v1098_v22 }
 0x4c1   :  { %v1069_v38 = vsub.f32 1.0, %v1068_v25 }
 0x4c2   :  { %v1051_v48 = vmul.f32 %v1578_v9, %v1050_v36  ;;  %vm1097_vm3 = vcmp.eq.f32.partialorder %v1096_v15, 8.507059e+37 }
 0x4c3   :  { %v1070_v37 = vmul.f32 %v1580_v20, %v1069_v38 }
 0x4c4   :  { %v1582_v30 = vpop.eup %1581  ;;  %v1052_v29 = vadd.f32 %v1578_v9, %v1051_v48 }
 0x4c5   :  { %v1071_v50 = vadd.f32 %v1580_v20, %v1070_v37  ;;  %v1088_v51 = vmul.f32 %v1582_v30, %v1086_v6  ;;  %v1584_v56 = vpop.eup %1583  ;;  %vm1093_vm0 = vweird.f32 %v1582_v30 }
 0x4c6   :  { %v1056_v55 = vsel %vm1055_vm12, %v1578_v9, %v1052_v29  ;;  %vm1094_vm2 = vmor %vm1092_vm1, %vm1093_vm0 }
 0x4c7   :  { %v1061_v59 = vsel %vm1058_vm14, %v1060_v49, %v1056_v55  ;;  %v1075_v60 = vsel %vm1074_vm13, %v1580_v20, %v1071_v50  ;;  %v1089_v61 = vsub.f32 1.0, %v1088_v51 }
 0x4c8   :  { %v1080_v62 = vsel %vm1077_vm15, %v1079_v52, %v1075_v60  ;;  %v1103_v63 = vmul.f32 %v1584_v56, %v1061_v59 }
 0x4c9   :  { %v1102_v0 = vmul.f32 %v1080_v62, %v2263_v14  ;;  %v1090_v4 = vmul.f32 %v1582_v30, %v1089_v61  ;;  %v1435_v14 = vld [vmem:[%s2312_s0 + $0xe0] sm:$0xff] }
 0x4cb   :  { %v2282_v26 = vadd.f32 %v1103_v63, %v1102_v0  ;;  %v1091_v18 = vadd.f32 %v1582_v30, %v1090_v4 }
 0x4cd   :  { %1585 = vtanh.f32 %v2282_v26  ;;  %v1095_v31 = vsel %vm1094_vm2, %v1582_v30, %v1091_v18 }
 0x4ce   :  { %v1100_v27 = vsel %vm1097_vm3, %v1099_v35, %v1095_v31 }
 0x4d3   :  { %v1586_v44 = vpop.eup %1585 }
 0x4d4   :  { %v1106_v47 = vmul.f32 %v1586_v44, %v1100_v27 }
 0x4d6   :  { %v1107_v23 = vpack.c.bf16 %v1106_v47, %v1106_v47 }
 0x4d8   :  { %1434 = vst [vmem:[%s2314_s4 + $0x18] sm:$0xf] %v1107_v23  ;;  %1123 = vmatmul.bf16.vlgmr.msrb.gmra.mxu0 %v1107_v23  ;;  %1136 = vmatmul.bf16.vlgmr.msrb.gmra.mxu1 %v1107_v23 }
 0x4d9   :  { %1149 = vmatmul.bf16.vlgmr.msrb.gmra.mxu2 %v1107_v23  ;;  %1162 = vmatmul.bf16.vlgmr.msrb.gmra.mxu3 %v1107_v23 }
 0x555   :  { %v1124_v5 = vpop.f32.mrf.mxu0  ;;  %v1137_v11 = vpop.f32.mrf.mxu1 }
 0x556   :  { %v1167_v3 = vadd.f32 %v1435_v14, %v1124_v5  ;;  %v1168_v7 = vadd.f32 %v1436_v13, %v1137_v11 }
 0x558   :  { %v1439_v8 = vmul.f32 -1.442695, %v1167_v3  ;;  %v1440_v12 = vmul.f32 -1.442695, %v1168_v7 }
 0x55a   :  { %1587 = vpow2.f32 %v1439_v8 }
 0x55b   :  { %1589 = vpow2.f32 %v1440_v12 }
 0x55c   :  { %v1150_v17 = vpop.f32.mrf.mxu2  ;;  %v1163_v21 = vpop.f32.mrf.mxu3 }
 0x55d   :  { %v1170_v28 = vadd.f32 %v1438_v16, %v1163_v21  ;;  %v1126_v32 = vpop.f32.mrf.mxu0  ;;  %v1139_v33 = vpop.f32.mrf.mxu1  ;;  %v1169_v6 = vadd.f32 %v1437_v57, %v1150_v17 }
 0x55f   :  { %v1441_v34 = vmul.f32 -1.442695, %v1170_v28 }
 0x560   :  { %v1588_v41 = vpop.eup %1587 }
 0x561   :  { %v1590_v42 = vpop.eup %1589  ;;  %v1174_v45 = vadd.f32 1.0, %v1588_v41  ;;  %1591 = vpow2.f32 %v1441_v34 }
 0x562   :  { %v1193_v46 = vadd.f32 1.0, %v1590_v42 }
 0x563   :  { %1593 = vrcp.f32 %v1174_v45  ;;  %v1186_v36 = vand.u32 2147483648, %v1174_v45  ;;  %v1184_v40 = vand.u32 2147483647, %v1174_v45  ;;  %vm1180_vm6 = vweird.f32 %v1174_v45 }
 0x564   :  { %1595 = vrcp.f32 %v1193_v46  ;;  %v1152_v53 = vpop.f32.mrf.mxu2  ;;  %v1165_v54 = vpop.f32.mrf.mxu3  ;;  %v1205_v38 = vand.u32 2147483648, %v1193_v46  ;;  %v1203_v10 = vand.u32 2147483647, %v1193_v46  ;;  %vm1199_vm7 = vweird.f32 %v1193_v46 }
 0x565   :  { %v1187_v30 = vor.u32 1.1754944e-38, %v1186_v36  ;;  %vm1185_vm10 = vcmp.eq.f32.partialorder %v1184_v40, 8.507059e+37 }
 0x566   :  { %v1206_v50 = vor.u32 1.1754944e-38, %v1205_v38  ;;  %vm1204_vm11 = vcmp.eq.f32.partialorder %v1203_v10, 8.507059e+37 }
 0x567   :  { %v1592_v58 = vpop.eup %1591 }
 0x568   :  { %v1213_v1 = vadd.f32 1.0, %v1592_v58 }
 0x569   :  { %v1594_v2 = vpop.eup %1593 }
 0x56a   :  { %v1596_v9 = vpop.eup %1595  ;;  %v1176_v19 = vmul.f32 %v1594_v2, %v1174_v45  ;;  %1597 = vrcp.f32 %v1213_v1  ;;  %vm1181_vm4 = vweird.f32 %v1594_v2  ;;  %v1225_v18 = vand.u32 2147483648, %v1213_v1 }
 0x56b   :  { %v1195_v20 = vmul.f32 %v1596_v9, %v1193_v46  ;;  %1599 = vtanh.f32 %v1169_v6  ;;  %vm1200_vm5 = vweird.f32 %v1596_v9  ;;  %vm1182_vm8 = vmor %vm1180_vm6, %vm1181_vm4  ;;  %vm1219_vm13 = vweird.f32 %v1213_v1 }
 0x56c   :  { %v1177_v24 = vsub.f32 1.0, %v1176_v19  ;;  %vm1201_vm9 = vmor %vm1199_vm7, %vm1200_vm5  ;;  %v1223_v22 = vand.u32 2147483647, %v1213_v1  ;;  %v1226_v31 = vor.u32 1.1754944e-38, %v1225_v18 }
 0x56d   :  { %v1196_v25 = vsub.f32 1.0, %v1195_v20 }
 0x56e   :  { %v1178_v39 = vmul.f32 %v1594_v2, %v1177_v24  ;;  %vm1224_vm15 = vcmp.eq.f32.partialorder %v1223_v22, 8.507059e+37 }
 0x56f   :  { %v1197_v48 = vmul.f32 %v1596_v9, %v1196_v25 }
 0x570   :  { %v1598_v37 = vpop.eup %1597  ;;  %v1179_v43 = vadd.f32 %v1594_v2, %v1178_v39 }
 0x571   :  { %v1198_v29 = vadd.f32 %v1596_v9, %v1197_v48  ;;  %v1215_v49 = vmul.f32 %v1598_v37, %v1213_v1  ;;  %v1600_v52 = vpop.eup %1599  ;;  %vm1220_vm12 = vweird.f32 %v1598_v37 }
 0x572   :  { %v1183_v51 = vsel %vm1182_vm8, %v1594_v2, %v1179_v43  ;;  %vm1221_vm14 = vmor %vm1219_vm13, %vm1220_vm12 }
 0x573   :  { %v1188_v55 = vsel %vm1185_vm10, %v1187_v30, %v1183_v51  ;;  %v1202_v56 = vsel %vm1201_vm9, %v1596_v9, %v1198_v29  ;;  %v1216_v59 = vsub.f32 1.0, %v1215_v49 }
 0x574   :  { %v1207_v60 = vsel %vm1204_vm11, %v1206_v50, %v1202_v56  ;;  %v1230_v61 = vmul.f32 %v1600_v52, %v1188_v55 }
 0x575   :  { %v1229_v62 = vmul.f32 %v1207_v60, %v2282_v26  ;;  %v1217_v63 = vmul.f32 %v1598_v37, %v1216_v59 }
 0x577   :  { %v1231_v0 = vadd.f32 %v1230_v61, %v1229_v62  ;;  %v1218_v4 = vadd.f32 %v1598_v37, %v1217_v63 }
 0x579   :  { %1601 = vtanh.f32 %v1231_v0  ;;  %1243 = vst [vmem:[%s2315_s6] sm:$0xff] %v1231_v0  ;;  %v1222_v15 = vsel %vm1221_vm14, %v1598_v37, %v1218_v4 }
 0x57a   :  { %v1227_v44 = vsel %vm1224_vm15, %v1226_v31, %v1222_v15 }
 0x57f   :  { %v1602_v35 = vpop.eup %1601 }
 0x580   :  { %v1233_v27 = vmul.f32 %v1602_v35, %v1227_v44 }
 0x582   :  { %v1234_v26 = vpack.c.bf16 %v1233_v27, %v1233_v27  ;;  %1242 = vst [vmem:[%s2316_s5] sm:$0xff] %v1233_v27 }
 0x584   :  { %1442 = vst [vmem:[%s2314_s4 + $0x1c] sm:$0xf] %v1234_v26 }

// kernel: latent_lstm_forward.3
= control target key start
LH: loop header
LB: loop body
LE: loop exit
PB: predicated region body
PF: predicated region fallthrough
CT: control target
= control target key end

     0   :  { %s1835_s18 = smov 0   ;;  %s1837_s19 = smov 0   ;;  %s2269_s0 = inlined_call_operand.vmem [shape: bf16[8,8192], index: 0, kind: input, shape index: {}]   ;;  %s2270_s1 = inlined_call_operand.vmem [shape: bf16[1024,128], index: 1, kind: input, shape index: {}]   ;;  %s2271_s2 = inlined_call_operand.vmem [shape: f32[1,128], index: 2, kind: input, shape index: {}]   ;;  %s2272_s3 = inlined_call_operand.vmem [shape: bf16[128,512], index: 3, kind: input, shape index: {}]   ;;  %s2273_s4 = inlined_call_operand.vmem [shape: f32[1,512], index: 4, kind: input, shape index: {}]   ;;  %s2274_s5 = inlined_call_operand.vmem [shape: f32[8,8,512], index: 5, kind: output, shape index: {}]  }
   0x1   :  { %s1839_s20 = smov 0  }
   0x2 LB: > { %s24_s21 = sadd.s32 1, %s1799_s19  ;;  %p1268_p0 = scmp.ge.s32.totalorder %s1803_s20, 1  ;;  %s1803_s20 = sphi %s1839_s20, %s15_s20   ;;  %s1799_s19 = sphi %s1837_s19, %s2276_s19   ;;  %s1795_s18 = sphi %s1835_s18, %s2275_s18  }
   0x3   : > { %p25_p1 = scmp.ge.s32.totalorder %s24_s21, 8  ;;  %p208_p2 = scmp.lt.s32.totalorder %s1803_s20, 9 }
   0x5   : > { %s2278_s21 = smov (%p25_p1, %s24_s21), 0  ;;  %p209_p3 = pnand %p1268_p0, %p208_p2 }
   0x6   : > { %s1269_s17 = sshll.u32 (!%p209_p3), %s1795_s18, 3  ;;  %p254_p5 = scmp.lt.s32.totalorder (!%p209_p3), %s1795_s18, 7 }
   0x7   : > { %212 = sbr.rel (%p209_p3) target bundleno = 359 (0x167), region = 40  ;;  %p247_p4 = scmp.lt.s32.totalorder (!%p209_p3), %s1269_s17, 63 }
   0xc   : > { %v1667_v0 = vld [vmem:[%s2270_s1 + $0x38] sm:$0xff]  ;;  %v1666_v4 = vld [vmem:[%s2270_s1 + $0x30] sm:$0xff]  ;;  %v1665_v8 = vld [vmem:[%s2270_s1 + $0x28] sm:$0xff]  ;;  %s2280_s17 = smov (!%p247_p4, %s1269_s17), 63  ;;  %s2282_s18 = smov (!%p254_p5, %s1795_s18), 7 }
   0xd   : > { %v1675_v1 = vld [vmem:[%s2270_s1 + $0x78] sm:$0xff]  ;;  %811 = vmatpush.bf16.msra.mxu0 %v1667_v0  ;;  %v1674_v5 = vld [vmem:[%s2270_s1 + $0x70] sm:$0xff]  ;;  %v1673_v9 = vld [vmem:[%s2270_s1 + $0x68] sm:$0xff]  ;;  %s1270_s22 = sshll.u32 %s2280_s17, 2  ;;  %s1659_s13 = sshll.u32 %s2282_s18, 5 }
   0xe   : > { %v1683_v2 = vld [vmem:[%s2270_s1 + $0xb8] sm:$0xff]  ;;  %824 = vmatpush.bf16.msra.mxu1 %v1675_v1  ;;  %v1682_v6 = vld [vmem:[%s2270_s1 + $0xb0] sm:$0xff]  ;;  %v1681_v10 = vld [vmem:[%s2270_s1 + $0xa8] sm:$0xff]  ;;  %s1931_s7 = scalar_lea.vmem %s2269_s0, %s1270_s22  ;;  %s262_s16 = scalar_lea.vmem %s2274_s5, %s1659_s13 }
   0xf   : > { %v1691_v3 = vld [vmem:[%s2270_s1 + $0xf8] sm:$0xff]  ;;  %837 = vmatpush.bf16.msra.mxu2 %v1683_v2  ;;  %v1690_v7 = vld [vmem:[%s2270_s1 + $0xf0] sm:$0xff]  ;;  %v1689_v11 = vld [vmem:[%s2270_s1 + $0xe8] sm:$0xff] }
  0x10   : > { %850 = vmatpush.bf16.msra.mxu3 %v1691_v3  ;;  %v1664_v12 = vld [vmem:[%s2270_s1 + $0x20] sm:$0xff]  ;;  %v1663_v16 = vld [vmem:[%s2270_s1 + $0x18] sm:$0xff]  ;;  %v1662_v20 = vld [vmem:[%s2270_s1 + $0x10] sm:$0xff] }
  0x11   : > { %812 = vmatpush.bf16.msra.mxu0 %v1666_v4  ;;  %v1672_v13 = vld [vmem:[%s2270_s1 + $0x60] sm:$0xff]  ;;  %v1671_v17 = vld [vmem:[%s2270_s1 + $0x58] sm:$0xff]  ;;  %v1670_v21 = vld [vmem:[%s2270_s1 + $0x50] sm:$0xff] }
  0x12   : > { %825 = vmatpush.bf16.msra.mxu1 %v1674_v5  ;;  %v1680_v14 = vld [vmem:[%s2270_s1 + $0xa0] sm:$0xff]  ;;  %v1679_v18 = vld [vmem:[%s2270_s1 + $0x98] sm:$0xff]  ;;  %v1678_v22 = vld [vmem:[%s2270_s1 + $0x90] sm:$0xff] }
  0x13   : > { %838 = vmatpush.bf16.msra.mxu2 %v1682_v6  ;;  %v1688_v15 = vld [vmem:[%s2270_s1 + $0xe0] sm:$0xff]  ;;  %v1687_v19 = vld [vmem:[%s2270_s1 + $0xd8] sm:$0xff]  ;;  %v1686_v23 = vld [vmem:[%s2270_s1 + $0xd0] sm:$0xff] }
  0x14   : > { %851 = vmatpush.bf16.msra.mxu3 %v1690_v7  ;;  %v1661_v24 = vld [vmem:[%s2270_s1 + $0x8] sm:$0xff]  ;;  %v263_v29 = vld [vmem:[%s1931_s7] sm:$0xff]  ;;  %v1699_v38 = vld [vmem:[%s2270_s1 + $0x138] sm:$0xff] }
  0x15   : > { %813 = vmatpush.bf16.msra.mxu0 %v1665_v8  ;;  %v1669_v25 = vld [vmem:[%s2270_s1 + $0x48] sm:$0xff]  ;;  %v1660_v30 = vld [vmem:[%s2270_s1] sm:$0xff]  ;;  %v403_v33 = vunpack.c.l.b16 %v263_v29  ;;  %v404_v37 = vunpack.c.h.b16 %v263_v29  ;;  %v1707_v39 = vld [vmem:[%s2270_s1 + $0x178] sm:$0xff] }
  0x16   : > { %826 = vmatpush.bf16.msra.mxu1 %v1673_v9  ;;  %v1677_v26 = vld [vmem:[%s2270_s1 + $0x88] sm:$0xff]  ;;  %v1668_v31 = vld [vmem:[%s2270_s1 + $0x40] sm:$0xff]  ;;  %v1715_v40 = vld [vmem:[%s2270_s1 + $0x1b8] sm:$0xff] }
  0x17   : > { %839 = vmatpush.bf16.msra.mxu2 %v1681_v10  ;;  %v1685_v27 = vld [vmem:[%s2270_s1 + $0xc8] sm:$0xff]  ;;  %v1676_v34 = vld [vmem:[%s2270_s1 + $0x80] sm:$0xff]  ;;  %v1723_v41 = vld [vmem:[%s2270_s1 + $0x1f8] sm:$0xff]  ;;  %v411_v43 = vpack.c.b16 %v403_v33, %v403_v33  ;;  %v412_v45 = vpack.c.b16 %v404_v37, %v404_v37 }
  0x18   : > { %852 = vmatpush.bf16.msra.mxu3 %v1689_v11  ;;  %v264_v28 = vld [vmem:[%s1931_s7 + $0x8] sm:$0xff]  ;;  %v1684_v35 = vld [vmem:[%s2270_s1 + $0xc0] sm:$0xff]  ;;  %v1698_v46 = vld [vmem:[%s2270_s1 + $0x130] sm:$0xff] }
  0x19   : > { %814 = vmatpush.bf16.msra.mxu0 %v1664_v12  ;;  %v405_v32 = vunpack.c.l.b16 %v264_v28  ;;  %v406_v36 = vunpack.c.h.b16 %v264_v28  ;;  %v1706_v47 = vld [vmem:[%s2270_s1 + $0x170] sm:$0xff]  ;;  %v1697_v50 = vld [vmem:[%s2270_s1 + $0x128] sm:$0xff]  ;;  %v1696_v54 = vld [vmem:[%s2270_s1 + $0x120] sm:$0xff] }
  0x1a   : > { %827 = vmatpush.bf16.msra.mxu1 %v1672_v13  ;;  %v1714_v48 = vld [vmem:[%s2270_s1 + $0x1b0] sm:$0xff]  ;;  %v1705_v51 = vld [vmem:[%s2270_s1 + $0x168] sm:$0xff]  ;;  %v1704_v55 = vld [vmem:[%s2270_s1 + $0x160] sm:$0xff] }
  0x1b   : > { %840 = vmatpush.bf16.msra.mxu2 %v1680_v14  ;;  %v413_v42 = vpack.c.b16 %v405_v32, %v405_v32  ;;  %v414_v44 = vpack.c.b16 %v406_v36, %v406_v36  ;;  %v1722_v49 = vld [vmem:[%s2270_s1 + $0x1f0] sm:$0xff]  ;;  %v1713_v52 = vld [vmem:[%s2270_s1 + $0x1a8] sm:$0xff]  ;;  %v1712_v56 = vld [vmem:[%s2270_s1 + $0x1a0] sm:$0xff] }
  0x1c   : > { %853 = vmatpush.bf16.msra.mxu3 %v1688_v15  ;;  %v1721_v53 = vld [vmem:[%s2270_s1 + $0x1e8] sm:$0xff]  ;;  %v1720_v57 = vld [vmem:[%s2270_s1 + $0x1e0] sm:$0xff]  ;;  %v1695_v58 = vld [vmem:[%s2270_s1 + $0x118] sm:$0xff] }
  0x1d   : > { %815 = vmatpush.bf16.msra.mxu0 %v1663_v16  ;;  %v1703_v59 = vld [vmem:[%s2270_s1 + $0x158] sm:$0xff]  ;;  %v1694_v62 = vld [vmem:[%s2270_s1 + $0x110] sm:$0xff]  ;;  %v1693_v2 = vld [vmem:[%s2270_s1 + $0x108] sm:$0xff] }
  0x1e   : > { %828 = vmatpush.bf16.msra.mxu1 %v1671_v17  ;;  %v1711_v60 = vld [vmem:[%s2270_s1 + $0x198] sm:$0xff]  ;;  %v1702_v63 = vld [vmem:[%s2270_s1 + $0x150] sm:$0xff]  ;;  %v1701_v3 = vld [vmem:[%s2270_s1 + $0x148] sm:$0xff] }
  0x1f   : > { %841 = vmatpush.bf16.msra.mxu2 %v1679_v18  ;;  %v1719_v61 = vld [vmem:[%s2270_s1 + $0x1d8] sm:$0xff]  ;;  %v1710_v0 = vld [vmem:[%s2270_s1 + $0x190] sm:$0xff]  ;;  %v1709_v5 = vld [vmem:[%s2270_s1 + $0x188] sm:$0xff] }
  0x20   : > { %854 = vmatpush.bf16.msra.mxu3 %v1687_v19  ;;  %v1718_v1 = vld [vmem:[%s2270_s1 + $0x1d0] sm:$0xff]  ;;  %v1717_v6 = vld [vmem:[%s2270_s1 + $0x1c8] sm:$0xff]  ;;  %v266_v7 = vld [vmem:[%s1931_s7 + $0x18] sm:$0xff] }
  0x21   : > { %816 = vmatpush.bf16.msra.mxu0 %v1662_v20  ;;  %v265_v4 = vld [vmem:[%s1931_s7 + $0x10] sm:$0xff]  ;;  %v1692_v10 = vld [vmem:[%s2270_s1 + $0x100] sm:$0xff]  ;;  %v409_v12 = vunpack.c.l.b16 %v266_v7  ;;  %v410_v13 = vunpack.c.h.b16 %v266_v7  ;;  %v1753_v29 = vld [vmem:[%s2272_s3 + $0xec] sm:$0xf] }
  0x22   : > { %829 = vmatpush.bf16.msra.mxu1 %v1670_v21  ;;  %v407_v8 = vunpack.c.l.b16 %v265_v4  ;;  %v408_v9 = vunpack.c.h.b16 %v265_v4  ;;  %v1700_v11 = vld [vmem:[%s2270_s1 + $0x140] sm:$0xff]  ;;  %v1754_v21 = vld [vmem:[%s2272_s3 + $0xec] sm:$0xf0] }
  0x23   : > { %842 = vmatpush.bf16.msra.mxu2 %v1678_v22  ;;  %v1708_v14 = vld [vmem:[%s2270_s1 + $0x180] sm:$0xff]  ;;  %v417_v18 = vpack.c.b16 %v409_v12, %v409_v12  ;;  %v418_v19 = vpack.c.b16 %v410_v13, %v410_v13  ;;  %v1750_v33 = vld [vmem:[%s2272_s3 + $0xcc] sm:$0xf0]  ;;  %v1737_v13 = vld [vmem:[%s2272_s3 + $0x6c] sm:$0xf] }
  0x24   : > { %855 = vmatpush.bf16.msra.mxu3 %v1686_v23  ;;  %v1716_v15 = vld [vmem:[%s2270_s1 + $0x1c0] sm:$0xff]  ;;  %v415_v16 = vpack.c.b16 %v407_v8, %v407_v8  ;;  %v416_v17 = vpack.c.b16 %v408_v9, %v408_v9  ;;  %v1581_v8 = vld [vmem:[%s2272_s3 + $0x70] sm:$0xf0]  ;;  %v1587_v9 = vld [vmem:[%s2272_s3 + $0x68] sm:$0xf] }
  0x25   : > { %817 = vmatpush.bf16.msra.mxu0 %v1661_v24  ;;  %v1643_v20 = vld [vmem:[%s2272_s3 + $0xe0] sm:$0xf]  ;;  %v1752_v22 = vld [vmem:[%s2272_s3 + $0xe4] sm:$0xf]  ;;  %v1645_v24 = vld [vmem:[%s2272_s3 + $0xf0] sm:$0xf0] }
  0x26   : > { %830 = vmatpush.bf16.msra.mxu1 %v1669_v25  ;;  %v1644_v23 = vor.u32 %v1754_v21, %v1643_v20  ;;  %v1651_v25 = vld [vmem:[%s2272_s3 + $0xe8] sm:$0xf]  ;;  %v1579_v4 = vld [vmem:[%s2272_s3 + $0x60] sm:$0xf]  ;;  %v1565_v21 = vld [vmem:[%s2272_s3 + $0x50] sm:$0xf0] }
  0x27   : > { %843 = vmatpush.bf16.msra.mxu2 %v1677_v26  ;;  %v1755_v26 = vld [vmem:[%s2272_s3 + $0xf4] sm:$0xf0] }
  0x28   : > { %856 = vmatpush.bf16.msra.mxu3 %v1685_v27  ;;  %v1648_v27 = vor.u32 %v1752_v22, %v1645_v24  ;;  %v1652_v28 = vor.u32 %v1755_v26, %v1651_v25  ;;  %v1571_v22 = vld [vmem:[%s2272_s3 + $0x48] sm:$0xf] }
  0x29   : > { %818 = vmatpush.bf16.msra.mxu0 %v1660_v30  ;;  %v1653_v30 = vld [vmem:[%s2272_s3 + $0xf8] sm:$0xf0] }
  0x2a   : > { %831 = vmatpush.bf16.msra.mxu1 %v1668_v31  ;;  %v1627_v31 = vld [vmem:[%s2272_s3 + $0xc0] sm:$0xf]  ;;  %v1656_v32 = vor.u32 %v1753_v29, %v1653_v30 }
  0x2b   : > { %844 = vmatpush.bf16.msra.mxu2 %v1676_v34  ;;  %v1748_v34 = vld [vmem:[%s2272_s3 + $0xc4] sm:$0xf]  ;;  %v1628_v36 = vor.u32 %v1750_v33, %v1627_v31  ;;  %v1547_v30 = vld [vmem:[%s2272_s3 + $0x20] sm:$0xf]  ;;  %v1730_v31 = vld [vmem:[%s2272_s3 + $0x2c] sm:$0xf0] }
  0x2c   : > { %857 = vmatpush.bf16.msra.mxu3 %v1684_v35  ;;  %819 = vmatmul.bf16.vlgmr.msra.gmra.mxu0 %v411_v43  ;;  %v1629_v35 = vld [vmem:[%s2272_s3 + $0xd0] sm:$0xf0]  ;;  %v1548_v33 = vor.u32 %v1730_v31, %v1547_v30 }
  0x2d   : > { %863 = vmatpush.bf16.msrb.mxu0 %v1699_v38  ;;  %832 = vmatmul.bf16.vlgmr.msra.gmra.mxu1 %v412_v45  ;;  %v1632_v37 = vor.u32 %v1748_v34, %v1629_v35  ;;  %v1635_v38 = vld [vmem:[%s2272_s3 + $0xc8] sm:$0xf]  ;;  %v1746_v45 = vld [vmem:[%s2272_s3 + $0xac] sm:$0xf0]  ;;  %v1549_v34 = vld [vmem:[%s2272_s3 + $0x30] sm:$0xf0] }
  0x2e   : > { %876 = vmatpush.bf16.msrb.mxu1 %v1707_v39  ;;  %845 = vmatmul.bf16.vlgmr.msra.gmra.mxu2 %v413_v42  ;;  %v1751_v39 = vld [vmem:[%s2272_s3 + $0xd4] sm:$0xf0]  ;;  %v1637_v42 = vld [vmem:[%s2272_s3 + $0xd8] sm:$0xf0]  ;;  %v1555_v35 = vld [vmem:[%s2272_s3 + $0x28] sm:$0xf] }
  0x2f   : > { %889 = vmatpush.bf16.msrb.mxu2 %v1715_v40  ;;  %858 = vmatmul.bf16.vlgmr.msra.gmra.mxu3 %v414_v44  ;;  %v1749_v40 = vld [vmem:[%s2272_s3 + $0xcc] sm:$0xf]  ;;  %v1611_v44 = vld [vmem:[%s2272_s3 + $0xa0] sm:$0xf] }
  0x30   : > { %902 = vmatpush.bf16.msrb.mxu3 %v1723_v41  ;;  %v1636_v41 = vor.u32 %v1751_v39, %v1635_v38  ;;  %v1640_v43 = vor.u32 %v1749_v40, %v1637_v42  ;;  %v1729_v39 = vld [vmem:[%s2272_s3 + $0x2c] sm:$0xf]  ;;  %v1557_v40 = vld [vmem:[%s2272_s3 + $0x38] sm:$0xf0] }
  0x31   : > { %864 = vmatpush.bf16.msrb.mxu0 %v1698_v46  ;;  %v1744_v46 = vld [vmem:[%s2272_s3 + $0xa4] sm:$0xf]  ;;  %v1560_v42 = vor.u32 %v1729_v39, %v1557_v40 }
  0x32   : > { %877 = vmatpush.bf16.msrb.mxu1 %v1706_v47  ;;  %v1612_v47 = vor.u32 %v1746_v45, %v1611_v44  ;;  %v1531_v44 = vld [vmem:[%s2272_s3] sm:$0xf]  ;;  %v1726_v45 = vld [vmem:[%s2272_s3 + $0xc] sm:$0xf0] }
  0x33   : > { %890 = vmatpush.bf16.msrb.mxu2 %v1714_v48  ;;  %v1613_v48 = vld [vmem:[%s2272_s3 + $0xb0] sm:$0xf0] }
  0x34   : > { %903 = vmatpush.bf16.msrb.mxu3 %v1722_v49  ;;  %v1619_v49 = vld [vmem:[%s2272_s3 + $0xa8] sm:$0xf] }
  0x35   : > { %865 = vmatpush.bf16.msrb.mxu0 %v1697_v50  ;;  %v1747_v50 = vld [vmem:[%s2272_s3 + $0xb4] sm:$0xf0] }
  0x36   : > { %878 = vmatpush.bf16.msrb.mxu1 %v1705_v51  ;;  %v1616_v51 = vor.u32 %v1744_v46, %v1613_v48  ;;  %v1724_v46 = vld [vmem:[%s2272_s3 + $0x4] sm:$0xf]  ;;  %v1532_v48 = vor.u32 %v1726_v45, %v1531_v44 }
  0x37   : > { %891 = vmatpush.bf16.msrb.mxu2 %v1713_v52  ;;  %v1620_v52 = vor.u32 %v1747_v50, %v1619_v49  ;;  %v1533_v49 = vld [vmem:[%s2272_s3 + $0x10] sm:$0xf0]  ;;  %v1539_v50 = vld [vmem:[%s2272_s3 + $0x8] sm:$0xf] }
  0x38   : > { %904 = vmatpush.bf16.msrb.mxu3 %v1721_v53  ;;  %v1745_v53 = vld [vmem:[%s2272_s3 + $0xac] sm:$0xf] }
  0x39   : > { %866 = vmatpush.bf16.msrb.mxu0 %v1696_v54  ;;  %v1621_v54 = vld [vmem:[%s2272_s3 + $0xb8] sm:$0xf0] }
  0x3a   : > { %879 = vmatpush.bf16.msrb.mxu1 %v1704_v55  ;;  %v1595_v55 = vld [vmem:[%s2272_s3 + $0x80] sm:$0xf] }
  0x3b   : > { %892 = vmatpush.bf16.msrb.mxu2 %v1712_v56  ;;  %v1624_v56 = vor.u32 %v1745_v53, %v1621_v54  ;;  %v1536_v53 = vor.u32 %v1724_v46, %v1533_v49 }
  0x3c   : > { %905 = vmatpush.bf16.msrb.mxu3 %v1720_v57  ;;  %v1742_v57 = vld [vmem:[%s2272_s3 + $0x8c] sm:$0xf0] }
  0x3d   : > { %867 = vmatpush.bf16.msrb.mxu0 %v1695_v58  ;;  %v1740_v58 = vld [vmem:[%s2272_s3 + $0x84] sm:$0xf] }
  0x3e   : > { %880 = vmatpush.bf16.msrb.mxu1 %v1703_v59  ;;  %v1597_v59 = vld [vmem:[%s2272_s3 + $0x90] sm:$0xf0] }
  0x3f   : > { %893 = vmatpush.bf16.msrb.mxu2 %v1711_v60  ;;  %v1603_v60 = vld [vmem:[%s2272_s3 + $0x88] sm:$0xf] }
  0x40   : > { %906 = vmatpush.bf16.msrb.mxu3 %v1719_v61  ;;  %v1743_v61 = vld [vmem:[%s2272_s3 + $0x94] sm:$0xf0] }
  0x41   : > { %868 = vmatpush.bf16.msrb.mxu0 %v1694_v62  ;;  %v1741_v62 = vld [vmem:[%s2272_s3 + $0x8c] sm:$0xf] }
  0x42   : > { %881 = vmatpush.bf16.msrb.mxu1 %v1702_v63  ;;  %v1596_v63 = vor.u32 %v1742_v57, %v1595_v55  ;;  %v1725_v55 = vld [vmem:[%s2272_s3 + $0xc] sm:$0xf] }
  0x43   : > { %894 = vmatpush.bf16.msrb.mxu2 %v1710_v0  ;;  %v1605_v0 = vld [vmem:[%s2272_s3 + $0x98] sm:$0xf0] }
  0x44   : > { %907 = vmatpush.bf16.msrb.mxu3 %v1718_v1  ;;  %v1600_v1 = vor.u32 %v1740_v58, %v1597_v59  ;;  %v1780_v58 = vld [vmem:[%s2271_s2] ss:$0 sm:$0xff] }
  0x45   : > { %869 = vmatpush.bf16.msrb.mxu0 %v1693_v2  ;;  %v1604_v2 = vor.u32 %v1743_v61, %v1603_v60 }
  0x46   : > { %882 = vmatpush.bf16.msrb.mxu1 %v1701_v3  ;;  %v1608_v3 = vor.u32 %v1741_v62, %v1605_v0 }
  0x47   : > { %895 = vmatpush.bf16.msrb.mxu2 %v1709_v5  ;;  %v1738_v5 = vld [vmem:[%s2272_s3 + $0x6c] sm:$0xf0] }
  0x48   : > { %908 = vmatpush.bf16.msrb.mxu3 %v1717_v6  ;;  %v1736_v6 = vld [vmem:[%s2272_s3 + $0x64] sm:$0xf]  ;;  %v1580_v7 = vor.u32 %v1738_v5, %v1579_v4 }
  0x49   : > { %870 = vmatpush.bf16.msrb.mxu0 %v1692_v10  ;;  %v1739_v10 = vld [vmem:[%s2272_s3 + $0x74] sm:$0xf0] }
  0x4a   : > { %883 = vmatpush.bf16.msrb.mxu1 %v1700_v11  ;;  %v1584_v11 = vor.u32 %v1736_v6, %v1581_v8  ;;  %v1588_v12 = vor.u32 %v1739_v10, %v1587_v9 }
  0x4b   : > { %896 = vmatpush.bf16.msrb.mxu2 %v1708_v14  ;;  %v1589_v14 = vld [vmem:[%s2272_s3 + $0x78] sm:$0xf0] }
  0x4c   : > { %909 = vmatpush.bf16.msrb.mxu3 %v1716_v15  ;;  %871 = vmatmul.bf16.vlgmr.msrb.gmra.mxu0 %v415_v16  ;;  %v1592_v15 = vor.u32 %v1737_v13, %v1589_v14  ;;  %v1563_v16 = vld [vmem:[%s2272_s3 + $0x40] sm:$0xf] }
  0x4d   : > { %884 = vmatmul.bf16.vlgmr.msrb.gmra.mxu1 %v416_v17  ;;  %1119 = vmatpush.bf16.msra.mxu0 %v1644_v23  ;;  %v1734_v17 = vld [vmem:[%s2272_s3 + $0x4c] sm:$0xf0]  ;;  %v1735_v23 = vld [vmem:[%s2272_s3 + $0x54] sm:$0xf0] }
  0x4e   : > { %897 = vmatmul.bf16.vlgmr.msrb.gmra.mxu2 %v417_v18  ;;  %1132 = vmatpush.bf16.msra.mxu1 %v1648_v27  ;;  %v1732_v18 = vld [vmem:[%s2272_s3 + $0x44] sm:$0xf]  ;;  %v1564_v20 = vor.u32 %v1734_v17, %v1563_v16  ;;  %v1572_v26 = vor.u32 %v1735_v23, %v1571_v22  ;;  %v1733_v27 = vld [vmem:[%s2272_s3 + $0x4c] sm:$0xf] }
  0x4f   : > { %910 = vmatmul.bf16.vlgmr.msrb.gmra.mxu3 %v418_v19  ;;  %1145 = vmatpush.bf16.msra.mxu2 %v1652_v28  ;;  %v1568_v25 = vor.u32 %v1732_v18, %v1565_v21  ;;  %v1573_v28 = vld [vmem:[%s2272_s3 + $0x58] sm:$0xf0] }
  0x50   : > { %1158 = vmatpush.bf16.msra.mxu3 %v1656_v32  ;;  %v1576_v29 = vor.u32 %v1733_v27, %v1573_v28  ;;  %v1728_v32 = vld [vmem:[%s2272_s3 + $0x24] sm:$0xf] }
  0x51   : > { %1120 = vmatpush.bf16.msra.mxu0 %v1628_v36  ;;  %v1731_v36 = vld [vmem:[%s2272_s3 + $0x34] sm:$0xf0] }
  0x52   : > { %1133 = vmatpush.bf16.msra.mxu1 %v1632_v37  ;;  %v1552_v37 = vor.u32 %v1728_v32, %v1549_v34  ;;  %v1556_v38 = vor.u32 %v1731_v36, %v1555_v35 }
  0x53   : > { %1146 = vmatpush.bf16.msra.mxu2 %v1636_v41 }
  0x54   : > { %1159 = vmatpush.bf16.msra.mxu3 %v1640_v43 }
  0x55   : > { %1121 = vmatpush.bf16.msra.mxu0 %v1612_v47 }
  0x56   : > { %1134 = vmatpush.bf16.msra.mxu1 %v1616_v51  ;;  %v1727_v51 = vld [vmem:[%s2272_s3 + $0x14] sm:$0xf0] }
  0x57   : > { %1147 = vmatpush.bf16.msra.mxu2 %v1620_v52  ;;  %v1540_v54 = vor.u32 %v1727_v51, %v1539_v50 }
  0x58   : > { %1160 = vmatpush.bf16.msra.mxu3 %v1624_v56  ;;  %v1541_v56 = vld [vmem:[%s2272_s3 + $0x18] sm:$0xf0] }
  0x59   : > { %1122 = vmatpush.bf16.msra.mxu0 %v1596_v63  ;;  %v1544_v57 = vor.u32 %v1725_v55, %v1541_v56 }
  0x5a   : > { %1135 = vmatpush.bf16.msra.mxu1 %v1600_v1 }
  0x5b   : > { %1148 = vmatpush.bf16.msra.mxu2 %v1604_v2 }
  0x5c   : > { %1161 = vmatpush.bf16.msra.mxu3 %v1608_v3 }
  0x5d   : > { %1123 = vmatpush.bf16.msra.mxu0 %v1580_v7 }
  0x5e   : > { %1136 = vmatpush.bf16.msra.mxu1 %v1584_v11 }
  0x5f   : > { %1149 = vmatpush.bf16.msra.mxu2 %v1588_v12 }
  0x60   : > { %1162 = vmatpush.bf16.msra.mxu3 %v1592_v15  ;;  %v949_v15 = vld [vmem:[%s2273_s4] sm:$0xf] }
  0x61   : > { %1124 = vmatpush.bf16.msra.mxu0 %v1564_v20  ;;  %v951_v16 = vperm.slane %v949_v15, 0  ;;  %v952_v17 = vperm.slane %v949_v15, 1  ;;  %v953_v22 = vperm.slane %v949_v15, 2  ;;  %v954_v23 = vperm.slane %v949_v15, 3 }
  0x62   : > { %1137 = vmatpush.bf16.msra.mxu1 %v1568_v25 }
  0x63   : > { %1150 = vmatpush.bf16.msra.mxu2 %v1572_v26 }
  0x64   : > { %1163 = vmatpush.bf16.msra.mxu3 %v1576_v29 }
  0x65   : > { %1125 = vmatpush.bf16.msra.mxu0 %v1548_v33 }
  0x66   : > { %1138 = vmatpush.bf16.msra.mxu1 %v1552_v37 }
  0x67   : > { %1151 = vmatpush.bf16.msra.mxu2 %v1556_v38 }
  0x68   : > { %1164 = vmatpush.bf16.msra.mxu3 %v1560_v42 }
  0x69   : > { %1126 = vmatpush.bf16.msra.mxu0 %v1532_v48 }
  0x6a   : > { %1139 = vmatpush.bf16.msra.mxu1 %v1536_v53 }
  0x6b   : > { %1152 = vmatpush.bf16.msra.mxu2 %v1540_v54 }
  0x6c   : > { %1165 = vmatpush.bf16.msra.mxu3 %v1544_v57 }
  0xa9   : > { %v820_v19 = vpop.f32.mrf.mxu0 }
  0xaa   : > { %v833_v24 = vpop.f32.mrf.mxu1  ;;  %v821_v61 = vadd.f32 %v1780_v58, %v820_v19 }
  0xac   : > { %v834_v62 = vadd.f32 %v833_v24, %v821_v61 }
  0xb1   : > { %v846_v41 = vpop.f32.mrf.mxu2  ;;  %v822_v47 = vpop.f32.mrf.mxu0 }
  0xb2   : > { %v859_v43 = vpop.f32.mrf.mxu3  ;;  %v835_v52 = vpop.f32.mrf.mxu1  ;;  %v847_v63 = vadd.f32 %v846_v41, %v834_v62 }
  0xb4   : > { %v860_v0 = vadd.f32 %v859_v43, %v847_v63 }
  0xb9   : > { %v848_v59 = vpop.f32.mrf.mxu2 }
  0xba   : > { %v861_v60 = vpop.f32.mrf.mxu3 }
  0xc9   : > { %v872_v1 = vpop.f32.mrf.mxu0 }
  0xca   : > { %v885_v2 = vpop.f32.mrf.mxu1  ;;  %v873_v3 = vadd.f32 %v872_v1, %v860_v0 }
  0xcc   : > { %v886_v4 = vadd.f32 %v885_v2, %v873_v3 }
  0xd1   : > { %v898_v5 = vpop.f32.mrf.mxu2  ;;  %v874_v8 = vpop.f32.mrf.mxu0 }
  0xd2   : > { %v911_v6 = vpop.f32.mrf.mxu3  ;;  %v899_v7 = vadd.f32 %v898_v5, %v886_v4  ;;  %v887_v9 = vpop.f32.mrf.mxu1 }
  0xd4   : > { %v912_v10 = vadd.f32 %v911_v6, %v899_v7 }
  0xd6   : > { %v915_v11 = vmax.f32 %v912_v10, 0.0 }
  0xd8   : > { %v916_v12 = vpack.c.bf16 %v915_v11, %v915_v11 }
  0xd9   : > { %v900_v13 = vpop.f32.mrf.mxu2 }
  0xda   : > { %v913_v14 = vpop.f32.mrf.mxu3  ;;  %1127 = vmatmul.bf16.vlgmr.msra.gmra.mxu0 %v916_v12  ;;  %1140 = vmatmul.bf16.vlgmr.msra.gmra.mxu1 %v916_v12 }
  0xdb   : > { %1153 = vmatmul.bf16.vlgmr.msra.gmra.mxu2 %v916_v12  ;;  %1166 = vmatmul.bf16.vlgmr.msra.gmra.mxu3 %v916_v12 }
 0x157   : > { %v1128_v18 = vpop.f32.mrf.mxu0  ;;  %v1141_v19 = vpop.f32.mrf.mxu1 }
 0x158   : > { %v1129_v20 = vadd.f32 %v1128_v18, %v951_v16  ;;  %v1142_v21 = vadd.f32 %v1141_v19, %v952_v17 }
 0x15a   : > { %1171 = vst [vmem:[%s262_s16] sm:$0xff] %v1129_v20 }
 0x15b   : > { %1172 = vst [vmem:[%s262_s16 + $0x8] sm:$0xff] %v1142_v21 }
 0x15e   : > { %v1154_v24 = vpop.f32.mrf.mxu2  ;;  %v1167_v25 = vpop.f32.mrf.mxu3 }
 0x15f   : > { %v1155_v26 = vadd.f32 %v1154_v24, %v953_v22  ;;  %v1168_v27 = vadd.f32 %v1167_v25, %v954_v23  ;;  %v1130_v28 = vpop.f32.mrf.mxu0  ;;  %v1143_v29 = vpop.f32.mrf.mxu1 }
 0x161   : > { %1173 = vst [vmem:[%s262_s16 + $0x10] sm:$0xff] %v1155_v26 }
 0x162   : > { %1174 = vst [vmem:[%s262_s16 + $0x18] sm:$0xff] %v1168_v27 }
 0x166   : > { %v1156_v30 = vpop.f32.mrf.mxu2  ;;  %v1169_v31 = vpop.f32.mrf.mxu3 }
 0x167 PF: > { %s15_s20 = sadd.s32 1, %s1803_s20   ;;  %s2275_s18 = smov %s1799_s19 }
 0x168   : > { %p12_p6 = scmp.ge.s32.totalorder %s15_s20, 10   ;;  %s2276_s19 = smov %s2278_s21 }
 0x16a   :  { %14 = sbr.rel (!%p12_p6) target bundleno = 2 (0x2), region = 70 }

// kernel: latent_lstm_forward.5
= control target key start
LH: loop header
LB: loop body
LE: loop exit
PB: predicated region body
PF: predicated region fallthrough
CT: control target
= control target key end

     0   :  { %s1578_s18 = smov 0   ;;  %s1580_s19 = smov 0   ;;  %s2102_s0 = inlined_call_operand.vmem [shape: bf16[8,8,128], index: 0, kind: input, shape index: {}]   ;;  %s2103_s1 = inlined_call_operand.vmem [shape: bf16[128,128], index: 1, kind: input, shape index: {}]   ;;  %s2104_s2 = inlined_call_operand.vmem [shape: f32[1,128], index: 2, kind: input, shape index: {}]   ;;  %s2105_s3 = inlined_call_operand.vmem [shape: bf16[128,1024], index: 3, kind: input, shape index: {}]   ;;  %s2106_s4 = inlined_call_operand.vmem [shape: f32[1,1024], index: 4, kind: input, shape index: {}]   ;;  %s2107_s5 = inlined_call_operand.vmem [shape: f32[8,8192], index: 5, kind: output, shape index: {}]  }
   0x1   :  { %s1582_s20 = smov 0  }
   0x2 LB: > { %s24_s21 = sadd.s32 1, %s1542_s19  ;;  %p1093_p0 = scmp.ge.s32.totalorder %s1546_s20, 1  ;;  %s1546_s20 = sphi %s1582_s20, %s15_s20   ;;  %s1542_s19 = sphi %s1580_s19, %s2114_s19   ;;  %s1538_s18 = sphi %s1578_s18, %s2113_s18  }
   0x3   : > { %p25_p1 = scmp.ge.s32.totalorder %s24_s21, 8  ;;  %p205_p2 = scmp.lt.s32.totalorder %s1546_s20, 9 }
   0x5   : > { %s2116_s21 = smov (%p25_p1, %s24_s21), 0  ;;  %p206_p3 = pnand %p1093_p0, %p205_p2 }
   0x6   : > { %p239_p4 = scmp.lt.s32.totalorder (!%p206_p3), %s1538_s18, 7 }
   0x7   : > { %209 = sbr.rel (%p206_p3) target bundleno = 354 (0x162), region = 40 }
   0xc   : > { %v1402_v0 = vld [vmem:[%s2103_s1 + $0x38] sm:$0xff]  ;;  %v1401_v1 = vld [vmem:[%s2103_s1 + $0x30] sm:$0xff]  ;;  %v1355_v2 = vld [vmem:[%s2105_s3 + $0x1c0] sm:$0xf]  ;;  %s1710_s6 = scalar_select %p239_p4, %s1538_s18, 7 }
   0xd   : > { %325 = vmatpush.bf16.msra.mxu0 %v1402_v0  ;;  %v1463_v3 = vld [vmem:[%s2105_s3 + $0x1dc] sm:$0xf0]  ;;  %v1459_v4 = vld [vmem:[%s2105_s3 + $0x1c4] sm:$0xf]  ;;  %v1363_v8 = vld [vmem:[%s2105_s3 + $0x1c8] sm:$0xf] }
   0xe   : > { %v1357_v5 = vld [vmem:[%s2105_s3 + $0x1e0] sm:$0xf0]  ;;  %v1356_v6 = vor.u32 %v1463_v3, %v1355_v2  ;;  %v1464_v9 = vld [vmem:[%s2105_s3 + $0x1e4] sm:$0xf0]  ;;  %v1323_v11 = vld [vmem:[%s2105_s3 + $0x180] sm:$0xf] }
   0xf   : > { %v1360_v7 = vor.u32 %v1459_v4, %v1357_v5  ;;  %v1364_v10 = vor.u32 %v1464_v9, %v1363_v8  ;;  %v1400_v12 = vld [vmem:[%s2103_s1 + $0x28] sm:$0xff]  ;;  %v1455_v13 = vld [vmem:[%s2105_s3 + $0x19c] sm:$0xf0]  ;;  %v1451_v14 = vld [vmem:[%s2105_s3 + $0x184] sm:$0xf]  ;;  %s1094_s25 = sshll.u32 %s1710_s6, 2 }
  0x10   : > { %741 = vmatpush.bf16.msra.mxu1 %v1356_v6  ;;  %v1324_v15 = vor.u32 %v1455_v13, %v1323_v11  ;;  %v1325_v16 = vld [vmem:[%s2105_s3 + $0x1a0] sm:$0xf0]  ;;  %v1331_v17 = vld [vmem:[%s2105_s3 + $0x188] sm:$0xf]  ;;  %v1291_v21 = vld [vmem:[%s2105_s3 + $0x140] sm:$0xf]  ;;  %s245_s15 = scalar_lea.vmem %s2102_s0, %s1094_s25 }
  0x11   : > { %326 = vmatpush.bf16.msra.mxu0 %v1401_v1  ;;  %754 = vmatpush.bf16.msra.mxu2 %v1360_v7  ;;  %v1456_v18 = vld [vmem:[%s2105_s3 + $0x1a4] sm:$0xf0]  ;;  %v1328_v19 = vor.u32 %v1451_v14, %v1325_v16  ;;  %v1447_v22 = vld [vmem:[%s2105_s3 + $0x15c] sm:$0xf0]  ;;  %v1443_v23 = vld [vmem:[%s2105_s3 + $0x144] sm:$0xf] }
  0x12   : > { %767 = vmatpush.bf16.msra.mxu3 %v1364_v10  ;;  %v1332_v20 = vor.u32 %v1456_v18, %v1331_v17  ;;  %v1293_v24 = vld [vmem:[%s2105_s3 + $0x160] sm:$0xf0]  ;;  %v1292_v26 = vor.u32 %v1447_v22, %v1291_v21  ;;  %v1299_v27 = vld [vmem:[%s2105_s3 + $0x148] sm:$0xf]  ;;  %v1259_v31 = vld [vmem:[%s2105_s3 + $0x100] sm:$0xf] }
  0x13   : > { %v1399_v25 = vld [vmem:[%s2103_s1 + $0x20] sm:$0xff]  ;;  %v1448_v28 = vld [vmem:[%s2105_s3 + $0x164] sm:$0xf0]  ;;  %v1296_v29 = vor.u32 %v1443_v23, %v1293_v24  ;;  %v1398_v37 = vld [vmem:[%s2103_s1 + $0x18] sm:$0xff]  ;;  %s1095_s25 = sshll.u32 %s1538_s18, 3 }
  0x14   : > { %742 = vmatpush.bf16.msra.mxu1 %v1324_v15  ;;  %v1300_v30 = vor.u32 %v1448_v28, %v1299_v27  ;;  %v1439_v32 = vld [vmem:[%s2105_s3 + $0x11c] sm:$0xf0]  ;;  %v1435_v33 = vld [vmem:[%s2105_s3 + $0x104] sm:$0xf]  ;;  %v1267_v35 = vld [vmem:[%s2105_s3 + $0x108] sm:$0xf] }
  0x15   : > { %327 = vmatpush.bf16.msra.mxu0 %v1400_v12  ;;  %755 = vmatpush.bf16.msra.mxu2 %v1328_v19  ;;  %v1261_v34 = vld [vmem:[%s2105_s3 + $0x120] sm:$0xf0]  ;;  %v1440_v36 = vld [vmem:[%s2105_s3 + $0x124] sm:$0xf0]  ;;  %v1260_v38 = vor.u32 %v1439_v32, %v1259_v31  ;;  %v1227_v41 = vld [vmem:[%s2105_s3 + $0xc0] sm:$0xf] }
  0x16   : > { %768 = vmatpush.bf16.msra.mxu3 %v1332_v20  ;;  %v1264_v39 = vor.u32 %v1435_v33, %v1261_v34  ;;  %v1268_v40 = vor.u32 %v1440_v36, %v1267_v35  ;;  %v1431_v42 = vld [vmem:[%s2105_s3 + $0xdc] sm:$0xf0]  ;;  %v1427_v43 = vld [vmem:[%s2105_s3 + $0xc4] sm:$0xf]  ;;  %v1235_v45 = vld [vmem:[%s2105_s3 + $0xc8] sm:$0xf] }
  0x17   : > { %v1229_v44 = vld [vmem:[%s2105_s3 + $0xe0] sm:$0xf0]  ;;  %v1432_v46 = vld [vmem:[%s2105_s3 + $0xe4] sm:$0xf0]  ;;  %v1397_v47 = vld [vmem:[%s2103_s1 + $0x10] sm:$0xff]  ;;  %v1228_v48 = vor.u32 %v1431_v42, %v1227_v41  ;;  %p2034_p5 = scmp.lt.s32.totalorder %s1095_s25, 63 }
  0x18   : > { %743 = vmatpush.bf16.msra.mxu1 %v1292_v26  ;;  %v1232_v49 = vor.u32 %v1427_v43, %v1229_v44  ;;  %v1236_v50 = vor.u32 %v1432_v46, %v1235_v45  ;;  %v1195_v51 = vld [vmem:[%s2105_s3 + $0x80] sm:$0xf]  ;;  %v1419_v53 = vld [vmem:[%s2105_s3 + $0x84] sm:$0xf]  ;;  %v1203_v55 = vld [vmem:[%s2105_s3 + $0x88] sm:$0xf] }
  0x19   : > { %328 = vmatpush.bf16.msra.mxu0 %v1399_v25  ;;  %756 = vmatpush.bf16.msra.mxu2 %v1296_v29  ;;  %v1423_v52 = vld [vmem:[%s2105_s3 + $0x9c] sm:$0xf0]  ;;  %v1197_v54 = vld [vmem:[%s2105_s3 + $0xa0] sm:$0xf0]  ;;  %v1424_v56 = vld [vmem:[%s2105_s3 + $0xa4] sm:$0xf0] }
  0x1a   : > { %769 = vmatpush.bf16.msra.mxu3 %v1300_v30  ;;  %v1396_v57 = vld [vmem:[%s2103_s1 + $0x8] sm:$0xff]  ;;  %v1196_v58 = vor.u32 %v1423_v52, %v1195_v51  ;;  %v1200_v60 = vor.u32 %v1419_v53, %v1197_v54  ;;  %v1204_v61 = vor.u32 %v1424_v56, %v1203_v55  ;;  %v1163_v62 = vld [vmem:[%s2105_s3 + $0x40] sm:$0xf]  ;;  %v1411_v1 = vld [vmem:[%s2105_s3 + $0x44] sm:$0xf]  ;;  %s2118_s25 = smov (!%p2034_p5, %s1095_s25), 63 }
  0x1b   : > { %v1460_v59 = vld [vmem:[%s2105_s3 + $0x1cc] sm:$0xf]  ;;  %v1415_v63 = vld [vmem:[%s2105_s3 + $0x5c] sm:$0xf0]  ;;  %v1165_v2 = vld [vmem:[%s2105_s3 + $0x60] sm:$0xf0] }
  0x1c   : > { %744 = vmatpush.bf16.msra.mxu1 %v1260_v38  ;;  %v1365_v0 = vld [vmem:[%s2105_s3 + $0x1e8] sm:$0xf0]  ;;  %v1171_v3 = vld [vmem:[%s2105_s3 + $0x48] sm:$0xf]  ;;  %v1395_v5 = vld [vmem:[%s2103_s1] sm:$0xff]  ;;  %v1164_v8 = vor.u32 %v1415_v63, %v1163_v62  ;;  %v1168_v10 = vor.u32 %v1411_v1, %v1165_v2  ;;  %s1096_s18 = sshll.u32 %s2118_s25, 3 }
  0x1d   : > { %329 = vmatpush.bf16.msra.mxu0 %v1398_v37  ;;  %757 = vmatpush.bf16.msra.mxu2 %v1264_v39  ;;  %v1416_v4 = vld [vmem:[%s2105_s3 + $0x64] sm:$0xf0]  ;;  %v1452_v6 = vld [vmem:[%s2105_s3 + $0x18c] sm:$0xf]  ;;  %v1368_v9 = vor.u32 %v1460_v59, %v1365_v0  ;;  %v1131_v11 = vld [vmem:[%s2105_s3] sm:$0xf]  ;;  %s2067_s9 = scalar_lea.vmem %s2107_s5, %s1096_s18 }
  0x1e   : > { %770 = vmatpush.bf16.msra.mxu3 %v1268_v40  ;;  %v1333_v7 = vld [vmem:[%s2105_s3 + $0x1a8] sm:$0xf0]  ;;  %v1407_v12 = vld [vmem:[%s2105_s3 + $0x1c] sm:$0xf0]  ;;  %v1403_v13 = vld [vmem:[%s2105_s3 + $0x4] sm:$0xf]  ;;  %v1172_v15 = vor.u32 %v1416_v4, %v1171_v3 }
  0x1f   : > { %v256_v14 = vld [vmem:[%s245_s15] sm:$0xf]  ;;  %v1133_v16 = vld [vmem:[%s2105_s3 + $0x20] sm:$0xf0]  ;;  %v1139_v17 = vld [vmem:[%s2105_s3 + $0x8] sm:$0xf]  ;;  %v1132_v22 = vor.u32 %v1407_v12, %v1131_v11  ;;  %v1336_v26 = vor.u32 %v1452_v6, %v1333_v7 }
  0x20   : > { %745 = vmatpush.bf16.msra.mxu1 %v1228_v48  ;;  %v1408_v18 = vld [vmem:[%s2105_s3 + $0x24] sm:$0xf0]  ;;  %v1371_v19 = vld [vmem:[%s2105_s3 + $0x1d0] sm:$0xf]  ;;  %v1461_v21 = vld [vmem:[%s2105_s3 + $0x1d4] sm:$0xf]  ;;  %v1136_v27 = vor.u32 %v1403_v13, %v1133_v16 }
  0x21   : > { %330 = vmatpush.bf16.msra.mxu0 %v1397_v47  ;;  %758 = vmatpush.bf16.msra.mxu2 %v1232_v49  ;;  %v1465_v20 = vld [vmem:[%s2105_s3 + $0x1ec] sm:$0xf0]  ;;  %v1373_v23 = vld [vmem:[%s2105_s3 + $0x1f0] sm:$0xf0]  ;;  %v1379_v24 = vld [vmem:[%s2105_s3 + $0x1d8] sm:$0xf]  ;;  %v1140_v30 = vor.u32 %v1408_v18, %v1139_v17 }
  0x22   : > { %771 = vmatpush.bf16.msra.mxu3 %v1236_v50  ;;  %v1466_v25 = vld [vmem:[%s2105_s3 + $0x1f4] sm:$0xf0]  ;;  %v1444_v28 = vld [vmem:[%s2105_s3 + $0x14c] sm:$0xf]  ;;  %v1372_v31 = vor.u32 %v1465_v20, %v1371_v19  ;;  %v1376_v32 = vor.u32 %v1461_v21, %v1373_v23  ;;  %v1339_v34 = vld [vmem:[%s2105_s3 + $0x190] sm:$0xf] }
  0x23   : > { %v1301_v29 = vld [vmem:[%s2105_s3 + $0x168] sm:$0xf0]  ;;  %v1380_v33 = vor.u32 %v1466_v25, %v1379_v24  ;;  %v1457_v35 = vld [vmem:[%s2105_s3 + $0x1ac] sm:$0xf0]  ;;  %v1453_v36 = vld [vmem:[%s2105_s3 + $0x194] sm:$0xf] }
  0x24   : > { %746 = vmatpush.bf16.msra.mxu1 %v1196_v58  ;;  %v1341_v37 = vld [vmem:[%s2105_s3 + $0x1b0] sm:$0xf0]  ;;  %v1347_v38 = vld [vmem:[%s2105_s3 + $0x198] sm:$0xf]  ;;  %v1304_v40 = vor.u32 %v1444_v28, %v1301_v29  ;;  %v1436_v41 = vld [vmem:[%s2105_s3 + $0x10c] sm:$0xf]  ;;  %v1340_v43 = vor.u32 %v1457_v35, %v1339_v34 }
  0x25   : > { %331 = vmatpush.bf16.msra.mxu0 %v1396_v57  ;;  %759 = vmatpush.bf16.msra.mxu2 %v1200_v60  ;;  %v1458_v39 = vld [vmem:[%s2105_s3 + $0x1b4] sm:$0xf0]  ;;  %v1269_v42 = vld [vmem:[%s2105_s3 + $0x128] sm:$0xf0]  ;;  %v1344_v44 = vor.u32 %v1453_v36, %v1341_v37  ;;  %v1307_v46 = vld [vmem:[%s2105_s3 + $0x150] sm:$0xf] }
  0x26   : > { %772 = vmatpush.bf16.msra.mxu3 %v1204_v61  ;;  %v1348_v45 = vor.u32 %v1458_v39, %v1347_v38  ;;  %v1449_v47 = vld [vmem:[%s2105_s3 + $0x16c] sm:$0xf0]  ;;  %v1445_v48 = vld [vmem:[%s2105_s3 + $0x154] sm:$0xf]  ;;  %v1315_v50 = vld [vmem:[%s2105_s3 + $0x158] sm:$0xf]  ;;  %v1272_v52 = vor.u32 %v1436_v41, %v1269_v42 }
  0x27   : > { %v1309_v49 = vld [vmem:[%s2105_s3 + $0x170] sm:$0xf0]  ;;  %v1450_v51 = vld [vmem:[%s2105_s3 + $0x174] sm:$0xf0]  ;;  %v1428_v53 = vld [vmem:[%s2105_s3 + $0xcc] sm:$0xf]  ;;  %v1308_v55 = vor.u32 %v1449_v47, %v1307_v46 }
  0x28   : > { %747 = vmatpush.bf16.msra.mxu1 %v1164_v8  ;;  %v1237_v54 = vld [vmem:[%s2105_s3 + $0xe8] sm:$0xf0]  ;;  %v1312_v56 = vor.u32 %v1445_v48, %v1309_v49  ;;  %v1316_v57 = vor.u32 %v1450_v51, %v1315_v50  ;;  %v1462_v3 = vld [vmem:[%s2105_s3 + $0x1dc] sm:$0xf]  ;;  %v1275_v13 = vld [vmem:[%s2105_s3 + $0x110] sm:$0xf] }
  0x29   : > { %332 = vmatpush.bf16.msra.mxu0 %v1395_v5  ;;  %760 = vmatpush.bf16.msra.mxu2 %v1168_v10  ;;  %v1240_v58 = vor.u32 %v1428_v53, %v1237_v54  ;;  %v1420_v59 = vld [vmem:[%s2105_s3 + $0x8c] sm:$0xf]  ;;  %v1381_v4 = vld [vmem:[%s2105_s3 + $0x1f8] sm:$0xf0]  ;;  %v1277_v17 = vld [vmem:[%s2105_s3 + $0x130] sm:$0xf0] }
  0x2a   : > { %773 = vmatpush.bf16.msra.mxu3 %v1172_v15  ;;  %v1205_v60 = vld [vmem:[%s2105_s3 + $0xa8] sm:$0xf0]  ;;  %v1384_v6 = vor.u32 %v1462_v3, %v1381_v4  ;;  %v1454_v7 = vld [vmem:[%s2105_s3 + $0x19c] sm:$0xf]  ;;  %v1437_v15 = vld [vmem:[%s2105_s3 + $0x114] sm:$0xf] }
  0x2b   : > { %v1208_v61 = vor.u32 %v1420_v59, %v1205_v60  ;;  %v1412_v62 = vld [vmem:[%s2105_s3 + $0x4c] sm:$0xf]  ;;  %v1349_v8 = vld [vmem:[%s2105_s3 + $0x1b8] sm:$0xf0]  ;;  %v1283_v18 = vld [vmem:[%s2105_s3 + $0x118] sm:$0xf]  ;;  %v1280_v20 = vor.u32 %v1437_v15, %v1277_v17 }
  0x2c   : > { %333 = vmatmul.bf16.vlgmr.msra.gmra.mxu0 %v256_v14  ;;  %748 = vmatpush.bf16.msra.mxu1 %v1132_v22  ;;  %v1173_v63 = vld [vmem:[%s2105_s3 + $0x68] sm:$0xf0]  ;;  %v1446_v10 = vld [vmem:[%s2105_s3 + $0x15c] sm:$0xf]  ;;  %v1441_v14 = vld [vmem:[%s2105_s3 + $0x12c] sm:$0xf0] }
  0x2d   : > { %780 = vmatpush.bf16.msrb.mxu0 %v1368_v9  ;;  %761 = vmatpush.bf16.msra.mxu2 %v1136_v27  ;;  %v1176_v0 = vor.u32 %v1412_v62, %v1173_v63  ;;  %v1404_v1 = vld [vmem:[%s2105_s3 + $0xc] sm:$0xf]  ;;  %v1352_v9 = vor.u32 %v1454_v7, %v1349_v8  ;;  %v1317_v11 = vld [vmem:[%s2105_s3 + $0x178] sm:$0xf0]  ;;  %v1276_v16 = vor.u32 %v1441_v14, %v1275_v13  ;;  %v1442_v19 = vld [vmem:[%s2105_s3 + $0x134] sm:$0xf0] }
  0x2e   : > { %774 = vmatpush.bf16.msra.mxu3 %v1140_v30  ;;  %v1141_v2 = vld [vmem:[%s2105_s3 + $0x28] sm:$0xf0]  ;;  %v1320_v12 = vor.u32 %v1446_v10, %v1317_v11  ;;  %v1284_v21 = vor.u32 %v1442_v19, %v1283_v18  ;;  %v1438_v22 = vld [vmem:[%s2105_s3 + $0x11c] sm:$0xf]  ;;  %v1243_v25 = vld [vmem:[%s2105_s3 + $0xd0] sm:$0xf] }
  0x2f   : > { %v1144_v5 = vor.u32 %v1404_v1, %v1141_v2  ;;  %v1285_v23 = vld [vmem:[%s2105_s3 + $0x138] sm:$0xf0]  ;;  %v1429_v27 = vld [vmem:[%s2105_s3 + $0xd4] sm:$0xf]  ;;  %v1251_v30 = vld [vmem:[%s2105_s3 + $0xd8] sm:$0xf] }
  0x30   : > { %793 = vmatpush.bf16.msrb.mxu1 %v1372_v31  ;;  %v1288_v24 = vor.u32 %v1438_v22, %v1285_v23  ;;  %v1245_v29 = vld [vmem:[%s2105_s3 + $0xf0] sm:$0xf0]  ;;  %v1434_v31 = vld [vmem:[%s2105_s3 + $0xf4] sm:$0xf0]  ;;  %v1430_v34 = vld [vmem:[%s2105_s3 + $0xdc] sm:$0xf] }
  0x31   : > { %781 = vmatpush.bf16.msrb.mxu0 %v1336_v26  ;;  %806 = vmatpush.bf16.msrb.mxu2 %v1376_v32  ;;  %v1433_v26 = vld [vmem:[%s2105_s3 + $0xec] sm:$0xf0]  ;;  %v1248_v32 = vor.u32 %v1429_v27, %v1245_v29  ;;  %v1253_v35 = vld [vmem:[%s2105_s3 + $0xf8] sm:$0xf0]  ;;  %v1421_v39 = vld [vmem:[%s2105_s3 + $0x94] sm:$0xf] }
  0x32   : > { %819 = vmatpush.bf16.msrb.mxu3 %v1380_v33  ;;  %v1244_v28 = vor.u32 %v1433_v26, %v1243_v25  ;;  %v1252_v33 = vor.u32 %v1434_v31, %v1251_v30  ;;  %v1256_v36 = vor.u32 %v1430_v34, %v1253_v35  ;;  %v1211_v37 = vld [vmem:[%s2105_s3 + $0x90] sm:$0xf]  ;;  %v1213_v41 = vld [vmem:[%s2105_s3 + $0xb0] sm:$0xf0]  ;;  %v1219_v42 = vld [vmem:[%s2105_s3 + $0x98] sm:$0xf] }
  0x33   : > { %v1425_v38 = vld [vmem:[%s2105_s3 + $0xac] sm:$0xf0]  ;;  %v1422_v46 = vld [vmem:[%s2105_s3 + $0x9c] sm:$0xf]  ;;  %v1413_v51 = vld [vmem:[%s2105_s3 + $0x54] sm:$0xf] }
  0x34   : > { %794 = vmatpush.bf16.msrb.mxu1 %v1340_v43  ;;  %v1426_v43 = vld [vmem:[%s2105_s3 + $0xb4] sm:$0xf0]  ;;  %v1221_v47 = vld [vmem:[%s2105_s3 + $0xb8] sm:$0xf0]  ;;  %v1179_v48 = vld [vmem:[%s2105_s3 + $0x50] sm:$0xf] }
  0x35   : > { %782 = vmatpush.bf16.msrb.mxu0 %v1304_v40  ;;  %807 = vmatpush.bf16.msrb.mxu2 %v1344_v44  ;;  %v1212_v40 = vor.u32 %v1425_v38, %v1211_v37  ;;  %v1216_v44 = vor.u32 %v1421_v39, %v1213_v41  ;;  %v1224_v49 = vor.u32 %v1422_v46, %v1221_v47  ;;  %v1417_v50 = vld [vmem:[%s2105_s3 + $0x6c] sm:$0xf0]  ;;  %v1189_v59 = vld [vmem:[%s2105_s3 + $0x78] sm:$0xf0]  ;;  %v1405_v63 = vld [vmem:[%s2105_s3 + $0x14] sm:$0xf] }
  0x36   : > { %820 = vmatpush.bf16.msrb.mxu3 %v1348_v45  ;;  %v1220_v45 = vor.u32 %v1426_v43, %v1219_v42  ;;  %v1180_v53 = vor.u32 %v1417_v50, %v1179_v48  ;;  %v1147_v60 = vld [vmem:[%s2105_s3 + $0x10] sm:$0xf]  ;;  %v1155_v1 = vld [vmem:[%s2105_s3 + $0x18] sm:$0xf]  ;;  %v1406_v4 = vld [vmem:[%s2105_s3 + $0x1c] sm:$0xf] }
  0x37   : > { %v1410_v3 = vld [vmem:[%s2105_s3 + $0x34] sm:$0xf0]  ;;  %v2022_v14 = vld [vmem:[%s2106_s4] sm:$0xff] }
  0x38   : > { %795 = vmatpush.bf16.msrb.mxu1 %v1308_v55  ;;  %v1187_v55 = vld [vmem:[%s2105_s3 + $0x58] sm:$0xf]  ;;  %v1156_v7 = vor.u32 %v1410_v3, %v1155_v1  ;;  %v405_v15 = vperm.slane %v2022_v14, 0  ;;  %v406_v22 = vperm.slane %v2022_v14, 1  ;;  %v409_v37 = vperm.slane %v2022_v14, 4 }
  0x39   : > { %783 = vmatpush.bf16.msrb.mxu0 %v1272_v52  ;;  %808 = vmatpush.bf16.msrb.mxu2 %v1312_v56  ;;  %v1181_v52 = vld [vmem:[%s2105_s3 + $0x70] sm:$0xf0]  ;;  %v1418_v56 = vld [vmem:[%s2105_s3 + $0x74] sm:$0xf0]  ;;  %v412_v41 = vperm.slane %v2022_v14, 7 }
  0x3a   : > { %821 = vmatpush.bf16.msrb.mxu3 %v1316_v57  ;;  %v1184_v54 = vor.u32 %v1413_v51, %v1181_v52  ;;  %v1414_v57 = vld [vmem:[%s2105_s3 + $0x5c] sm:$0xf]  ;;  %v410_v52 = vperm.slane %v2022_v14, 5 }
  0x3b   : > { %v1192_v62 = vor.u32 %v1414_v57, %v1189_v59 }
  0x3c   : > { %796 = vmatpush.bf16.msrb.mxu1 %v1276_v16  ;;  %v408_v16 = vperm.slane %v2022_v14, 3 }
  0x3d   : > { %784 = vmatpush.bf16.msrb.mxu0 %v1240_v58  ;;  %809 = vmatpush.bf16.msrb.mxu2 %v1280_v20  ;;  %v1188_v58 = vor.u32 %v1418_v56, %v1187_v55 }
  0x3e   : > { %822 = vmatpush.bf16.msrb.mxu3 %v1284_v21 }
  0x40   : > { %797 = vmatpush.bf16.msrb.mxu1 %v1244_v28 }
  0x41   : > { %785 = vmatpush.bf16.msrb.mxu0 %v1208_v61  ;;  %810 = vmatpush.bf16.msrb.mxu2 %v1248_v32  ;;  %v1409_v61 = vld [vmem:[%s2105_s3 + $0x2c] sm:$0xf0] }
  0x42   : > { %823 = vmatpush.bf16.msrb.mxu3 %v1252_v33  ;;  %v1148_v2 = vor.u32 %v1409_v61, %v1147_v60 }
  0x44   : > { %798 = vmatpush.bf16.msrb.mxu1 %v1212_v40 }
  0x45   : > { %786 = vmatpush.bf16.msrb.mxu0 %v1176_v0  ;;  %811 = vmatpush.bf16.msrb.mxu2 %v1216_v44  ;;  %v1149_v0 = vld [vmem:[%s2105_s3 + $0x30] sm:$0xf0] }
  0x46   : > { %824 = vmatpush.bf16.msrb.mxu3 %v1220_v45 }
  0x48   : > { %799 = vmatpush.bf16.msrb.mxu1 %v1180_v53  ;;  %v411_v53 = vperm.slane %v2022_v14, 6 }
  0x49   : > { %787 = vmatpush.bf16.msrb.mxu0 %v1144_v5  ;;  %v1157_v5 = vld [vmem:[%s2105_s3 + $0x38] sm:$0xf0]  ;;  %812 = vmatpush.bf16.msrb.mxu2 %v1184_v54 }
  0x4a   : > { %825 = vmatpush.bf16.msrb.mxu3 %v1188_v58  ;;  %v1160_v8 = vor.u32 %v1406_v4, %v1157_v5 }
  0x4c   : > { %800 = vmatpush.bf16.msrb.mxu1 %v1148_v2 }
  0x4d   : > { %832 = vmatpush.bf16.msra.mxu0 %v1384_v6  ;;  %v1152_v6 = vor.u32 %v1405_v63, %v1149_v0 }
  0x4e   : > { %826 = vmatpush.bf16.msrb.mxu3 %v1156_v7 }
  0x4f   : > { %813 = vmatpush.bf16.msrb.mxu2 %v1152_v6 }
  0x51   : > { %833 = vmatpush.bf16.msra.mxu0 %v1352_v9  ;;  %v1491_v9 = vld [vmem:[%s2104_s2] ss:$0 sm:$0xff] }
  0x55   : > { %834 = vmatpush.bf16.msra.mxu0 %v1320_v12 }
  0x59   : > { %835 = vmatpush.bf16.msra.mxu0 %v1288_v24  ;;  %v407_v24 = vperm.slane %v2022_v14, 2 }
  0x5d   : > { %836 = vmatpush.bf16.msra.mxu0 %v1256_v36 }
  0x61   : > { %837 = vmatpush.bf16.msra.mxu0 %v1224_v49 }
  0x65   : > { %838 = vmatpush.bf16.msra.mxu0 %v1192_v62 }
  0x69   : > { %839 = vmatpush.bf16.msra.mxu0 %v1160_v8 }
  0xa9   : > { %v334_v10 = vpop.f32.mrf.mxu0 }
  0xaa   : > { %v335_v11 = vadd.f32 %v1491_v9, %v334_v10 }
  0xac   : > { %v338_v12 = vpack.c.bf16 %v335_v11, %v335_v11 }
  0xae   : > { %749 = vmatmul.bf16.vlgmr.msra.gmra.mxu1 %v338_v12  ;;  %762 = vmatmul.bf16.vlgmr.msra.gmra.mxu2 %v338_v12 }
  0xaf   : > { %775 = vmatmul.bf16.vlgmr.msra.gmra.mxu3 %v338_v12  ;;  %788 = vmatmul.bf16.vlgmr.msrb.gmra.mxu0 %v338_v12 }
  0xb1   : > { %v336_v13 = vpop.f32.mrf.mxu0 }
  0xbe   : > { %801 = vmatmul.bf16.vlgmr.msrb.gmra.mxu1 %v338_v12  ;;  %814 = vmatmul.bf16.vlgmr.msrb.gmra.mxu2 %v338_v12 }
  0xbf   : > { %827 = vmatmul.bf16.vlgmr.msrb.gmra.mxu3 %v338_v12  ;;  %840 = vmatmul.bf16.vlgmr.msra.gmra.mxu0 %v338_v12 }
 0x12b   : > { %v750_v17 = vpop.f32.mrf.mxu1 }
 0x12c   : > { %v751_v18 = vadd.f32 %v750_v17, %v405_v15  ;;  %v789_v19 = vpop.f32.mrf.mxu0 }
 0x12d   : > { %v790_v20 = vadd.f32 %v789_v19, %v408_v16 }
 0x12e   : > { %v1385_v21 = vmul.f32 -1.442695, %v751_v18 }
 0x12f   : > { %v1388_v23 = vmul.f32 -1.442695, %v790_v20 }
 0x130   : > { %1492 = vpow2.f32 %v1385_v21 }
 0x131   : > { %1494 = vpow2.f32 %v1388_v23  ;;  %v763_v25 = vpop.f32.mrf.mxu2 }
 0x132   : > { %v764_v26 = vadd.f32 %v763_v25, %v406_v22  ;;  %v776_v27 = vpop.f32.mrf.mxu3 }
 0x133   : > { %v777_v28 = vadd.f32 %v776_v27, %v407_v24  ;;  %v752_v29 = vpop.f32.mrf.mxu1 }
 0x134   : > { %v1386_v30 = vmul.f32 -1.442695, %v764_v26  ;;  %v791_v31 = vpop.f32.mrf.mxu0 }
 0x135   : > { %v1387_v32 = vmul.f32 -1.442695, %v777_v28 }
 0x136   : > { %v1493_v33 = vpop.eup %1492  ;;  %1496 = vpow2.f32 %v1386_v30 }
 0x137   : > { %v1495_v34 = vpop.eup %1494  ;;  %v869_v35 = vadd.f32 1.0, %v1493_v33  ;;  %1498 = vpow2.f32 %v1387_v32 }
 0x138   : > { %v2028_v36 = vadd.f32 1.0, %v1495_v34 }
 0x139   : > { %1500 = vrcp.f32 %v869_v35  ;;  %v765_v38 = vpop.f32.mrf.mxu2  ;;  %v886_v47 = vand.u32 2147483647, %v869_v35  ;;  %v888_v56 = vand.u32 2147483648, %v869_v35  ;;  %vm882_vm0 = vweird.f32 %v869_v35 }
 0x13a   : > { %1502 = vrcp.f32 %v2028_v36  ;;  %v778_v39 = vpop.f32.mrf.mxu3  ;;  %vm927_vm1 = vweird.f32 %v2028_v36  ;;  %v931_v58 = vand.u32 2147483647, %v2028_v36  ;;  %v933_v62 = vand.u32 2147483648, %v2028_v36 }
 0x13b   : > { %v802_v40 = vpop.f32.mrf.mxu1  ;;  %vm2053_vm2 = vcmp.eq.f32.partialorder %v886_v47, 8.507059e+37  ;;  %v889_v6 = vor.u32 1.1754944e-38, %v888_v56 }
 0x13c   : > { %v1497_v42 = vpop.eup %1496  ;;  %v803_v43 = vadd.f32 %v802_v40, %v409_v37  ;;  %v841_v44 = vpop.f32.mrf.mxu0  ;;  %vm2059_vm5 = vcmp.eq.f32.partialorder %v931_v58, 8.507059e+37  ;;  %v934_v15 = vor.u32 1.1754944e-38, %v933_v62 }
 0x13d   : > { %v1499_v45 = vpop.eup %1498  ;;  %v2038_v46 = vadd.f32 1.0, %v1497_v42  ;;  %v842_v51 = vadd.f32 %v841_v44, %v412_v41 }
 0x13e   : > { %v2040_v48 = vadd.f32 1.0, %v1499_v45  ;;  %v1389_v49 = vmul.f32 -1.442695, %v803_v43 }
 0x13f   : > { %v1501_v50 = vpop.eup %1500  ;;  %1504 = vrcp.f32 %v2038_v46  ;;  %v1392_v1 = vmul.f32 -1.442695, %v842_v51  ;;  %v901_v18 = vand.u32 2147483647, %v2038_v46  ;;  %v903_v23 = vand.u32 2147483648, %v2038_v46 }
 0x140   : > { %v1503_v54 = vpop.eup %1502  ;;  %v878_v55 = vmul.f32 %v1501_v50, %v869_v35  ;;  %1506 = vrcp.f32 %v2040_v48  ;;  %vm883_vm3 = vweird.f32 %v1501_v50  ;;  %v918_v31 = vand.u32 2147483648, %v2040_v48 }
 0x141   : > { %v923_v57 = vmul.f32 %v1503_v54, %v2028_v36  ;;  %v815_v59 = vpop.f32.mrf.mxu2  ;;  %1508 = vpow2.f32 %v1389_v49  ;;  %vm928_vm4 = vweird.f32 %v1503_v54  ;;  %vm884_vm6 = vmor %vm882_vm0, %vm883_vm3  ;;  %v916_v35 = vand.u32 2147483647, %v2040_v48 }
 0x142   : > { %v879_v60 = vsub.f32 1.0, %v878_v55  ;;  %v828_v63 = vpop.f32.mrf.mxu3  ;;  %v816_v2 = vadd.f32 %v815_v59, %v410_v52  ;;  %1510 = vpow2.f32 %v1392_v1  ;;  %vm929_vm7 = vmor %vm927_vm1, %vm928_vm4  ;;  %vm897_vm10 = vweird.f32 %v2038_v46 }
 0x143   : > { %v924_v0 = vsub.f32 1.0, %v923_v57  ;;  %v829_v3 = vadd.f32 %v828_v63, %v411_v53  ;;  %v804_v4 = vpop.f32.mrf.mxu1  ;;  %v904_v39 = vor.u32 1.1754944e-38, %v903_v23  ;;  %vm912_vm12 = vweird.f32 %v2040_v48 }
 0x144   : > { %v880_v5 = vmul.f32 %v1501_v50, %v879_v60  ;;  %v843_v7 = vpop.f32.mrf.mxu0  ;;  %v1390_v10 = vmul.f32 -1.442695, %v816_v2  ;;  %vm902_vm13 = vcmp.eq.f32.partialorder %v901_v18, 8.507059e+37  ;;  %v919_v43 = vor.u32 1.1754944e-38, %v918_v31 }
 0x145   : > { %v1505_v8 = vpop.eup %1504  ;;  %v925_v9 = vmul.f32 %v1503_v54, %v924_v0  ;;  %v1391_v11 = vmul.f32 -1.442695, %v829_v3  ;;  %vm917_vm15 = vcmp.eq.f32.partialorder %v916_v35, 8.507059e+37 }
 0x146   : > { %v1507_v12 = vpop.eup %1506  ;;  %v881_v13 = vadd.f32 %v1501_v50, %v880_v5  ;;  %v893_v16 = vmul.f32 %v1505_v8, %v2038_v46  ;;  %1512 = vpow2.f32 %v1390_v10  ;;  %vm898_vm8 = vweird.f32 %v1505_v8 }
 0x147   : > { %v926_v17 = vadd.f32 %v1503_v54, %v925_v9  ;;  %v908_v19 = vmul.f32 %v1507_v12, %v2040_v48  ;;  %v1509_v20 = vpop.eup %1508  ;;  %1514 = vpow2.f32 %v1391_v11  ;;  %vm913_vm9 = vweird.f32 %v1507_v12  ;;  %vm899_vm11 = vmor %vm897_vm10, %vm898_vm8 }
 0x148   : > { %v885_v21 = vsel %vm884_vm6, %v1501_v50, %v881_v13  ;;  %v894_v22 = vsub.f32 1.0, %v893_v16  ;;  %v873_v27 = vadd.f32 1.0, %v1509_v20  ;;  %v1511_v33 = vpop.eup %1510  ;;  %vm914_vm14 = vmor %vm912_vm12, %vm913_vm9 }
 0x149   : > { %v890_v24 = vsel %vm2053_vm2, %v889_v6, %v885_v21  ;;  %v930_v25 = vsel %vm929_vm7, %v1503_v54, %v926_v17  ;;  %v909_v26 = vsub.f32 1.0, %v908_v19  ;;  %v817_v28 = vpop.f32.mrf.mxu2  ;;  %v876_v37 = vadd.f32 1.0, %v1511_v33 }
 0x14a   : > { %997 = vst [vmem:[%s2067_s9] sm:$0xff] %v890_v24  ;;  %v935_v29 = vsel %vm2059_vm5, %v934_v15, %v930_v25  ;;  %v895_v30 = vmul.f32 %v1505_v8, %v894_v22  ;;  %v830_v32 = vpop.f32.mrf.mxu3  ;;  %1516 = vrcp.f32 %v873_v27  ;;  %v948_v53 = vand.u32 2147483648, %v873_v27 }
 0x14b   : > { %1000 = vst [vmem:[%s2067_s9 + $0x18] sm:$0xff] %v935_v29  ;;  %v910_v34 = vmul.f32 %v1507_v12, %v909_v26  ;;  %1518 = vrcp.f32 %v876_v37  ;;  %v946_v56 = vand.u32 2147483647, %v873_v27  ;;  %v991_v58 = vand.u32 2147483647, %v876_v37 }
 0x14c   : > { %v896_v36 = vadd.f32 %v1505_v8, %v895_v30  ;;  %v1513_v38 = vpop.eup %1512  ;;  %vm942_vm1 = vweird.f32 %v873_v27  ;;  %v993_v61 = vand.u32 2147483648, %v876_v37  ;;  %v949_v63 = vor.u32 1.1754944e-38, %v948_v53 }
 0x14d   : > { %v911_v40 = vadd.f32 %v1507_v12, %v910_v34  ;;  %v1515_v41 = vpop.eup %1514  ;;  %v874_v47 = vadd.f32 1.0, %v1513_v38  ;;  %vm947_vm4 = vcmp.eq.f32.partialorder %v946_v56, 8.507059e+37  ;;  %vm987_vm5 = vweird.f32 %v876_v37 }
 0x14e   : > { %v900_v42 = vsel %vm899_vm11, %v1505_v8, %v896_v36  ;;  %v875_v49 = vadd.f32 1.0, %v1515_v41  ;;  %vm992_vm6 = vcmp.eq.f32.partialorder %v991_v58, 8.507059e+37  ;;  %v994_v7 = vor.u32 1.1754944e-38, %v993_v61 }
 0x14f   : > { %v905_v44 = vsel %vm902_vm13, %v904_v39, %v900_v42  ;;  %v915_v45 = vsel %vm914_vm14, %v1507_v12, %v911_v40  ;;  %1520 = vrcp.f32 %v874_v47  ;;  %v961_v8 = vand.u32 2147483647, %v874_v47 }
 0x150   : > { %998 = vst [vmem:[%s2067_s9 + $0x8] sm:$0xff] %v905_v44  ;;  %v920_v46 = vsel %vm917_vm15, %v919_v43, %v915_v45  ;;  %v1517_v50 = vpop.eup %1516  ;;  %1522 = vrcp.f32 %v875_v49  ;;  %v963_v9 = vand.u32 2147483648, %v874_v47  ;;  %v978_v13 = vand.u32 2147483648, %v875_v49 }
 0x151   : > { %999 = vst [vmem:[%s2067_s9 + $0x10] sm:$0xff] %v920_v46  ;;  %v938_v51 = vmul.f32 %v1517_v50, %v873_v27  ;;  %v1519_v52 = vpop.eup %1518  ;;  %vm943_vm0 = vweird.f32 %v1517_v50  ;;  %v976_v16 = vand.u32 2147483647, %v875_v49  ;;  %vm957_vm10 = vweird.f32 %v874_v47 }
 0x152   : > { %v983_v54 = vmul.f32 %v1519_v52, %v876_v37  ;;  %vm944_vm2 = vmor %vm942_vm1, %vm943_vm0  ;;  %vm988_vm3 = vweird.f32 %v1519_v52  ;;  %v964_v18 = vor.u32 1.1754944e-38, %v963_v9  ;;  %vm972_vm12 = vweird.f32 %v875_v49 }
 0x153   : > { %v939_v48 = vsub.f32 1.0, %v938_v51  ;;  %vm989_vm7 = vmor %vm987_vm5, %vm988_vm3  ;;  %vm962_vm13 = vcmp.eq.f32.partialorder %v961_v8, 8.507059e+37  ;;  %v979_v21 = vor.u32 1.1754944e-38, %v978_v13  ;;  %vm977_vm15 = vcmp.eq.f32.partialorder %v976_v16, 8.507059e+37 }
 0x154   : > { %v984_v57 = vsub.f32 1.0, %v983_v54 }
 0x155   : > { %v940_v55 = vmul.f32 %v1517_v50, %v939_v48  ;;  %v1521_v59 = vpop.eup %1520 }
 0x156   : > { %v1523_v62 = vpop.eup %1522  ;;  %v985_v0 = vmul.f32 %v1519_v52, %v984_v57  ;;  %v953_v1 = vmul.f32 %v1521_v59, %v874_v47  ;;  %vm958_vm8 = vweird.f32 %v1521_v59 }
 0x157   : > { %v941_v60 = vadd.f32 %v1517_v50, %v940_v55  ;;  %v968_v3 = vmul.f32 %v1523_v62, %v875_v49  ;;  %vm973_vm9 = vweird.f32 %v1523_v62  ;;  %vm959_vm11 = vmor %vm957_vm10, %vm958_vm8 }
 0x158   : > { %v986_v5 = vadd.f32 %v1519_v52, %v985_v0  ;;  %v954_v6 = vsub.f32 1.0, %v953_v1  ;;  %vm974_vm14 = vmor %vm972_vm12, %vm973_vm9 }
 0x159   : > { %v945_v2 = vsel %vm944_vm2, %v1517_v50, %v941_v60  ;;  %v969_v10 = vsub.f32 1.0, %v968_v3 }
 0x15a   : > { %v950_v4 = vsel %vm947_vm4, %v949_v63, %v945_v2  ;;  %v990_v11 = vsel %vm989_vm7, %v1519_v52, %v986_v5  ;;  %v955_v12 = vmul.f32 %v1521_v59, %v954_v6 }
 0x15b   : > { %1001 = vst [vmem:[%s2067_s9 + $0x20] sm:$0xff] %v950_v4  ;;  %v995_v14 = vsel %vm992_vm6, %v994_v7, %v990_v11  ;;  %v970_v15 = vmul.f32 %v1523_v62, %v969_v10 }
 0x15c   : > { %1004 = vst [vmem:[%s2067_s9 + $0x38] sm:$0xff] %v995_v14  ;;  %v956_v17 = vadd.f32 %v1521_v59, %v955_v12 }
 0x15d   : > { %v971_v19 = vadd.f32 %v1523_v62, %v970_v15 }
 0x15e   : > { %v960_v20 = vsel %vm959_vm11, %v1521_v59, %v956_v17 }
 0x15f   : > { %v965_v22 = vsel %vm962_vm13, %v964_v18, %v960_v20  ;;  %v975_v23 = vsel %vm974_vm14, %v1523_v62, %v971_v19 }
 0x160   : > { %1002 = vst [vmem:[%s2067_s9 + $0x28] sm:$0xff] %v965_v22  ;;  %v980_v24 = vsel %vm977_vm15, %v979_v21, %v975_v23 }
 0x161   : > { %1003 = vst [vmem:[%s2067_s9 + $0x30] sm:$0xff] %v980_v24 }
 0x162 PF: > { %s15_s20 = sadd.s32 1, %s1546_s20   ;;  %s2113_s18 = smov %s1542_s19 }
 0x163   : > { %p12_p6 = scmp.ge.s32.totalorder %s15_s20, 10   ;;  %s2114_s19 = smov %s2116_s21 }
 0x165   :  { %14 = sbr.rel (!%p12_p6) target bundleno = 2 (0x2), region = 70 }

</bundles_post_ra>
